<compile_context>
chip_gen: v6e
topology: v6e:2x2x1
jax: 0.10.0
libtpu: 0.0.40
codegen_flags: <defaults>
</compile_context>

<pallas_src>
import jax
import jax.numpy as jnp
from jax.experimental import pallas as pl
from jax.experimental.pallas import tpu as pltpu

BN_EPS = 1e-5  # torch.nn.BatchNorm1d default eps


def _round_up(x, m):
    return (x + m - 1) // m * m


# ---------------------------------------------------------------------------
# Kernel
# ---------------------------------------------------------------------------
def gwen_kernel(ids_ref, t1_ref, b1_ref, w2_ref, b2_ref, w3_ref, b3_ref, o_ref):
    ids = ids_ref[...]                               # (TM, G) int32, pre-offset by g*vocab
    tm, groups = ids.shape
    gv = t1_ref.shape[0]                             # padded G*VOCAB (multiple of 256)

    # Multi-hot over the packed row space: groups occupy disjoint id ranges (ids were
    # pre-offset in the wrapper), so a boolean OR of the per-group compares is exact.
    col = jax.lax.broadcasted_iota(jnp.int32, (tm, gv), 1)
    mask = col == ids[:, 0:1]
    for g in range(1, groups):                       # groups is small & static
        mask = mask | (col == ids[:, g:g + 1])
    # bool -> f32 -> bf16 (two-step cast is safe on v5e where there is no bf16 VALU).
    hot = mask.astype(jnp.float32).astype(t1_ref.dtype)

    # Fused gather + concat + Linear1 (+ both eval-mode BNs): table was folded into W1
    # offline, so a single one-hot matmul yields the layer-1 pre-activation.
    h = jnp.dot(hot, t1_ref[...], preferred_element_type=jnp.float32) + b1_ref[...]
    h = jnp.maximum(h, 0.0)                          # ReLU; Dropout = identity (eval)

    # Hidden layer 2 (BNs folded in).
    h = jnp.dot(h.astype(w2_ref.dtype), w2_ref[...],
                preferred_element_type=jnp.float32) + b2_ref[...]
    h = jnp.maximum(h, 0.0)

    # Output head, padded to 128 lanes -> unmasked lane-dense store.
    # Sigmoid is applied in the wrapper on the valid lanes only.
    o_ref[...] = jnp.dot(h.astype(w3_ref.dtype), w3_ref[...],
                         preferred_element_type=jnp.float32) + b3_ref[...]


# ---------------------------------------------------------------------------
# Wrapper
# ---------------------------------------------------------------------------
def gwen_forward(ids, params, *, block_rows=512):
    t1, b1 = params["t1"], params["b1"]
    w2, b2 = params["w2"], params["b2"]
    w3, b3 = params["w3p"], params["b3p"]
    num_classes = params["num_classes"]
    vocab = params["vocab"]

    B, G = ids.shape
    c_pad = w3.shape[1]

    # Pre-offset ids into the packed-table row space (g*vocab + id) so the kernel
    # skips the per-group integer adds.
    ids = ids.astype(jnp.int32) + jnp.arange(G, dtype=jnp.int32)[None, :] * vocab

    tm = min(block_rows, _round_up(B, 8))            # row tile (multiple of 8 sublanes)
    b_pad = _round_up(B, tm)
    if b_pad != B:
        ids = jnp.pad(ids, ((0, b_pad - B), (0, 0)))  # padded rows computed then sliced off
    n_tiles = b_pad // tm

    resident = lambda i: (0, 0)                       # weights stay VMEM-resident across tiles

    logits = pl.pallas_call(
        gwen_kernel,
        out_shape=jax.ShapeDtypeStruct((b_pad, c_pad), jnp.float32),
        grid_spec=pltpu.PrefetchScalarGridSpec(
            num_scalar_prefetch=0,
            grid=(n_tiles,),
            in_specs=[
                pl.BlockSpec((tm, G), lambda i: (i, 0)),   # ids tile
                pl.BlockSpec(t1.shape, resident),          # fused table@W1 (bf16)
                pl.BlockSpec(b1.shape, resident),
                pl.BlockSpec(w2.shape, resident),
                pl.BlockSpec(b2.shape, resident),
                pl.BlockSpec(w3.shape, resident),
                pl.BlockSpec(b3.shape, resident),
            ],
            out_specs=pl.BlockSpec((tm, c_pad), lambda i: (i, 0)),
        ),
        compiler_params=pltpu.CompilerParams(
            dimension_semantics=("parallel",),             # batch tiles are independent
            vmem_limit_bytes=32 * 1024 * 1024,
        ),
    )(ids, t1, b1, w2, b2, w3, b3)

    # Sigmoid only on the valid slice (no EUP work on the 127 dead padded lanes).
    return jax.nn.sigmoid(logits[:B, :num_classes])


# ---------------------------------------------------------------------------
# Parameters: raw (torch-equivalent) + folding into kernel layout
# ---------------------------------------------------------------------------
def init_raw_params(key, emb_sizes, hid_dims, num_classes, vocab):
    assert len(hid_dims) == 2, "kernel is specialized to the module's two hidden layers"
    dims = [sum(emb_sizes)] + list(hid_dims)
    k_emb, k_l1, k_l2, k_l3, k_bn = jax.random.split(key, 5)

    # Embedding tables: truncated normal, mean 0.0, stddev 1e-4 (module's initializer).
    std = 1e-4
    emb_tables = []
    for g, e in enumerate(emb_sizes):
        kg = jax.random.fold_in(k_emb, g)
        emb_tables.append(
            std * jax.random.truncated_normal(kg, -2.0, 2.0, (vocab, e), jnp.float32))

    def linear(k, din, dout):
        # torch.nn.Linear default init; weight stored transposed (din, dout) so x @ W + b.
        bound = float(1.0 / (din ** 0.5))
        kw, kb = jax.random.split(k)
        return (jax.random.uniform(kw, (din, dout), jnp.float32, -bound, bound),
                jax.random.uniform(kb, (1, dout), jnp.float32, -bound, bound))

    w1, b1 = linear(k_l1, dims[0], dims[1])
    w2, b2 = linear(k_l2, dims[1], dims[2])
    w3, b3 = linear(k_l3, dims[2], num_classes)

    def bn(k, d):
        # torch defaults are gamma=1, beta=0, mean=0, var=1; randomize so the BN->Linear
        # fold is actually exercised by the reference check (same forward semantics).
        kg, kb_, km, kv = jax.random.split(k, 4)
        return dict(gamma=jax.random.uniform(kg, (1, d), jnp.float32, 0.5, 1.5),
                    beta=jax.random.uniform(kb_, (1, d), jnp.float32, -0.2, 0.2),
                    mean=jax.random.uniform(km, (1, d), jnp.float32, -0.2, 0.2),
                    var=jax.random.uniform(kv, (1, d), jnp.float32, 0.5, 1.5))

    bns = []
    for i, d in enumerate(hid_dims):
        bns.append((bn(jax.random.fold_in(k_bn, 2 * i), d),
                    bn(jax.random.fold_in(k_bn, 2 * i + 1), d)))

    return dict(emb_sizes=list(emb_sizes), emb_tables=emb_tables,
                w=[w1, w2], b=[b1, b2], bns=bns,
                w_out=w3, b_out=b3, num_classes=num_classes)


def fold_params(raw, *, k_align=256):
    nc = raw["num_classes"]
    vocab = raw["emb_tables"][0].shape[0]

    # 1) Fold the two eval-mode BatchNorm1d of each hidden layer into its Linear:
    #    BN(x) = a*x + c  (running stats).
    def bn_affine(p):
        a = p["gamma"] / jnp.sqrt(p["var"] + BN_EPS)
        return a, p["beta"] - p["mean"] * a

    ws, bs = [], []
    for (w, b), (bn_a, bn_b) in zip(zip(raw["w"], raw["b"]), raw["bns"]):
        a1, c1 = bn_affine(bn_a)
        a2, c2 = bn_affine(bn_b)
        a, c = a1 * a2, c1 * a2 + c2              # combined affine of both BNs
        ws.append(w * a)                          # (din, d) * (1, d) column scale
        bs.append(b * a + c)

    # 2) Fold the embedding gather + concat into Linear1 (exact: no nonlinearity between):
    #    T'[g*vocab + i, :] = table_g[i, :] @ W1[rows of group g, :]
    blocks, off = [], 0
    for t in raw["emb_tables"]:
        e = t.shape[1]
        blocks.append(t @ ws[0][off:off + e, :])
        off += e
    t1 = jnp.concatenate(blocks, axis=0)          # (G*VOCAB, H1)

    # 3) Zero-pad the K dim to a multiple of 256 -> whole MXU passes on v6e/v7x
    #    (free: the padded rows are never selected by the multi-hot).
    gv_pad = _round_up(t1.shape[0], k_align)
    t1 = jnp.pad(t1, ((0, gv_pad - t1.shape[0]), (0, 0)))

    # 4) Pad the head to a multiple of 128 lanes for unmasked, lane-dense output stores.
    c_pad = _round_up(max(nc, 128), 128)
    w3p = jnp.pad(raw["w_out"], ((0, 0), (0, c_pad - nc)))
    b3p = jnp.pad(raw["b_out"], ((0, 0), (0, c_pad - nc)))

    # 5) Matmul operands in bf16 (accumulation stays f32 in-kernel); biases stay f32.
    return dict(t1=t1.astype(jnp.bfloat16), b1=bs[0],
                w2=ws[1].astype(jnp.bfloat16), b2=bs[1],
                w3p=w3p.astype(jnp.bfloat16), b3p=b3p,
                num_classes=nc, vocab=vocab)


# ---------------------------------------------------------------------------
# Pure-JAX reference (unfused, unfolded, f32) for correctness checking
# ---------------------------------------------------------------------------
def gwen_reference(ids, raw):
    embs = [jnp.take(t, ids[:, g], axis=0) for g, t in enumerate(raw["emb_tables"])]
    h = jnp.concatenate(embs, axis=1).astype(jnp.float32)
    for (w, b), (bn_a, bn_b) in zip(zip(raw["w"], raw["b"]), raw["bns"]):
        h = h @ w + b
        for p in (bn_a, bn_b):
            h = p["gamma"] * (h - p["mean"]) / jnp.sqrt(p["var"] + BN_EPS) + p["beta"]
        h = jnp.maximum(h, 0.0)
    return jax.nn.sigmoid(h @ raw["w_out"] + raw["b_out"])


if __name__ == "__main__":
    emb_sizes = [8, 16, 8]     # per-group embedding dims -> concat dim 32
    hid_dims = [32, 16]
    num_classes = 1
    vocab = 64
    batch = 1024               # 2 grid tiles of 512 rows (exercises residency + tiling)

    key = jax.random.PRNGKey(0)
    kp, kx = jax.random.split(key)
    raw = init_raw_params(kp, emb_sizes, hid_dims, num_classes, vocab)
    params = fold_params(raw)
    ids = jax.random.randint(kx, (batch, len(emb_sizes)), 0, vocab, jnp.int32)

    out = jax.block_until_ready(gwen_forward(ids, params, block_rows=512))
    ref = jax.block_until_ready(gwen_reference(ids, raw))

    assert out.shape == (batch, num_classes)
    assert bool(jnp.all(jnp.isfinite(out)))
    # bf16 matmul operands (f32 accumulation) -> tolerance relaxed slightly vs pure-f32.
    assert bool(jnp.allclose(out, ref, atol=2e-3, rtol=2e-3)), \
        float(jnp.max(jnp.abs(out - ref)))
    print("KERNEL_OK")
</pallas_src>

<mosaic_0001>
module attributes {stable_mosaic.version = 11 : i64} {
  func.func @gwen_kernel(%arg0: i32, %arg1: memref<512x3xi32, #tpu.memory_space<vmem>>, %arg2: memref<256x32xbf16, #tpu.memory_space<vmem>>, %arg3: memref<1x32xf32, #tpu.memory_space<vmem>>, %arg4: memref<32x16xbf16, #tpu.memory_space<vmem>>, %arg5: memref<1x16xf32, #tpu.memory_space<vmem>>, %arg6: memref<16x128xbf16, #tpu.memory_space<vmem>>, %arg7: memref<1x128xf32, #tpu.memory_space<vmem>>, %arg8: memref<512x128xf32, #tpu.memory_space<vmem>>) attributes {dimension_semantics = [#tpu.dimension_semantics<parallel>], iteration_bounds = array<i64: 2>, scalar_prefetch = 0 : i64, scratch_operands = 0 : i64, tpu.core_type = #tpu.core_type<tc>, window_params = [{transform_indices = @transform_0, window_bounds = array<i64: 512, 3>}, {pipeline_mode = #tpu.pipeline_mode<synchronous>, transform_indices = @transform_1, window_bounds = array<i64: 256, 32>}, {pipeline_mode = #tpu.pipeline_mode<synchronous>, transform_indices = @transform_2, window_bounds = array<i64: 1, 32>}, {pipeline_mode = #tpu.pipeline_mode<synchronous>, transform_indices = @transform_3, window_bounds = array<i64: 32, 16>}, {pipeline_mode = #tpu.pipeline_mode<synchronous>, transform_indices = @transform_4, window_bounds = array<i64: 1, 16>}, {pipeline_mode = #tpu.pipeline_mode<synchronous>, transform_indices = @transform_5, window_bounds = array<i64: 16, 128>}, {pipeline_mode = #tpu.pipeline_mode<synchronous>, transform_indices = @transform_6, window_bounds = array<i64: 1, 128>}, {transform_indices = @transform_7, window_bounds = array<i64: 512, 128>}]} {
    %c0 = arith.constant 0 : index
    %c0_0 = arith.constant 0 : index
    %0 = vector.load %arg1[%c0, %c0_0] : memref<512x3xi32, #tpu.memory_space<vmem>>, vector<512x3xi32>
    %1 = tpu.iota {dimensions = array<i32: 1>} : vector<512x256xi32>
    %2 = vector.extract_strided_slice %0 {offsets = [0, 0], sizes = [512, 1], strides = [1, 1]} : vector<512x3xi32> to vector<512x1xi32>
    %3 = vector.broadcast %2 : vector<512x1xi32> to vector<512x256xi32>
    %4 = arith.cmpi eq, %1, %3 : vector<512x256xi32>
    %5 = vector.extract_strided_slice %0 {offsets = [0, 1], sizes = [512, 1], strides = [1, 1]} : vector<512x3xi32> to vector<512x1xi32>
    %6 = vector.broadcast %5 : vector<512x1xi32> to vector<512x256xi32>
    %7 = arith.cmpi eq, %1, %6 : vector<512x256xi32>
    %8 = arith.ori %4, %7 : vector<512x256xi1>
    %9 = vector.extract_strided_slice %0 {offsets = [0, 2], sizes = [512, 1], strides = [1, 1]} : vector<512x3xi32> to vector<512x1xi32>
    %10 = vector.broadcast %9 : vector<512x1xi32> to vector<512x256xi32>
    %11 = arith.cmpi eq, %1, %10 : vector<512x256xi32>
    %12 = arith.ori %8, %11 : vector<512x256xi1>
    %13 = arith.extui %12 : vector<512x256xi1> to vector<512x256xi32>
    %14 = arith.sitofp %13 : vector<512x256xi32> to vector<512x256xf32>
    %15 = arith.truncf %14 : vector<512x256xf32> to vector<512x256xbf16>
    %c0_1 = arith.constant 0 : index
    %c0_2 = arith.constant 0 : index
    %16 = vector.load %arg2[%c0_1, %c0_2] : memref<256x32xbf16, #tpu.memory_space<vmem>>, vector<256x32xbf16>
    %cst = arith.constant dense<0.000000e+00> : vector<512x32xf32>
    %17 = tpu.matmul %15, %16, %cst {dimension_numbers = #tpu.dot_dimension_numbers<[1], [0], [0], [1], [0, 0, 1, 1], [], []>} : vector<512x256xbf16>, vector<256x32xbf16>, vector<512x32xf32> -> vector<512x32xf32>
    %c0_3 = arith.constant 0 : index
    %c0_4 = arith.constant 0 : index
    %18 = vector.load %arg3[%c0_3, %c0_4] : memref<1x32xf32, #tpu.memory_space<vmem>>, vector<1x32xf32>
    %19 = vector.broadcast %18 : vector<1x32xf32> to vector<512x32xf32>
    %20 = arith.addf %17, %19 : vector<512x32xf32>
    %cst_5 = arith.constant 0.000000e+00 : f32
    %21 = vector.broadcast %cst_5 : f32 to vector<512x32xf32>
    %22 = arith.maximumf %20, %21 : vector<512x32xf32>
    %23 = arith.truncf %22 : vector<512x32xf32> to vector<512x32xbf16>
    %c0_6 = arith.constant 0 : index
    %c0_7 = arith.constant 0 : index
    %24 = vector.load %arg4[%c0_6, %c0_7] : memref<32x16xbf16, #tpu.memory_space<vmem>>, vector<32x16xbf16>
    %cst_8 = arith.constant dense<0.000000e+00> : vector<512x16xf32>
    %25 = tpu.matmul %23, %24, %cst_8 {dimension_numbers = #tpu.dot_dimension_numbers<[1], [0], [0], [1], [0, 0, 1, 1], [], []>} : vector<512x32xbf16>, vector<32x16xbf16>, vector<512x16xf32> -> vector<512x16xf32>
    %c0_9 = arith.constant 0 : index
    %c0_10 = arith.constant 0 : index
    %26 = vector.load %arg5[%c0_9, %c0_10] : memref<1x16xf32, #tpu.memory_space<vmem>>, vector<1x16xf32>
    %27 = vector.broadcast %26 : vector<1x16xf32> to vector<512x16xf32>
    %28 = arith.addf %25, %27 : vector<512x16xf32>
    %cst_11 = arith.constant 0.000000e+00 : f32
    %29 = vector.broadcast %cst_11 : f32 to vector<512x16xf32>
    %30 = arith.maximumf %28, %29 : vector<512x16xf32>
    %31 = arith.truncf %30 : vector<512x16xf32> to vector<512x16xbf16>
    %c0_12 = arith.constant 0 : index
    %c0_13 = arith.constant 0 : index
    %32 = vector.load %arg6[%c0_12, %c0_13] : memref<16x128xbf16, #tpu.memory_space<vmem>>, vector<16x128xbf16>
    %cst_14 = arith.constant dense<0.000000e+00> : vector<512x128xf32>
    %33 = tpu.matmul %31, %32, %cst_14 {dimension_numbers = #tpu.dot_dimension_numbers<[1], [0], [0], [1], [0, 0, 1, 1], [], []>} : vector<512x16xbf16>, vector<16x128xbf16>, vector<512x128xf32> -> vector<512x128xf32>
    %c0_15 = arith.constant 0 : index
    %c0_16 = arith.constant 0 : index
    %34 = vector.load %arg7[%c0_15, %c0_16] : memref<1x128xf32, #tpu.memory_space<vmem>>, vector<1x128xf32>
    %35 = vector.broadcast %34 : vector<1x128xf32> to vector<512x128xf32>
    %36 = arith.addf %33, %35 : vector<512x128xf32>
    %c0_17 = arith.constant 0 : index
    %c0_18 = arith.constant 0 : index
    %37 = vector.load %arg8[%c0_17, %c0_18] : memref<512x128xf32, #tpu.memory_space<vmem>>, vector<512x128xf32>
    tpu.vector_store %arg8[%c0_17, %c0_18], %36 {strides = array<i32>} : memref<512x128xf32, #tpu.memory_space<vmem>>, vector<512x128xf32>,
    return
  }
  func.func @transform_0(%arg0: i32) -> (i32, i32) {
    %c0_i32 = arith.constant 0 : i32
    %c0_i32_0 = arith.constant 0 : i32
    return %arg0, %c0_i32 : i32, i32
  }
  func.func @transform_1(%arg0: i32) -> (i32, i32) {
    %c0_i32 = arith.constant 0 : i32
    %c0_i32_0 = arith.constant 0 : i32
    %c0_i32_1 = arith.constant 0 : i32
    return %c0_i32, %c0_i32_0 : i32, i32
  }
  func.func @transform_2(%arg0: i32) -> (i32, i32) {
    %c0_i32 = arith.constant 0 : i32
    %c0_i32_0 = arith.constant 0 : i32
    %c0_i32_1 = arith.constant 0 : i32
    return %c0_i32, %c0_i32_0 : i32, i32
  }
  func.func @transform_3(%arg0: i32) -> (i32, i32) {
    %c0_i32 = arith.constant 0 : i32
    %c0_i32_0 = arith.constant 0 : i32
    %c0_i32_1 = arith.constant 0 : i32
    return %c0_i32, %c0_i32_0 : i32, i32
  }
  func.func @transform_4(%arg0: i32) -> (i32, i32) {
    %c0_i32 = arith.constant 0 : i32
    %c0_i32_0 = arith.constant 0 : i32
    %c0_i32_1 = arith.constant 0 : i32
    return %c0_i32, %c0_i32_0 : i32, i32
  }
  func.func @transform_5(%arg0: i32) -> (i32, i32) {
    %c0_i32 = arith.constant 0 : i32
    %c0_i32_0 = arith.constant 0 : i32
    %c0_i32_1 = arith.constant 0 : i32
    return %c0_i32, %c0_i32_0 : i32, i32
  }
  func.func @transform_6(%arg0: i32) -> (i32, i32) {
    %c0_i32 = arith.constant 0 : i32
    %c0_i32_0 = arith.constant 0 : i32
    %c0_i32_1 = arith.constant 0 : i32
    return %c0_i32, %c0_i32_0 : i32, i32
  }
  func.func @transform_7(%arg0: i32) -> (i32, i32) {
    %c0_i32 = arith.constant 0 : i32
    %c0_i32_0 = arith.constant 0 : i32
    return %arg0, %c0_i32 : i32, i32
  }
}

</mosaic_0001>

<bundles_post_ra>
// kernel: tpu_custom_call.1
= control target key start
LH: loop header
LB: loop body
LE: loop exit
PB: predicated region body
PF: predicated region fallthrough
CT: control target
= control target key end

     0   :  { %12 = vsyncpa [#allocation3], 0  ;;  %s6227_s0 = inlined_call_operand.vmem [shape: s32[1024,3], index: 0, kind: input, shape index: {}]   ;;  %s6228_s1 = inlined_call_operand.vmem [shape: bf16[256,32], index: 1, kind: input, shape index: {}]   ;;  %s6229_s2 = inlined_call_operand.vmem [shape: f32[1,32], index: 2, kind: input, shape index: {}]   ;;  %s6230_s3 = inlined_call_operand.vmem [shape: bf16[32,16], index: 3, kind: input, shape index: {}]   ;;  %s6231_s4 = inlined_call_operand.vmem [shape: f32[1,16], index: 4, kind: input, shape index: {}]   ;;  %s6232_s5 = inlined_call_operand.vmem [shape: bf16[16,128], index: 5, kind: input, shape index: {}]   ;;  %s6233_s6 = inlined_call_operand.vmem [shape: f32[1,128], index: 6, kind: input, shape index: {}]   ;;  %s6234_s7 = inlined_call_operand.hbm [shape: f32[1024,128], index: 7, kind: output, shape index: {}]  }
   0x1   :  { %14 = vsyncpa [#allocation3 + $0x1], 0  ;;  %s4285_s24 = smov 0   ;;  %s4287_s25 = smov 0  }
   0x2   :  { %s4289_s26 = smov 0   ;;  %s4291_s27 = smov 0  }
   0x3 LB: > { %s4306_s28 = sadd.s32 4294967295, %s4236_s27   ;;  %s3450_s29 = sadd.s32 4294967294, %s4236_s27   ;;  %s4236_s27 = sphi %s4291_s27, %s6328_s27   ;;  %s4232_s26 = sphi %s4289_s26, %s6327_s26   ;;  %s4228_s25 = sphi %s4287_s25, %s6326_s25   ;;  %s4224_s24 = sphi %s4285_s24, %s6325_s24  }
   0x4   : > { %s4310_s30 = sadd.s32 1, %s4236_s27   ;;  %s179_s8 = sadd.s32 1, %s4232_s26 }
   0x5   : > { %s176_s9 = ssub.s32 %s4236_s27, %s4310_s30  ;;  %p189_p0 = scmp.ne.s32.totalorder %s4232_s26, %s4228_s25 }
   0x6   : > { %p177_p1 = scmp.eq.s32.totalorder %s176_s9, 0  ;;  %p190_p2 = scmp.eq.s32.totalorder %s4306_s28, 1 }
   0x7   : > { %p195_p3 = scmp.ne.s32.totalorder %s4228_s25, %s4224_s24  ;;  %p196_p4 = scmp.eq.s32.totalorder %s3450_s29, 1 }
   0x8   : > { %s4321_s10 = scalar_select %p177_p1, %s4232_s26, %s179_s8  }
   0x9   : > { %p4323_p5 = por %p190_p2, %p189_p0  ;;  %p4327_p6 = por %p196_p4, %p195_p3 }
   0xa   : > { %p3453_p7 = scmp.ge.s32.totalorder %s4236_s27, 1  ;;  %p241_p8 = scmp.lt.s32.totalorder %s4236_s27, 3 }
   0xc   : > { %p242_p9 = pnand %p3453_p7, %p241_p8 }
   0xd   : > { %s3455_s13 = sshll.u32 (!%p242_p9), %s4306_s28, 6  ;;  %s270_s22 = sand.u32 (!%p242_p9), 1, %s4228_s25  }
   0xe   : > { %245 = sbr.rel (%p242_p9) target bundleno = 1375 (0x55f), region = 48  ;;  %p274_p10 = scmp.lt.s32.totalorder (!%p242_p9), %s3455_s13, 127 }
   0xf   : > { %s3454_s23 = sshll.u32 (!%p242_p9), %s270_s22, 9 }
  0x10   : > { %s6045_s9 = scalar_lea.vmem (!%p242_p9), [#allocation2], %s3454_s23 }
  0x11   : > { %s3388_s14 = sshll.u32 (!%p242_p9), %s6045_s9, 4  ;;  %s6180_s14 = int_to_ptr.vmem [resolvable:$true] %s3388_s14 }
  0x12   : > { %s4176_s17 = scalar_lea.vmem (!%p242_p9), %s6180_s14, 8192 }
  0x13   : > { %v4238_v0 = vmov 2   ;;  %v4239_v1 = vmov 1   ;;  %v4155_v2 = vld [vmem:[%s6228_s1 + $0x38] sm:$0xff]   ;;  %v4240_v3 = vmov 0   ;;  %s6330_s13 = smov (!%p274_p10, %s3455_s13), 127  ;;  %v4156_v4 = vld [vmem:[%s6228_s1 + $0x30] sm:$0xff]   ;;  %v345_v61 = vlaneseq  ;;  %p4177_p11 = scmp.ne.s32.totalorder %s6180_s14, %s4176_s17 }
  0x14   : > { %4052 = vset.pattern.permute.xlu0 %v4238_v0  ;;  %4051 = vset.pattern.permute.xlu1 %v4239_v1  ;;  %s3456_s18 = sshll.u32 %s6330_s13, 3  ;;  %v4157_v6 = vld [vmem:[%s6228_s1 + $0x28] sm:$0xff]   ;;  %v4158_v9 = vld [vmem:[%s6228_s1 + $0x20] sm:$0xff]   ;;  %v4159_v11 = vld [vmem:[%s6228_s1 + $0x18] sm:$0xff]   ;;  %s3804_s13 = sshll.u32 %s4306_s28, 13 }
  0x15   : > { %2019 = vmatprep.subr.bf16.mxu0 %v4240_v3  ;;  %s4347_s21 = scalar_lea.vmem %s6227_s0, %s3456_s18  ;;  %v4160_v13 = vld [vmem:[%s6228_s1 + $0x10] sm:$0xff]   ;;  %v4161_v15 = vld [vmem:[%s6228_s1 + $0x8] sm:$0xff]   ;;  %v4162_v17 = vld [vmem:[%s6228_s1] sm:$0xff]   ;;  %s6178_s16 = scalar_lea.hbm %s6234_s7, %s3804_s13 }
  0x16   : > { %2020 = vmatpush1.bf16.msra.mxu0 %v4155_v2  ;;  %v281_v5 = vld [vmem:[%s4347_s21] sm:$0xff]  ;;  %v283_v7 = vld [vmem:[%s4347_s21 + $0x10] sm:$0xff]  ;;  %v282_v8 = vld [vmem:[%s4347_s21 + $0x8] sm:$0xff]  ;;  %s6187_s28 = scalar_lea.sflag [#allocation3], %s270_s22  ;;  %p4178_p12 = pnand %p4177_p11, %p4323_p5 }
  0x17   : > { %2021 = vmatprep.subr.bf16.mxu0 %v4240_v3  ;;  %1117 = vperm.xlu0 %4052, %v281_v5   ;;  %v285_v10 = vld [vmem:[%s4347_s21 + $0x20] sm:$0xff]  ;;  %v4366_v12 = vld [vmem:[%s4347_s21 + $0x30] sm:$0xff]  ;;  %v284_v18 = vld [vmem:[%s4347_s21 + $0x18] sm:$0xff]  ;;  %s4242_s18 = smov [#allocation2]  }
  0x18   : > { %669 = vperm.xlu1 %4051, %v281_v5   ;;  %v4373_v14 = vld [vmem:[%s4347_s21 + $0x40] sm:$0xff]  ;;  %v4384_v16 = vld [vmem:[%s4347_s21 + $0x50] sm:$0xff]  ;;  %v4163_v20 = vld [vmem:[%s6228_s1 + $0x78] sm:$0xff]   ;;  %p4179_p13 = pneg %p4178_p12  ;;  %s4180_s19 = sshll.u32 %s4242_s18, 4  ;;  %s4181_s19 = int_to_ptr.vmem [resolvable:$false] %s4180_s19 }
  0x19   : > { %v4394_v19 = vld [vmem:[%s4347_s21 + $0x60] sm:$0xff]  ;;  %v4164_v21 = vld [vmem:[%s6228_s1 + $0x70] sm:$0xff]   ;;  %v4165_v22 = vld [vmem:[%s6228_s1 + $0x68] sm:$0xff]   ;;  %s4182_s20 = scalar_lea.vmem %s4181_s19, 16384  ;;  %p4183_p0 = scmp.lt.s32.totalorder %s6180_s14, %s4181_s19 }
  0x1a   : > { %2022 = vmatpush1.bf16.msra.mxu0 %v4156_v4  ;;  %v4166_v23 = vld [vmem:[%s6228_s1 + $0x60] sm:$0xff]   ;;  %v286_v24 = vld [vmem:[%s4347_s21 + $0x28] sm:$0xff]  ;;  %v4167_v25 = vld [vmem:[%s6228_s1 + $0x58] sm:$0xff]   ;;  %v4559_v4 = vand.u32 127, %v345_v61  ;;  %p4184_p1 = scmp.lt.s32.totalorder %s4182_s20, %s4176_s17 }
  0x1b   : > { %2023 = vmatprep.subr.bf16.mxu0 %v4240_v3  ;;  %1123 = vperm.xlu0 %4052, %v283_v7   ;;  %v288_v26 = vld [vmem:[%s4347_s21 + $0x38] sm:$0xff]  ;;  %v4168_v27 = vld [vmem:[%s6228_s1 + $0x50] sm:$0xff]   ;;  %v290_v28 = vld [vmem:[%s4347_s21 + $0x48] sm:$0xff] }
  0x1c   : > { %672 = vperm.xlu1 %4051, %v282_v8   ;;  %v4169_v29 = vld [vmem:[%s6228_s1 + $0x48] sm:$0xff]   ;;  %v292_v30 = vld [vmem:[%s4347_s21 + $0x58] sm:$0xff]  ;;  %v4170_v31 = vld [vmem:[%s6228_s1 + $0x40] sm:$0xff]   ;;  %p4185_p2 = por %p4184_p1, %p4183_p0 }
  0x1d   : > { %v294_v32 = vld [vmem:[%s4347_s21 + $0x68] sm:$0xff]  ;;  %v4444_v33 = vld [vmem:[%s4347_s21 + $0x78] sm:$0xff]  ;;  %v295_v40 = vld [vmem:[%s4347_s21 + $0x70] sm:$0xff] }
  0x1e   : > { %2024 = vmatpush1.bf16.msra.mxu0 %v4157_v6  ;;  %v4448_v34 = vld [vmem:[%s4347_s21 + $0x88] sm:$0xff]  ;;  %v4453_v35 = vld [vmem:[%s4347_s21 + $0x98] sm:$0xff]  ;;  %v4482_v41 = vld [vmem:[%s4347_s21 + $0x80] sm:$0xff]  ;;  %p4186_p3 = pnand %p4185_p2, %p4179_p13 }
  0x1f   : > { %2025 = vmatprep.subr.bf16.mxu0 %v4240_v3  ;;  %1129 = vperm.xlu0 %4052, %v285_v10   ;;  %v4458_v36 = vld [vmem:[%s4347_s21 + $0xa8] sm:$0xff]  ;;  %v4463_v37 = vld [vmem:[%s4347_s21 + $0xb8] sm:$0xff]  ;;  %v4488_v42 = vld [vmem:[%s4347_s21 + $0x90] sm:$0xff] }
  0x20   : > { %4053 = vset.pattern.permute.xlu1 %v4238_v0  ;;  %v4469_v38 = vld [vmem:[%s4347_s21 + $0xc8] sm:$0xff]  ;;  %v4473_v39 = vld [vmem:[%s4347_s21 + $0xd8] sm:$0xff]  ;;  %v4492_v43 = vld [vmem:[%s4347_s21 + $0xa0] sm:$0xff] }
  0x21   : > { %1120 = vperm.xlu1 %4053, %v282_v8   ;;  %v4497_v44 = vld [vmem:[%s4347_s21 + $0xb0] sm:$0xff]  ;;  %v4503_v45 = vld [vmem:[%s4347_s21 + $0xc0] sm:$0xff]  ;;  %v4553_v63 = vld [vmem:[%s4347_s21 + $0xe8] sm:$0xff] }
  0x22   : > { %2026 = vmatpush1.bf16.msra.mxu0 %v4158_v9  ;;  %v4509_v46 = vld [vmem:[%s4347_s21 + $0xd0] sm:$0xff]  ;;  %v4513_v47 = vld [vmem:[%s4347_s21 + $0xe0] sm:$0xff] }
  0x23   : > { %2027 = vmatprep.subr.bf16.mxu0 %v4240_v3  ;;  %1135 = vperm.xlu0 %4052, %v4366_v12   ;;  %v4520_v50 = vld [vmem:[%s4347_s21 + $0xf0] sm:$0xff]  ;;  %v4529_v53 = vld [vmem:[%s4347_s21 + $0x100] sm:$0xff] }
  0x24   : > { %v4540_v57 = vld [vmem:[%s4347_s21 + $0x110] sm:$0xff]  ;;  %v4545_v59 = vld [vmem:[%s4347_s21 + $0x120] sm:$0xff] }
  0x25   : > { %4054 = vset.pattern.permute.xlu1 %v4240_v3 }
  0x26   : > { %2028 = vmatpush1.bf16.msra.mxu0 %v4159_v11  ;;  %355 = vperm.xlu1 %4054, %v283_v7  }
  0x27   : > { %2029 = vmatprep.subr.bf16.mxu0 %v4240_v3  ;;  %1141 = vperm.xlu0 %4052, %v4373_v14  }
  0x2a   : > { %2030 = vmatpush1.bf16.msra.mxu0 %v4160_v13  ;;  %4055 = vset.pattern.permute.xlu1 %v4239_v1 }
  0x2b   : > { %2031 = vmatprep.subr.bf16.mxu0 %v4240_v3  ;;  %675 = vperm.xlu1 %4055, %v283_v7   ;;  %v4566_v7 = vadd.s32 128, %v4559_v4 }
  0x2c   : > { %1147 = vperm.xlu0 %4052, %v4384_v16  }
  0x2e   : > { %2032 = vmatpush1.bf16.msra.mxu0 %v4161_v15 }
  0x2f   : > { %2033 = vmatprep.subr.bf16.mxu0 %v4240_v3  ;;  %678 = vperm.xlu1 %4055, %v284_v18  }
  0x30   : > { %1153 = vperm.xlu0 %4052, %v4394_v19  }
  0x32   : > { %2034 = vmatpush1.bf16.msra.mxu0 %v4162_v17  ;;  %v4172_v17 = vld [vmem:[%s6230_s3] sm:$0xff]  }
  0x33   : > { %2035 = vmatprep.subr.bf16.mxu0 %v4240_v3  ;;  %4056 = vset.pattern.permute.xlu1 %v4238_v0 }
  0x34   : > { %4071 = vset.pattern.permute.xlu0 %v4240_v3  ;;  %1126 = vperm.xlu1 %4056, %v284_v18  }
  0x35   : > { %349 = vperm.xlu0 %4071, %v281_v5  }
  0x36   : > { %2036 = vmatpush2.bf16.msra.mxu0 %v4163_v20  ;;  %v4241_v20 = vmov 1.0|1.0  }
  0x37   : > { %2037 = vmatprep.subr.bf16.mxu0 %v4240_v3 }
  0x38   : > { %4057 = vset.pattern.permute.xlu1 %v4240_v3 }
  0x39   : > { %352 = vperm.xlu0 %4071, %v282_v8   ;;  %361 = vperm.xlu1 %4057, %v285_v10  }
  0x3a   : > { %2038 = vmatpush2.bf16.msra.mxu0 %v4164_v21 }
  0x3b   : > { %2039 = vmatprep.subr.bf16.mxu0 %v4240_v3 }
  0x3d   : > { %358 = vperm.xlu0 %4071, %v284_v18   ;;  %4058 = vset.pattern.permute.xlu1 %v4239_v1  ;;  %v4619_v18 = vld [vmem:[%s4347_s21 + $0xf8] sm:$0xff] }
  0x3e   : > { %2040 = vmatpush2.bf16.msra.mxu0 %v4165_v22  ;;  %681 = vperm.xlu1 %4058, %v285_v10  }
  0x3f   : > { %2041 = vmatprep.subr.bf16.mxu0 %v4240_v3 }
  0x41   : > { %364 = vperm.xlu0 %4071, %v286_v24  }
  0x42   : > { %2042 = vmatpush2.bf16.msra.mxu0 %v4166_v23  ;;  %684 = vperm.xlu1 %4058, %v286_v24   ;;  %v4885_v23 = vld [vmem:[%s4347_s21 + $0x140] sm:$0xff] }
  0x43   : > { %2043 = vmatprep.subr.bf16.mxu0 %v4240_v3 }
  0x45   : > { %370 = vperm.xlu0 %4071, %v288_v26  }
  0x46   : > { %2044 = vmatpush2.bf16.msra.mxu0 %v4167_v25  ;;  %4059 = vset.pattern.permute.xlu1 %v4238_v0 }
  0x47   : > { %2045 = vmatprep.subr.bf16.mxu0 %v4240_v3  ;;  %1132 = vperm.xlu1 %4059, %v286_v24  }
  0x49   : > { %376 = vperm.xlu0 %4071, %v290_v28  }
  0x4a   : > { %2046 = vmatpush2.bf16.msra.mxu0 %v4168_v27 }
  0x4b   : > { %2047 = vmatprep.subr.bf16.mxu0 %v4240_v3  ;;  %4060 = vset.pattern.permute.xlu1 %v4240_v3 }
  0x4c   : > { %367 = vperm.xlu1 %4060, %v4366_v12  }
  0x4d   : > { %382 = vperm.xlu0 %4071, %v292_v30  }
  0x4e   : > { %2048 = vmatpush2.bf16.msra.mxu0 %v4169_v29 }
  0x4f   : > { %2049 = vmatprep.subr.bf16.mxu0 %v4240_v3 }
  0x50   : > { %4061 = vset.pattern.permute.xlu1 %v4239_v1 }
  0x51   : > { %687 = vperm.xlu1 %4061, %v4366_v12   ;;  %388 = vperm.xlu0 %4071, %v294_v32  }
  0x52   : > { %2050 = vmatpush2.bf16.msra.mxu0 %v4170_v31 }
  0x55   : > { %690 = vperm.xlu1 %4061, %v288_v26   ;;  %394 = vperm.xlu0 %4071, %v4444_v33  }
  0x59   : > { %4062 = vset.pattern.permute.xlu1 %v4238_v0  ;;  %400 = vperm.xlu0 %4071, %v4448_v34  }
  0x5a   : > { %1138 = vperm.xlu1 %4062, %v288_v26  }
  0x5d   : > { %406 = vperm.xlu0 %4071, %v4453_v35  }
  0x5e   : > { %4063 = vset.pattern.permute.xlu1 %v4240_v3 }
  0x5f   : > { %373 = vperm.xlu1 %4063, %v4373_v14  }
  0x61   : > { %412 = vperm.xlu0 %4071, %v4458_v36  }
  0x63   : > { %4064 = vset.pattern.permute.xlu1 %v4239_v1 }
  0x64   : > { %693 = vperm.xlu1 %4064, %v4373_v14   ;;  %v5092_v14 = vld [vmem:[%s6229_s2] ss:$0 sm:$0xff] }
  0x65   : > { %418 = vperm.xlu0 %4071, %v4463_v37  }
  0x68   : > { %696 = vperm.xlu1 %4064, %v290_v28  }
  0x69   : > { %424 = vperm.xlu0 %4071, %v4469_v38  }
  0x6c   : > { %4065 = vset.pattern.permute.xlu1 %v4238_v0 }
  0x6d   : > { %1144 = vperm.xlu1 %4065, %v290_v28   ;;  %430 = vperm.xlu0 %4071, %v4473_v39   ;;  %v4699_v28 = vld [vmem:[%s4347_s21 + $0x108] sm:$0xff] }
  0x71   : > { %4066 = vset.pattern.permute.xlu1 %v4240_v3  ;;  %4092 = vset.pattern.permute.xlu0 %v4238_v0 }
  0x72   : > { %379 = vperm.xlu1 %4066, %v4384_v16   ;;  %1159 = vperm.xlu0 %4092, %v295_v40  }
  0x76   : > { %4067 = vset.pattern.permute.xlu1 %v4239_v1  ;;  %1165 = vperm.xlu0 %4092, %v4482_v41  }
  0x77   : > { %699 = vperm.xlu1 %4067, %v4384_v16  }
  0x7a   : > { %1171 = vperm.xlu0 %4092, %v4488_v42  }
  0x7b   : > { %702 = vperm.xlu1 %4067, %v292_v30  }
  0x7e   : > { %1177 = vperm.xlu0 %4092, %v4492_v43  }
  0x7f   : > { %4068 = vset.pattern.permute.xlu1 %v4238_v0 }
  0x80   : > { %1150 = vperm.xlu1 %4068, %v292_v30  }
  0x82   : > { %1183 = vperm.xlu0 %4092, %v4497_v44  }
  0x84   : > { %4069 = vset.pattern.permute.xlu1 %v4240_v3 }
  0x85   : > { %385 = vperm.xlu1 %4069, %v4394_v19  }
  0x86   : > { %1189 = vperm.xlu0 %4092, %v4503_v45  }
  0x89   : > { %4070 = vset.pattern.permute.xlu1 %v4239_v1 }
  0x8a   : > { %705 = vperm.xlu1 %4070, %v4394_v19   ;;  %1195 = vperm.xlu0 %4092, %v4509_v46  }
  0x8e   : > { %708 = vperm.xlu1 %4070, %v294_v32   ;;  %1201 = vperm.xlu0 %4092, %v4513_v47  }
  0x92   : > { %4072 = vset.pattern.permute.xlu1 %v4238_v0  ;;  %v4517_v49 = vpop.permute.xlu0 %1117  ;;  %1207 = vperm.xlu0 %4092, %v4520_v50  }
  0x93   : > { %1156 = vperm.xlu1 %4072, %v294_v32   ;;  %v670_v48 = vpop.permute.xlu1 %669  ;;  %vm1309_vm9 = vcmp.eq.s32.totalorder %v4566_v7, %v4517_v49  ;;  %v4943_v32 = vld [vmem:[%s4347_s21 + $0x160] sm:$0xff] }
  0x94   : > { %vm861_vm6 = vcmp.eq.s32.totalorder %v4566_v7, %v670_v48  ;;  %vm860_vm10 = vcmp.eq.s32.totalorder %v4559_v4, %v670_v48 }
  0x96   : > { %v4526_v52 = vpop.permute.xlu0 %1123  ;;  %1213 = vperm.xlu0 %4092, %v4529_v53  }
  0x97   : > { %4073 = vset.pattern.permute.xlu1 %v4240_v3  ;;  %v4524_v51 = vpop.permute.xlu1 %672  ;;  %vm1313_vm12 = vcmp.eq.s32.totalorder %v4566_v7, %v4526_v52 }
  0x98   : > { %391 = vperm.xlu1 %4073, %v295_v40   ;;  %vm863_vm15 = vcmp.eq.s32.totalorder %v4566_v7, %v4524_v51 }
  0x9a   : > { %v4532_v54 = vpop.permute.xlu0 %1129  ;;  %1219 = vperm.xlu0 %4092, %v4540_v57  }
  0x9c   : > { %4074 = vset.pattern.permute.xlu1 %v4239_v1  ;;  %v4535_v55 = vpop.permute.xlu1 %1120 }
  0x9d   : > { %711 = vperm.xlu1 %4074, %v295_v40  }
  0x9e   : > { %v4537_v56 = vpop.permute.xlu0 %1135  ;;  %1225 = vperm.xlu0 %4092, %v4545_v59  }
  0xa1   : > { %714 = vperm.xlu1 %4074, %v4444_v33   ;;  %v356_v58 = vpop.permute.xlu1 %355 }
  0xa2   : > { %v4547_v60 = vpop.permute.xlu0 %1141  ;;  %4109 = vset.pattern.permute.xlu0 %v4240_v3  ;;  %vm544_vm1 = vcmp.eq.s32.totalorder %v4559_v4, %v356_v58  ;;  %vm545_vm7 = vcmp.eq.s32.totalorder %v4566_v7, %v356_v58 }
  0xa3   : > { %436 = vperm.xlu0 %4109, %v4553_v63  }
  0xa5   : > { %4075 = vset.pattern.permute.xlu1 %v4238_v0 }
  0xa6   : > { %1162 = vperm.xlu1 %4075, %v4444_v33   ;;  %v676_v62 = vpop.permute.xlu1 %675 }
  0xa7   : > { %v4555_v2 = vpop.permute.xlu0 %1147  ;;  %vm864_vm0 = vcmp.eq.s32.totalorder %v4559_v4, %v676_v62  ;;  %vm865_vm2 = vcmp.eq.s32.totalorder %v4566_v7, %v676_v62  ;;  %442 = vperm.xlu0 %4109, %v4619_v18  }
  0xa8   : > { %vm4576_vm4 = vmor %vm544_vm1, %vm864_vm0  ;;  %vm1308_vm1 = vcmp.eq.s32.totalorder %v4559_v4, %v4517_v49 }
  0xa9   : > { %vm4586_vm11 = vmor %vm545_vm7, %vm865_vm2 }
  0xaa   : > { %4076 = vset.pattern.permute.xlu1 %v4240_v3  ;;  %v679_v5 = vpop.permute.xlu1 %678  ;;  %vm4614_vm7 = vmor %vm4586_vm11, %vm1313_vm12  ;;  %vm862_vm11 = vcmp.eq.s32.totalorder %v4559_v4, %v4524_v51  ;;  %v4762_v51 = vld [vmem:[%s4347_s21 + $0x128] sm:$0xff] }
  0xab   : > { %397 = vperm.xlu1 %4076, %v4482_v41   ;;  %v4563_v6 = vpop.permute.xlu0 %1153  ;;  %448 = vperm.xlu0 %4109, %v4699_v28  }
  0xaf   : > { %4077 = vset.pattern.permute.xlu1 %v4239_v1  ;;  %v4570_v8 = vpop.permute.xlu1 %1126 }
  0xb0   : > { %v350_v9 = vpop.permute.xlu0 %349  ;;  %717 = vperm.xlu1 %4077, %v4482_v41  }
  0xb1   : > { %vm541_vm3 = vcmp.eq.s32.totalorder %v4566_v7, %v350_v9  ;;  %vm540_vm5 = vcmp.eq.s32.totalorder %v4559_v4, %v350_v9 }
  0xb2   : > { %vm989_vm8 = vmor %vm541_vm3, %vm861_vm6  ;;  %vm1311_vm3 = vcmp.eq.s32.totalorder %v4566_v7, %v4535_v55 }
  0xb3   : > { %vm4595_vm13 = vmor %vm540_vm5, %vm860_vm10 }
  0xb4   : > { %v353_v12 = vpop.permute.xlu0 %352  ;;  %720 = vperm.xlu1 %4077, %v4448_v34   ;;  %v4591_v13 = vpop.permute.xlu1 %361  ;;  %vm4602_vm0 = vmor %vm989_vm8, %vm1309_vm9  ;;  %vm1312_vm8 = vcmp.eq.s32.totalorder %v4559_v4, %v4526_v52 }
  0xb5   : > { %vm543_vm14 = vcmp.eq.s32.totalorder %v4566_v7, %v353_v12  ;;  %vm542_vm5 = vcmp.eq.s32.totalorder %v4559_v4, %v353_v12  ;;  %v4835_v12 = vld [vmem:[%s4347_s21 + $0x130] sm:$0xff] }
  0xb6   : > { %vm991_vm2 = vmor %vm543_vm14, %vm863_vm15  ;;  %vm866_vm15 = vcmp.eq.s32.totalorder %v4559_v4, %v679_v5 }
  0xb7   : > { %vm1439_vm6 = vmor %vm991_vm2, %vm1311_vm3  ;;  %vm867_vm2 = vcmp.eq.s32.totalorder %v4566_v7, %v679_v5  ;;  %v4813_v5 = vld [vmem:[%s4347_s21 + $0x168] sm:$0xff] }
  0xb8   : > { %v359_v16 = vpop.permute.xlu0 %358  ;;  %4078 = vset.pattern.permute.xlu1 %v4238_v0  ;;  %vm3602_vm10 = vmpackc.low %vm1439_vm6, %vm4602_vm0 }
  0xb9   : > { %vm546_vm9 = vcmp.eq.s32.totalorder %v4559_v4, %v359_v16  ;;  %1168 = vperm.xlu1 %4078, %v4448_v34   ;;  %v682_v19 = vpop.permute.xlu1 %681  ;;  %vm547_vm12 = vcmp.eq.s32.totalorder %v4566_v7, %v359_v16  ;;  %3603 = vmatprep.mubr.msk.bf16.mxu0 %vm3602_vm10, %v4241_v20  ;;  %vm4637_vm14 = vmor %vm4595_vm13, %vm1308_vm1  ;;  %vm1310_vm1 = vcmp.eq.s32.totalorder %v4559_v4, %v4535_v55  ;;  %v4778_v55 = vld [vmem:[%s4347_s21 + $0x148] sm:$0xff] }
  0xba   : > { %vm990_vm0 = vmor %vm542_vm5, %vm862_vm11  ;;  %vm869_vm10 = vcmp.eq.s32.totalorder %v4566_v7, %v682_v19 }
  0xbb   : > { %vm4645_vm3 = vmor %vm546_vm9, %vm866_vm15  ;;  %vm1315_vm9 = vcmp.eq.s32.totalorder %v4566_v7, %v4570_v8  ;;  %vm549_vm15 = vcmp.eq.s32.totalorder %v4566_v7, %v4591_v13 }
  0xbc   : > { %vm4654_vm13 = vmor %vm4576_vm4, %vm1312_vm8  ;;  %v365_v24 = vpop.permute.xlu0 %364 }
  0xbd   : > { %vm995_vm6 = vmor %vm547_vm12, %vm867_vm2  ;;  %4079 = vset.pattern.permute.xlu1 %v4240_v3  ;;  %v685_v25 = vpop.permute.xlu1 %684  ;;  %vm551_vm8 = vcmp.eq.s32.totalorder %v4566_v7, %v365_v24 }
  0xbe   : > { %vm1438_vm5 = vmor %vm990_vm0, %vm1310_vm1  ;;  %403 = vperm.xlu1 %4079, %v4488_v42   ;;  %vm871_vm12 = vcmp.eq.s32.totalorder %v4566_v7, %v685_v25  ;;  %vm1314_vm1 = vcmp.eq.s32.totalorder %v4559_v4, %v4570_v8 }
  0xbf   : > { %vm3604_vm4 = vmpackc.low %vm1438_vm5, %vm4637_vm14  ;;  %vm1317_vm14 = vcmp.eq.s32.totalorder %v4566_v7, %v4532_v54 }
  0xc0   : > { %3605 = vmatmul.mubr.msk.bf16.vlgmr.msra.gmra.mxu0 %vm3604_vm4, %v4241_v20  ;;  %vm1443_vm11 = vmor %vm995_vm6, %vm1315_vm9  ;;  %vm868_vm4 = vcmp.eq.s32.totalorder %v4559_v4, %v682_v19  ;;  %v371_v30 = vpop.permute.xlu0 %370 }
  0xc1   : > { %vm3606_vm0 = vmpackc.low %vm1443_vm11, %vm4614_vm7 }
  0xc2   : > { %vm997_vm2 = vmor %vm549_vm15, %vm869_vm10  ;;  %3607 = vmatprep.mubr.msk.bf16.mxu0 %vm3606_vm0, %v4241_v20  ;;  %4080 = vset.pattern.permute.xlu1 %v4239_v1  ;;  %v1133_v26 = vpop.permute.xlu1 %1132  ;;  %vm548_vm15 = vcmp.eq.s32.totalorder %v4559_v4, %v4591_v13  ;;  %v4171_v13 = vld [vmem:[%s6230_s3 + $0x8] sm:$0xff]  }
  0xc3   : > { %vm999_vm6 = vmor %vm551_vm8, %vm871_vm12  ;;  %723 = vperm.xlu1 %4080, %v4488_v42   ;;  %vm1319_vm7 = vcmp.eq.s32.totalorder %v4566_v7, %v1133_v26  ;;  %vm550_vm8 = vcmp.eq.s32.totalorder %v4559_v4, %v365_v24  ;;  %vm870_vm12 = vcmp.eq.s32.totalorder %v4559_v4, %v685_v25  ;;  %3872 = vmatprep.subr.bf16.mxu1 %v4171_v13 }
  0xc4   : > { %vm1442_vm5 = vmor %vm4645_vm3, %vm1314_vm1  ;;  %v377_v41 = vpop.permute.xlu0 %376  ;;  %3873 = vmatpush3.bf16.msra.mxu1 %v4171_v13 }
  0xc5   : > { %vm3608_vm9 = vmpackc.low %vm1442_vm5, %vm4654_vm13  ;;  %vm1318_vm13 = vcmp.eq.s32.totalorder %v4559_v4, %v1133_v26  ;;  %3874 = vmatprep.subr.bf16.mxu1 %v4172_v17  ;;  %v4910_v26 = vld [vmem:[%s4347_s21 + $0x150] sm:$0xff] }
  0xc6   : > { %vm1445_vm10 = vmor %vm997_vm2, %vm1317_vm14  ;;  %vm1316_vm2 = vcmp.eq.s32.totalorder %v4559_v4, %v4532_v54 }
  0xc7   : > { %vm1447_vm11 = vmor %vm999_vm6, %vm1319_vm7  ;;  %726 = vperm.xlu1 %4080, %v4453_v35   ;;  %v368_v27 = vpop.permute.xlu1 %367 }
  0xc8   : > { %3609 = vmatmul.mubr.msk.bf16.gmra.mxu0 %vm3608_vm9, %v4241_v20  ;;  %vm3610_vm3 = vmpackc.low %vm1447_vm11, %vm1445_vm10  ;;  %vm553_vm9 = vcmp.eq.s32.totalorder %v4566_v7, %v368_v27  ;;  %vm552_vm11 = vcmp.eq.s32.totalorder %v4559_v4, %v368_v27  ;;  %3875 = vmatpush3.bf16.msra.mxu1 %v4172_v17 }
  0xc9   : > { %3611 = vmatprep.mubr.msk.bf16.mxu0 %vm3610_vm3, %v4241_v20  ;;  %vm996_vm0 = vmor %vm548_vm15, %vm868_vm4  ;;  %vm1321_vm4 = vcmp.eq.s32.totalorder %v4566_v7, %v4537_v56  ;;  %vm554_vm15 = vcmp.eq.s32.totalorder %v4559_v4, %v371_v30 }
  0xca   : > { %vm998_vm14 = vmor %vm550_vm8, %vm870_vm12  ;;  %vm1320_vm12 = vcmp.eq.s32.totalorder %v4559_v4, %v4537_v56 }
  0xcb   : > { %4081 = vset.pattern.permute.xlu1 %v4238_v0  ;;  %vm1446_vm1 = vmor %vm998_vm14, %vm1318_vm13 }
  0xcc   : > { %1174 = vperm.xlu1 %4081, %v4453_v35   ;;  %v688_v29 = vpop.permute.xlu1 %687  ;;  %vm1444_vm5 = vmor %vm996_vm0, %vm1316_vm2  ;;  %vm555_vm0 = vcmp.eq.s32.totalorder %v4566_v7, %v371_v30  ;;  %v4733_v35 = vld [vmem:[%s4347_s21 + $0x118] sm:$0xff] }
  0xcd   : > { %vm873_vm6 = vcmp.eq.s32.totalorder %v4566_v7, %v688_v29  ;;  %vm872_vm7 = vcmp.eq.s32.totalorder %v4559_v4, %v688_v29  ;;  %vm3612_vm10 = vmpackc.low %vm1446_vm1, %vm1444_vm5  ;;  %454 = vperm.xlu0 %4109, %v4733_v35  }
  0xce   : > { %vm1001_vm8 = vmor %vm553_vm9, %vm873_vm6 }
  0xcf   : > { %vm1000_vm3 = vmor %vm552_vm11, %vm872_vm7 }
  0xd0   : > { %3613 = vmatmul.mubr.msk.bf16.gmra.mxu0 %vm3612_vm10, %v4241_v20  ;;  %4082 = vset.pattern.permute.xlu1 %v4240_v3  ;;  %v691_v31 = vpop.permute.xlu1 %690  ;;  %vm1449_vm14 = vmor %vm1001_vm8, %vm1321_vm4 }
  0xd1   : > { %409 = vperm.xlu1 %4082, %v4492_v43   ;;  %vm874_vm13 = vcmp.eq.s32.totalorder %v4559_v4, %v691_v31  ;;  %vm875_vm2 = vcmp.eq.s32.totalorder %v4566_v7, %v691_v31  ;;  %vm4718_vm1 = vmor %vm1000_vm3, %vm1320_vm12  ;;  %460 = vperm.xlu0 %4109, %v4762_v51  }
  0xd2   : > { %vm1002_vm6 = vmor %vm554_vm15, %vm874_vm13  ;;  %vm1325_vm13 = vcmp.eq.s32.totalorder %v4566_v7, %v4547_v60 }
  0xd3   : > { %vm1003_vm5 = vmor %vm555_vm0, %vm875_vm2 }
  0xd5   : > { %4083 = vset.pattern.permute.xlu1 %v4239_v1  ;;  %v1139_v33 = vpop.permute.xlu1 %1138 }
  0xd6   : > { %vm1322_vm7 = vcmp.eq.s32.totalorder %v4559_v4, %v1139_v33  ;;  %vm1323_vm9 = vcmp.eq.s32.totalorder %v4566_v7, %v1139_v33  ;;  %729 = vperm.xlu1 %4083, %v4492_v43  }
  0xd7   : > { %vm1451_vm10 = vmor %vm1003_vm5, %vm1323_vm9 }
  0xd8   : > { %vm3614_vm11 = vmpackc.low %vm1451_vm10, %vm1449_vm14  ;;  %vm1324_vm14 = vcmp.eq.s32.totalorder %v4559_v4, %v4547_v60  ;;  %v4788_v60 = vld [vmem:[%s4347_s21 + $0x158] sm:$0xff] }
  0xd9   : > { %3615 = vmatprep.mubr.msk.bf16.mxu0 %vm3614_vm11, %v4241_v20  ;;  %vm1450_vm4 = vmor %vm1002_vm6, %vm1322_vm7  ;;  %vm558_vm6 = vcmp.eq.s32.totalorder %v4559_v4, %v377_v41  ;;  %vm559_vm7 = vcmp.eq.s32.totalorder %v4566_v7, %v377_v41 }
  0xda   : > { %732 = vperm.xlu1 %4083, %v4458_v36   ;;  %vm3616_vm8 = vmpackc.low %vm1450_vm4, %vm4718_vm1  ;;  %v374_v34 = vpop.permute.xlu1 %373 }
  0xdb   : > { %3617 = vmatmul.mubr.msk.bf16.gmra.mxu0 %vm3616_vm8, %v4241_v20  ;;  %vm557_vm15 = vcmp.eq.s32.totalorder %v4566_v7, %v374_v34  ;;  %vm556_vm0 = vcmp.eq.s32.totalorder %v4559_v4, %v374_v34 }
  0xde   : > { %4084 = vset.pattern.permute.xlu1 %v4238_v0 }
  0xdf   : > { %1180 = vperm.xlu1 %4084, %v4458_v36   ;;  %v694_v40 = vpop.permute.xlu1 %693  ;;  %v383_v36 = vpop.permute.xlu0 %382 }
  0xe0   : > { %vm877_vm12 = vcmp.eq.s32.totalorder %v4566_v7, %v694_v40  ;;  %vm876_vm3 = vcmp.eq.s32.totalorder %v4559_v4, %v694_v40 }
  0xe1   : > { %vm1005_vm2 = vmor %vm557_vm15, %vm877_vm12 }
  0xe2   : > { %vm1004_vm1 = vmor %vm556_vm0, %vm876_vm3 }
  0xe3   : > { %4085 = vset.pattern.permute.xlu1 %v4240_v3  ;;  %v697_v42 = vpop.permute.xlu1 %696  ;;  %vm1453_vm10 = vmor %vm1005_vm2, %vm1325_vm13  ;;  %v4759_v49 = vpop.permute.xlu0 %388 }
  0xe4   : > { %415 = vperm.xlu1 %4085, %v4497_v44   ;;  %vm878_vm5 = vcmp.eq.s32.totalorder %v4559_v4, %v697_v42  ;;  %vm879_vm9 = vcmp.eq.s32.totalorder %v4566_v7, %v697_v42  ;;  %vm4751_vm11 = vmor %vm1004_vm1, %vm1324_vm14  ;;  %v4976_v42 = vld [vmem:[%s4347_s21 + $0x170] sm:$0xff] }
  0xe5   : > { %vm1006_vm4 = vmor %vm558_vm6, %vm878_vm5  ;;  %vm1329_vm5 = vcmp.eq.s32.totalorder %v4566_v7, %v4555_v2 }
  0xe6   : > { %vm1007_vm8 = vmor %vm559_vm7, %vm879_vm9 }
  0xe7   : > { %v4773_v54 = vpop.permute.xlu0 %394 }
  0xe8   : > { %4086 = vset.pattern.permute.xlu1 %v4239_v1  ;;  %v1145_v48 = vpop.permute.xlu1 %1144 }
  0xe9   : > { %vm1326_vm12 = vcmp.eq.s32.totalorder %v4559_v4, %v1145_v48  ;;  %vm1327_vm3 = vcmp.eq.s32.totalorder %v4566_v7, %v1145_v48  ;;  %735 = vperm.xlu1 %4086, %v4497_v44   ;;  %v4770_v44 = vld [vmem:[%s4347_s21 + $0x138] sm:$0xff] }
  0xea   : > { %vm1455_vm15 = vmor %vm1007_vm8, %vm1327_vm3  ;;  %466 = vperm.xlu0 %4109, %v4770_v44  }
  0xeb   : > { %vm3618_vm13 = vmpackc.low %vm1455_vm15, %vm1453_vm10  ;;  %v4785_v58 = vpop.permute.xlu0 %400  ;;  %vm1328_vm10 = vcmp.eq.s32.totalorder %v4559_v4, %v4555_v2 }
  0xec   : > { %3619 = vmatprep.mubr.msk.bf16.mxu0 %vm3618_vm13, %v4241_v20  ;;  %vm1454_vm0 = vmor %vm1006_vm4, %vm1326_vm12  ;;  %vm562_vm4 = vcmp.eq.s32.totalorder %v4559_v4, %v383_v36  ;;  %vm563_vm12 = vcmp.eq.s32.totalorder %v4566_v7, %v383_v36 }
  0xed   : > { %738 = vperm.xlu1 %4086, %v4463_v37   ;;  %vm3620_vm2 = vmpackc.low %vm1454_vm0, %vm4751_vm11  ;;  %v380_v52 = vpop.permute.xlu1 %379 }
  0xee   : > { %3621 = vmatmul.mubr.msk.bf16.gmra.mxu0 %vm3620_vm2, %v4241_v20  ;;  %472 = vperm.xlu0 %4109, %v4778_v55   ;;  %vm561_vm6 = vcmp.eq.s32.totalorder %v4566_v7, %v380_v52  ;;  %vm560_vm7 = vcmp.eq.s32.totalorder %v4559_v4, %v380_v52 }
  0xef   : > { %v4807_v2 = vpop.permute.xlu0 %406 }
  0xf1   : > { %4087 = vset.pattern.permute.xlu1 %v4238_v0 }
  0xf2   : > { %1186 = vperm.xlu1 %4087, %v4463_v37   ;;  %v700_v56 = vpop.permute.xlu1 %699  ;;  %478 = vperm.xlu0 %4109, %v4788_v60  }
  0xf3   : > { %vm881_vm14 = vcmp.eq.s32.totalorder %v4566_v7, %v700_v56  ;;  %vm880_vm1 = vcmp.eq.s32.totalorder %v4559_v4, %v700_v56  ;;  %v4821_v9 = vpop.permute.xlu0 %412 }
  0xf4   : > { %vm1009_vm9 = vmor %vm561_vm6, %vm881_vm14 }
  0xf5   : > { %vm1008_vm11 = vmor %vm560_vm7, %vm880_vm1 }
  0xf6   : > { %4088 = vset.pattern.permute.xlu1 %v4240_v3  ;;  %v703_v37 = vpop.permute.xlu1 %702  ;;  %vm1457_vm15 = vmor %vm1009_vm9, %vm1329_vm5  ;;  %484 = vperm.xlu0 %4109, %v4813_v5  }
  0xf7   : > { %421 = vperm.xlu1 %4088, %v4503_v45   ;;  %vm882_vm8 = vcmp.eq.s32.totalorder %v4559_v4, %v703_v37  ;;  %vm883_vm3 = vcmp.eq.s32.totalorder %v4566_v7, %v703_v37  ;;  %vm4802_vm13 = vmor %vm1008_vm11, %vm1328_vm10  ;;  %v4831_v11 = vpop.permute.xlu0 %418  ;;  %v5028_v37 = vld [vmem:[%s4347_s21 + $0x188] sm:$0xff] }
  0xf8   : > { %vm1010_vm0 = vmor %vm562_vm4, %vm882_vm8  ;;  %vm1333_vm8 = vcmp.eq.s32.totalorder %v4566_v7, %v4563_v6 }
  0xf9   : > { %vm1011_vm2 = vmor %vm563_vm12, %vm883_vm3 }
  0xfb   : > { %4089 = vset.pattern.permute.xlu1 %v4239_v1  ;;  %v1151_v62 = vpop.permute.xlu1 %1150 }
  0xfc   : > { %vm1330_vm14 = vcmp.eq.s32.totalorder %v4559_v4, %v1151_v62  ;;  %vm1331_vm1 = vcmp.eq.s32.totalorder %v4566_v7, %v1151_v62  ;;  %741 = vperm.xlu1 %4089, %v4503_v45   ;;  %v4824_v45 = vld [vmem:[%s4347_s21 + $0x178] sm:$0xff] }
  0xfd   : > { %vm1459_vm6 = vmor %vm1011_vm2, %vm1331_vm1  ;;  %490 = vperm.xlu0 %4109, %v4824_v45  }
  0xfe   : > { %vm3622_vm5 = vmpackc.low %vm1459_vm6, %vm1457_vm15  ;;  %vm1332_vm15 = vcmp.eq.s32.totalorder %v4559_v4, %v4563_v6  ;;  %v4859_v6 = vpop.permute.xlu0 %424 }
  0xff   : > { %3623 = vmatprep.mubr.msk.bf16.mxu0 %vm3622_vm5, %v4241_v20  ;;  %vm1458_vm7 = vmor %vm1010_vm0, %vm1330_vm14  ;;  %vm566_vm0 = vcmp.eq.s32.totalorder %v4559_v4, %v4759_v49  ;;  %vm567_vm14 = vcmp.eq.s32.totalorder %v4566_v7, %v4759_v49  ;;  %v5005_v49 = vld [vmem:[%s4347_s21 + $0x180] sm:$0xff] }
 0x100   : > { %744 = vperm.xlu1 %4089, %v4469_v38   ;;  %vm3624_vm9 = vmpackc.low %vm1458_vm7, %vm4802_vm13  ;;  %v386_v8 = vpop.permute.xlu1 %385 }
 0x101   : > { %3625 = vmatmul.mubr.msk.bf16.gmra.mxu0 %vm3624_vm9, %v4241_v20  ;;  %vm565_vm4 = vcmp.eq.s32.totalorder %v4566_v7, %v386_v8  ;;  %4124 = vset.pattern.permute.xlu0 %v4238_v0  ;;  %vm564_vm12 = vcmp.eq.s32.totalorder %v4559_v4, %v386_v8 }
 0x102   : > { %1231 = vperm.xlu0 %4124, %v4835_v12   ;;  %v4878_v21 = vpop.permute.xlu0 %430 }
 0x104   : > { %4090 = vset.pattern.permute.xlu1 %v4238_v0 }
 0x105   : > { %1192 = vperm.xlu1 %4090, %v4469_v38   ;;  %v706_v10 = vpop.permute.xlu1 %705 }
 0x106   : > { %vm885_vm10 = vcmp.eq.s32.totalorder %v4566_v7, %v706_v10  ;;  %vm884_vm11 = vcmp.eq.s32.totalorder %v4559_v4, %v706_v10  ;;  %v1160_v22 = vpop.permute.xlu0 %1159  ;;  %1237 = vperm.xlu0 %4124, %v4885_v23  }
 0x107   : > { %vm1013_vm3 = vmor %vm565_vm4, %vm885_vm10 }
 0x108   : > { %vm1012_vm13 = vmor %vm564_vm12, %vm884_vm11 }
 0x109   : > { %4091 = vset.pattern.permute.xlu1 %v4240_v3  ;;  %v709_v38 = vpop.permute.xlu1 %708  ;;  %vm4855_vm6 = vmor %vm1013_vm3, %vm1333_vm8 }
 0x10a   : > { %427 = vperm.xlu1 %4091, %v4509_v46   ;;  %vm886_vm2 = vcmp.eq.s32.totalorder %v4559_v4, %v709_v38  ;;  %vm887_vm1 = vcmp.eq.s32.totalorder %v4566_v7, %v709_v38  ;;  %vm4861_vm5 = vmor %vm1012_vm13, %vm1332_vm15  ;;  %1243 = vperm.xlu0 %4124, %v4910_v26   ;;  %v1166_v29 = vpop.permute.xlu0 %1165 }
 0x10b   : > { %vm1014_vm7 = vmor %vm566_vm0, %vm886_vm2 }
 0x10c   : > { %vm1015_vm9 = vmor %vm567_vm14, %vm887_vm1  ;;  %vm1336_vm1 = vcmp.eq.s32.totalorder %v4559_v4, %v1160_v22 }
 0x10e   : > { %4093 = vset.pattern.permute.xlu1 %v4239_v1  ;;  %v1157_v16 = vpop.permute.xlu1 %1156  ;;  %1249 = vperm.xlu0 %4124, %v4943_v32   ;;  %v1172_v34 = vpop.permute.xlu0 %1171 }
 0x10f   : > { %vm1334_vm10 = vcmp.eq.s32.totalorder %v4559_v4, %v1157_v16  ;;  %vm1335_vm11 = vcmp.eq.s32.totalorder %v4566_v7, %v1157_v16  ;;  %747 = vperm.xlu1 %4093, %v4509_v46  }
 0x110   : > { %vm1463_vm4 = vmor %vm1015_vm9, %vm1335_vm11 }
 0x111   : > { %vm3626_vm8 = vmpackc.low %vm1463_vm4, %vm4855_vm6 }
 0x112   : > { %3627 = vmatprep.mubr.msk.bf16.mxu0 %vm3626_vm8, %v4241_v20  ;;  %vm1462_vm12 = vmor %vm1014_vm7, %vm1334_vm10  ;;  %vm570_vm7 = vcmp.eq.s32.totalorder %v4559_v4, %v4773_v54  ;;  %vm571_vm10 = vcmp.eq.s32.totalorder %v4566_v7, %v4773_v54  ;;  %1255 = vperm.xlu0 %4124, %v4976_v42   ;;  %v1178_v43 = vpop.permute.xlu0 %1177  ;;  %v5013_v54 = vld [vmem:[%s4347_s21 + $0x190] sm:$0xff] }
 0x113   : > { %750 = vperm.xlu1 %4093, %v4473_v39   ;;  %vm3628_vm3 = vmpackc.low %vm1462_vm12, %vm4861_vm5  ;;  %v392_v19 = vpop.permute.xlu1 %391  ;;  %vm1337_vm5 = vcmp.eq.s32.totalorder %v4566_v7, %v1160_v22 }
 0x114   : > { %3629 = vmatmul.mubr.msk.bf16.gmra.mxu0 %vm3628_vm3, %v4241_v20  ;;  %vm568_vm0 = vcmp.eq.s32.totalorder %v4559_v4, %v392_v19  ;;  %vm569_vm2 = vcmp.eq.s32.totalorder %v4566_v7, %v392_v19 }
 0x116   : > { %1261 = vperm.xlu0 %4124, %v5005_v49   ;;  %v1184_v61 = vpop.permute.xlu0 %1183 }
 0x117   : > { %4094 = vset.pattern.permute.xlu1 %v4238_v0 }
 0x118   : > { %1198 = vperm.xlu1 %4094, %v4473_v39   ;;  %v712_v46 = vpop.permute.xlu1 %711 }
 0x119   : > { %vm888_vm15 = vcmp.eq.s32.totalorder %v4559_v4, %v712_v46  ;;  %vm889_vm13 = vcmp.eq.s32.totalorder %v4566_v7, %v712_v46 }
 0x11a   : > { %vm1016_vm14 = vmor %vm568_vm0, %vm888_vm15  ;;  %1267 = vperm.xlu0 %4124, %v5013_v54   ;;  %v1190_v10 = vpop.permute.xlu0 %1189 }
 0x11b   : > { %vm1017_vm6 = vmor %vm569_vm2, %vm889_vm13 }
 0x11c   : > { %4095 = vset.pattern.permute.xlu1 %v4240_v3  ;;  %v715_v39 = vpop.permute.xlu1 %714  ;;  %vm4900_vm11 = vmor %vm1016_vm14, %vm1336_vm1 }
 0x11d   : > { %433 = vperm.xlu1 %4095, %v4513_v47   ;;  %vm890_vm9 = vcmp.eq.s32.totalorder %v4559_v4, %v715_v39  ;;  %vm891_vm4 = vcmp.eq.s32.totalorder %v4566_v7, %v715_v39  ;;  %vm1465_vm8 = vmor %vm1017_vm6, %vm1337_vm5 }
 0x11e   : > { %vm1018_vm12 = vmor %vm570_vm7, %vm890_vm9  ;;  %v5071_v38 = vpop.permute.xlu0 %1195 }
 0x11f   : > { %vm1019_vm3 = vmor %vm571_vm10, %vm891_vm4 }
 0x121   : > { %4096 = vset.pattern.permute.xlu1 %v4239_v1  ;;  %v1163_v25 = vpop.permute.xlu1 %1162 }
 0x122   : > { %vm1338_vm15 = vcmp.eq.s32.totalorder %v4559_v4, %v1163_v25  ;;  %vm1339_vm13 = vcmp.eq.s32.totalorder %v4566_v7, %v1163_v25  ;;  %753 = vperm.xlu1 %4096, %v4513_v47   ;;  %v5098_v16 = vpop.permute.xlu0 %1201 }
 0x123   : > { %vm1467_vm0 = vmor %vm1019_vm3, %vm1339_vm13 }
 0x124   : > { %vm3630_vm2 = vmpackc.low %vm1467_vm0, %vm1465_vm8  ;;  %vm1341_vm8 = vcmp.eq.s32.totalorder %v4566_v7, %v1166_v29 }
 0x125   : > { %3631 = vmatprep.mubr.msk.bf16.mxu0 %vm3630_vm2, %v4241_v20  ;;  %vm1466_vm14 = vmor %vm1018_vm12, %vm1338_vm15  ;;  %vm574_vm12 = vcmp.eq.s32.totalorder %v4559_v4, %v4785_v58  ;;  %vm575_vm15 = vcmp.eq.s32.totalorder %v4566_v7, %v4785_v58  ;;  %v5021_v58 = vld [vmem:[%s4347_s21 + $0x1a0] sm:$0xff] }
 0x126   : > { %756 = vperm.xlu1 %4096, %v4553_v63   ;;  %vm3632_vm1 = vmpackc.low %vm1466_vm14, %vm4900_vm11  ;;  %v398_v27 = vpop.permute.xlu1 %397  ;;  %vm1340_vm11 = vcmp.eq.s32.totalorder %v4559_v4, %v1166_v29  ;;  %1273 = vperm.xlu0 %4124, %v5021_v58   ;;  %v5112_v29 = vld [vmem:[%s4347_s21 + $0x1a8] sm:$0xff] }
 0x127   : > { %3633 = vmatmul.mubr.msk.bf16.gmra.mxu0 %vm3632_vm1, %v4241_v20  ;;  %vm572_vm7 = vcmp.eq.s32.totalorder %v4559_v4, %v398_v27  ;;  %vm573_vm9 = vcmp.eq.s32.totalorder %v4566_v7, %v398_v27  ;;  %v5109_v27 = vpop.permute.xlu0 %1207 }
 0x12a   : > { %4097 = vset.pattern.permute.xlu1 %v4238_v0  ;;  %4135 = vset.pattern.permute.xlu0 %v4240_v3 }
 0x12b   : > { %1204 = vperm.xlu1 %4097, %v4553_v63   ;;  %v718_v47 = vpop.permute.xlu1 %717  ;;  %496 = vperm.xlu0 %4135, %v5028_v37  }
 0x12c   : > { %vm892_vm6 = vcmp.eq.s32.totalorder %v4559_v4, %v718_v47  ;;  %vm893_vm5 = vcmp.eq.s32.totalorder %v4566_v7, %v718_v47 }
 0x12d   : > { %vm1020_vm10 = vmor %vm572_vm7, %vm892_vm6 }
 0x12e   : > { %vm1021_vm4 = vmor %vm573_vm9, %vm893_vm5 }
 0x12f   : > { %4098 = vset.pattern.permute.xlu1 %v4240_v3  ;;  %v721_v30 = vpop.permute.xlu1 %720  ;;  %vm4933_vm13 = vmor %vm1020_vm10, %vm1340_vm11 }
 0x130   : > { %439 = vperm.xlu1 %4098, %v4520_v50   ;;  %vm894_vm3 = vcmp.eq.s32.totalorder %v4559_v4, %v721_v30  ;;  %vm895_vm0 = vcmp.eq.s32.totalorder %v4566_v7, %v721_v30  ;;  %vm1469_vm2 = vmor %vm1021_vm4, %vm1341_vm8 }
 0x131   : > { %vm1022_vm14 = vmor %vm574_vm12, %vm894_vm3 }
 0x132   : > { %vm1023_vm1 = vmor %vm575_vm15, %vm895_vm0 }
 0x134   : > { %4099 = vset.pattern.permute.xlu1 %v4239_v1  ;;  %v1169_v31 = vpop.permute.xlu1 %1168 }
 0x135   : > { %vm1342_vm6 = vcmp.eq.s32.totalorder %v4559_v4, %v1169_v31  ;;  %vm1343_vm5 = vcmp.eq.s32.totalorder %v4566_v7, %v1169_v31  ;;  %759 = vperm.xlu1 %4099, %v4520_v50  }
 0x136   : > { %vm1471_vm7 = vmor %vm1023_vm1, %vm1343_vm5 }
 0x137   : > { %vm3634_vm9 = vmpackc.low %vm1471_vm7, %vm1469_vm2  ;;  %vm1345_vm2 = vcmp.eq.s32.totalorder %v4566_v7, %v1172_v34 }
 0x138   : > { %3635 = vmatprep.mubr.msk.bf16.mxu0 %vm3634_vm9, %v4241_v20  ;;  %vm1470_vm10 = vmor %vm1022_vm14, %vm1342_vm6  ;;  %vm578_vm14 = vcmp.eq.s32.totalorder %v4559_v4, %v4807_v2  ;;  %vm579_vm6 = vcmp.eq.s32.totalorder %v4566_v7, %v4807_v2 }
 0x139   : > { %762 = vperm.xlu1 %4099, %v4619_v18   ;;  %vm3636_vm11 = vmpackc.low %vm1470_vm10, %vm4933_vm13  ;;  %v404_v33 = vpop.permute.xlu1 %403  ;;  %vm1344_vm13 = vcmp.eq.s32.totalorder %v4559_v4, %v1172_v34 }
 0x13a   : > { %3637 = vmatmul.mubr.msk.bf16.gmra.mxu0 %vm3636_vm11, %v4241_v20  ;;  %vm576_vm12 = vcmp.eq.s32.totalorder %v4559_v4, %v404_v33  ;;  %vm577_vm3 = vcmp.eq.s32.totalorder %v4566_v7, %v404_v33 }
 0x13d   : > { %4100 = vset.pattern.permute.xlu1 %v4238_v0 }
 0x13e   : > { %1210 = vperm.xlu1 %4100, %v4619_v18   ;;  %v724_v50 = vpop.permute.xlu1 %723 }
 0x13f   : > { %vm896_vm4 = vcmp.eq.s32.totalorder %v4559_v4, %v724_v50  ;;  %vm897_vm8 = vcmp.eq.s32.totalorder %v4566_v7, %v724_v50 }
 0x140   : > { %vm1024_vm15 = vmor %vm576_vm12, %vm896_vm4 }
 0x141   : > { %vm1025_vm0 = vmor %vm577_vm3, %vm897_vm8 }
 0x142   : > { %4101 = vset.pattern.permute.xlu1 %v4240_v3  ;;  %v727_v40 = vpop.permute.xlu1 %726  ;;  %vm4966_vm5 = vmor %vm1024_vm15, %vm1344_vm13 }
 0x143   : > { %445 = vperm.xlu1 %4101, %v4529_v53   ;;  %vm898_vm1 = vcmp.eq.s32.totalorder %v4559_v4, %v727_v40  ;;  %vm899_vm7 = vcmp.eq.s32.totalorder %v4566_v7, %v727_v40  ;;  %vm1473_vm9 = vmor %vm1025_vm0, %vm1345_vm2  ;;  %v5123_v40 = vpop.permute.xlu0 %1213 }
 0x144   : > { %vm1026_vm10 = vmor %vm578_vm14, %vm898_vm1 }
 0x145   : > { %vm1027_vm11 = vmor %vm579_vm6, %vm899_vm7 }
 0x147   : > { %4102 = vset.pattern.permute.xlu1 %v4239_v1  ;;  %v1175_v41 = vpop.permute.xlu1 %1174 }
 0x148   : > { %vm1346_vm4 = vcmp.eq.s32.totalorder %v4559_v4, %v1175_v41  ;;  %vm1347_vm8 = vcmp.eq.s32.totalorder %v4566_v7, %v1175_v41  ;;  %765 = vperm.xlu1 %4102, %v4529_v53  }
 0x149   : > { %vm1475_vm12 = vmor %vm1027_vm11, %vm1347_vm8 }
 0x14a   : > { %vm3638_vm3 = vmpackc.low %vm1475_vm12, %vm1473_vm9  ;;  %vm1349_vm9 = vcmp.eq.s32.totalorder %v4566_v7, %v1178_v43 }
 0x14b   : > { %3639 = vmatprep.mubr.msk.bf16.mxu0 %vm3638_vm3, %v4241_v20  ;;  %vm1474_vm15 = vmor %vm1026_vm10, %vm1346_vm4  ;;  %vm582_vm10 = vcmp.eq.s32.totalorder %v4559_v4, %v4821_v9  ;;  %vm583_vm4 = vcmp.eq.s32.totalorder %v4566_v7, %v4821_v9  ;;  %v5061_v9 = vld [vmem:[%s4347_s21 + $0x198] sm:$0xff] }
 0x14c   : > { %768 = vperm.xlu1 %4102, %v4699_v28   ;;  %vm3640_vm13 = vmpackc.low %vm1474_vm15, %vm4966_vm5  ;;  %v410_v36 = vpop.permute.xlu1 %409  ;;  %vm1348_vm5 = vcmp.eq.s32.totalorder %v4559_v4, %v1178_v43  ;;  %502 = vperm.xlu0 %4135, %v5061_v9  }
 0x14d   : > { %3641 = vmatmul.mubr.msk.bf16.gmra.mxu0 %vm3640_vm13, %v4241_v20  ;;  %vm580_vm14 = vcmp.eq.s32.totalorder %v4559_v4, %v410_v36  ;;  %vm581_vm1 = vcmp.eq.s32.totalorder %v4566_v7, %v410_v36 }
 0x150   : > { %4103 = vset.pattern.permute.xlu1 %v4238_v0  ;;  %508 = vperm.xlu0 %4135, %v5112_v29  }
 0x151   : > { %1216 = vperm.xlu1 %4103, %v4699_v28   ;;  %v730_v53 = vpop.permute.xlu1 %729 }
 0x152   : > { %vm900_vm0 = vcmp.eq.s32.totalorder %v4559_v4, %v730_v53  ;;  %vm901_vm2 = vcmp.eq.s32.totalorder %v4566_v7, %v730_v53 }
 0x153   : > { %vm1028_vm6 = vmor %vm580_vm14, %vm900_vm0 }
 0x154   : > { %vm1029_vm7 = vmor %vm581_vm1, %vm901_vm2 }
 0x155   : > { %4104 = vset.pattern.permute.xlu1 %v4240_v3  ;;  %v733_v48 = vpop.permute.xlu1 %732  ;;  %vm4999_vm8 = vmor %vm1028_vm6, %vm1348_vm5 }
 0x156   : > { %451 = vperm.xlu1 %4104, %v4540_v57   ;;  %vm902_vm11 = vcmp.eq.s32.totalorder %v4559_v4, %v733_v48  ;;  %vm903_vm12 = vcmp.eq.s32.totalorder %v4566_v7, %v733_v48  ;;  %vm1477_vm3 = vmor %vm1029_vm7, %vm1349_vm9  ;;  %v5140_v48 = vld [vmem:[%s4347_s21 + $0x1b8] sm:$0xff] }
 0x157   : > { %vm1030_vm15 = vmor %vm582_vm10, %vm902_vm11  ;;  %514 = vperm.xlu0 %4135, %v5140_v48  }
 0x158   : > { %vm1031_vm13 = vmor %vm583_vm4, %vm903_vm12 }
 0x15a   : > { %4105 = vset.pattern.permute.xlu1 %v4239_v1  ;;  %v1181_v52 = vpop.permute.xlu1 %1180 }
 0x15b   : > { %vm1350_vm0 = vcmp.eq.s32.totalorder %v4559_v4, %v1181_v52  ;;  %vm1351_vm2 = vcmp.eq.s32.totalorder %v4566_v7, %v1181_v52  ;;  %771 = vperm.xlu1 %4105, %v4540_v57  }
 0x15c   : > { %vm1479_vm14 = vmor %vm1031_vm13, %vm1351_vm2 }
 0x15d   : > { %vm3642_vm1 = vmpackc.low %vm1479_vm14, %vm1477_vm3  ;;  %vm1353_vm3 = vcmp.eq.s32.totalorder %v4566_v7, %v1184_v61 }
 0x15e   : > { %3643 = vmatprep.mubr.msk.bf16.mxu0 %vm3642_vm1, %v4241_v20  ;;  %vm1478_vm6 = vmor %vm1030_vm15, %vm1350_vm0  ;;  %vm586_vm15 = vcmp.eq.s32.totalorder %v4559_v4, %v4831_v11  ;;  %vm587_vm0 = vcmp.eq.s32.totalorder %v4566_v7, %v4831_v11 }
 0x15f   : > { %774 = vperm.xlu1 %4105, %v4733_v35   ;;  %vm3644_vm5 = vmpackc.low %vm1478_vm6, %vm4999_vm8  ;;  %v416_v56 = vpop.permute.xlu1 %415  ;;  %vm1352_vm8 = vcmp.eq.s32.totalorder %v4559_v4, %v1184_v61 }
 0x160   : > { %3645 = vmatmul.mubr.msk.bf16.gmra.mxu0 %vm3644_vm5, %v4241_v20  ;;  %vm584_vm10 = vcmp.eq.s32.totalorder %v4559_v4, %v416_v56  ;;  %vm585_vm11 = vcmp.eq.s32.totalorder %v4566_v7, %v416_v56 }
 0x163   : > { %4106 = vset.pattern.permute.xlu1 %v4238_v0 }
 0x164   : > { %1222 = vperm.xlu1 %4106, %v4733_v35   ;;  %v736_v57 = vpop.permute.xlu1 %735 }
 0x165   : > { %vm904_vm7 = vcmp.eq.s32.totalorder %v4559_v4, %v736_v57  ;;  %vm905_vm9 = vcmp.eq.s32.totalorder %v4566_v7, %v736_v57 }
 0x166   : > { %vm1032_vm4 = vmor %vm584_vm10, %vm904_vm7 }
 0x167   : > { %vm1033_vm12 = vmor %vm585_vm11, %vm905_vm9 }
 0x168   : > { %4107 = vset.pattern.permute.xlu1 %v4240_v3  ;;  %v739_v35 = vpop.permute.xlu1 %738  ;;  %vm5045_vm2 = vmor %vm1032_vm4, %vm1352_vm8 }
 0x169   : > { %457 = vperm.xlu1 %4107, %v4545_v59   ;;  %vm906_vm13 = vcmp.eq.s32.totalorder %v4559_v4, %v739_v35  ;;  %vm907_vm14 = vcmp.eq.s32.totalorder %v4566_v7, %v739_v35  ;;  %vm1481_vm1 = vmor %vm1033_vm12, %vm1353_vm3 }
 0x16a   : > { %vm1034_vm6 = vmor %vm586_vm15, %vm906_vm13 }
 0x16b   : > { %vm1035_vm5 = vmor %vm587_vm0, %vm907_vm14 }
 0x16d   : > { %4108 = vset.pattern.permute.xlu1 %v4239_v1  ;;  %v1187_v2 = vpop.permute.xlu1 %1186 }
 0x16e   : > { %vm1354_vm7 = vcmp.eq.s32.totalorder %v4559_v4, %v1187_v2  ;;  %vm1355_vm9 = vcmp.eq.s32.totalorder %v4566_v7, %v1187_v2  ;;  %777 = vperm.xlu1 %4108, %v4545_v59   ;;  %v5169_v2 = vpop.permute.xlu0 %1219 }
 0x16f   : > { %vm1483_vm10 = vmor %vm1035_vm5, %vm1355_vm9 }
 0x170   : > { %vm3646_vm11 = vmpackc.low %vm1483_vm10, %vm1481_vm1  ;;  %vm1357_vm1 = vcmp.eq.s32.totalorder %v4566_v7, %v1190_v10 }
 0x171   : > { %3647 = vmatprep.mubr.msk.bf16.mxu0 %vm3646_vm11, %v4241_v20  ;;  %vm1482_vm4 = vmor %vm1034_vm6, %vm1354_vm7  ;;  %vm590_vm6 = vcmp.eq.s32.totalorder %v4559_v4, %v4859_v6  ;;  %vm591_vm7 = vcmp.eq.s32.totalorder %v4566_v7, %v4859_v6 }
 0x172   : > { %780 = vperm.xlu1 %4108, %v4762_v51   ;;  %vm3648_vm8 = vmpackc.low %vm1482_vm4, %vm5045_vm2  ;;  %v422_v8 = vpop.permute.xlu1 %421  ;;  %vm1356_vm2 = vcmp.eq.s32.totalorder %v4559_v4, %v1190_v10  ;;  %v5175_v10 = vld [vmem:[%s4347_s21 + $0x1c8] sm:$0xff] }
 0x173   : > { %3649 = vmatmul.mubr.msk.bf16.gmra.mxu0 %vm3648_vm8, %v4241_v20  ;;  %vm588_vm15 = vcmp.eq.s32.totalorder %v4559_v4, %v422_v8  ;;  %vm589_vm13 = vcmp.eq.s32.totalorder %v4566_v7, %v422_v8  ;;  %520 = vperm.xlu0 %4135, %v5175_v10  }
 0x176   : > { %4110 = vset.pattern.permute.xlu1 %v4238_v0 }
 0x177   : > { %1228 = vperm.xlu1 %4110, %v4762_v51   ;;  %v742_v59 = vpop.permute.xlu1 %741  ;;  %v5185_v51 = vld [vmem:[%s4347_s21 + $0x1d8] sm:$0xff] }
 0x178   : > { %vm908_vm12 = vcmp.eq.s32.totalorder %v4559_v4, %v742_v59  ;;  %vm909_vm3 = vcmp.eq.s32.totalorder %v4566_v7, %v742_v59  ;;  %526 = vperm.xlu0 %4135, %v5185_v51  }
 0x179   : > { %vm1036_vm0 = vmor %vm588_vm15, %vm908_vm12 }
 0x17a   : > { %vm1037_vm14 = vmor %vm589_vm13, %vm909_vm3 }
 0x17b   : > { %4111 = vset.pattern.permute.xlu1 %v4240_v3  ;;  %v745_v11 = vpop.permute.xlu1 %744  ;;  %vm5080_vm9 = vmor %vm1036_vm0, %vm1356_vm2 }
 0x17c   : > { %463 = vperm.xlu1 %4111, %v4835_v12   ;;  %vm910_vm5 = vcmp.eq.s32.totalorder %v4559_v4, %v745_v11  ;;  %vm911_vm10 = vcmp.eq.s32.totalorder %v4566_v7, %v745_v11  ;;  %vm5085_vm11 = vmor %vm1037_vm14, %vm1357_vm1  ;;  %vm2427_vm14 = vcmask 261120   ;;  %4144 = vset.pattern.permute.xlu0 %v4238_v0 }
 0x17d   : > { %vm1038_vm4 = vmor %vm590_vm6, %vm910_vm5 }
 0x17e   : > { %vm1039_vm8 = vmor %vm591_vm7, %vm911_vm10 }
 0x180   : > { %v2053_v15 = vpop.f32.mrf.mxu0  ;;  %4112 = vset.pattern.permute.xlu1 %v4239_v1  ;;  %v1193_v6 = vpop.permute.xlu1 %1192 }
 0x181   : > { %vm1358_vm12 = vcmp.eq.s32.totalorder %v4559_v4, %v1193_v6  ;;  %vm1359_vm3 = vcmp.eq.s32.totalorder %v4566_v7, %v1193_v6  ;;  %783 = vperm.xlu1 %4112, %v4835_v12   ;;  %v2054_v19 = vadd.f32 %v5092_v14, %v2053_v15  ;;  %v5188_v15 = vpop.permute.xlu0 %1225 }
 0x182   : > { %v2055_v17 = vpop.f32.mrf.mxu0  ;;  %vm1487_vm15 = vmor %vm1039_vm8, %vm1359_vm3  ;;  %vm594_vm8 = vcmp.eq.s32.totalorder %v4559_v4, %v4878_v21  ;;  %vm595_vm3 = vcmp.eq.s32.totalorder %v4566_v7, %v4878_v21 }
 0x183   : > { %vm3650_vm13 = vmpackc.low %vm1487_vm15, %vm5085_vm11  ;;  %v2308_v24 = vmax.f32 %v2054_v19, 0.0  ;;  %vm1360_vm11 = vcmp.eq.s32.totalorder %v4559_v4, %v5071_v38 }
 0x184   : > { %v2056_v46 = vpop.f32.mrf.mxu0  ;;  %3651 = vmatprep.mubr.msk.bf16.mxu0 %vm3650_vm13, %v4241_v20  ;;  %vm1486_vm0 = vmor %vm1038_vm4, %vm1358_vm12 }
 0x185   : > { %v2057_v22 = vadd.f32 %v5092_v14, %v2056_v46  ;;  %786 = vperm.xlu1 %4112, %v4770_v44   ;;  %vm3652_vm2 = vmpackc.low %vm1486_vm0, %vm5080_vm9  ;;  %v428_v12 = vpop.permute.xlu1 %427  ;;  %vm1361_vm9 = vcmp.eq.s32.totalorder %v4566_v7, %v5071_v38 }
 0x186   : > { %v2058_v39 = vpop.f32.mrf.mxu0  ;;  %3653 = vmatmul.mubr.msk.bf16.gmra.mxu0 %vm3652_vm2, %v4241_v20  ;;  %vm593_vm5 = vcmp.eq.s32.totalorder %v4566_v7, %v428_v12  ;;  %vm592_vm7 = vcmp.eq.s32.totalorder %v4559_v4, %v428_v12  ;;  %v5198_v12 = vld [vmem:[%s4347_s21 + $0x1b0] sm:$0xff] }
 0x187   : > { %v2309_v25 = vmax.f32 %v2057_v22, 0.0  ;;  %1279 = vperm.xlu0 %4144, %v5198_v12  }
 0x188   : > { %v2061_v47 = vpop.f32.mrf.mxu0 }
 0x189   : > { %v2372_v30 = vpack.c.bf16 %v2309_v25, %v2308_v24  ;;  %4113 = vset.pattern.permute.xlu1 %v4238_v0  ;;  %v2062_v33 = vadd.f32 %v5092_v14, %v2061_v47  ;;  %v437_v24 = vpop.permute.xlu0 %436 }
 0x18a   : > { %v2063_v63 = vpop.f32.mrf.mxu0  ;;  %1234 = vperm.xlu1 %4113, %v4770_v44   ;;  %v748_v31 = vpop.permute.xlu1 %747 }
 0x18b   : > { %3876 = vmatprep.mubr.msk.bf16.mxu1 %vm2427_vm14, %v2372_v30  ;;  %vm913_vm1 = vcmp.eq.s32.totalorder %v4566_v7, %v748_v31  ;;  %vm912_vm6 = vcmp.eq.s32.totalorder %v4559_v4, %v748_v31  ;;  %v2310_v36 = vmax.f32 %v2062_v33, 0.0 }
 0x18c   : > { %v2064_v50 = vpop.f32.mrf.mxu0  ;;  %vm5128_vm10 = vmor %vm593_vm5, %vm913_vm1 }
 0x18d   : > { %v2065_v34 = vadd.f32 %v5092_v14, %v2064_v50  ;;  %vm1040_vm4 = vmor %vm592_vm7, %vm912_vm6 }
 0x18e   : > { %v2066_v44 = vpop.f32.mrf.mxu0  ;;  %4114 = vset.pattern.permute.xlu1 %v4240_v3  ;;  %v751_v41 = vpop.permute.xlu1 %750  ;;  %vm5150_vm13 = vmor %vm5128_vm10, %vm1361_vm9 }
 0x18f   : > { %v2311_v53 = vmax.f32 %v2065_v34, 0.0  ;;  %469 = vperm.xlu1 %4114, %v4885_v23   ;;  %vm914_vm12 = vcmp.eq.s32.totalorder %v4559_v4, %v751_v41  ;;  %vm915_vm15 = vcmp.eq.s32.totalorder %v4566_v7, %v751_v41  ;;  %vm5155_vm0 = vmor %vm1040_vm4, %vm1360_vm11 }
 0x190   : > { %v2069_v43 = vpop.f32.mrf.mxu0  ;;  %vm5161_vm2 = vmor %vm594_vm8, %vm914_vm12 }
 0x191   : > { %v2373_v28 = vpack.c.bf16 %v2311_v53, %v2310_v36  ;;  %v2070_v21 = vadd.f32 %v5092_v14, %v2069_v43  ;;  %vm1043_vm1 = vmor %vm595_vm3, %vm915_vm15  ;;  %vm1365_vm3 = vcmp.eq.s32.totalorder %v4566_v7, %v5098_v16  ;;  %v443_v53 = vpop.permute.xlu0 %442 }
 0x192   : > { %v2071_v56 = vpop.f32.mrf.mxu0 }
 0x193   : > { %3877 = vmatmul.mubr.msk.bf16.vlgmr.msra.gmra.mxu1 %vm2427_vm14, %v2373_v28  ;;  %4115 = vset.pattern.permute.xlu1 %v4239_v1  ;;  %v1199_v35 = vpop.permute.xlu1 %1198  ;;  %v2312_v11 = vmax.f32 %v2070_v21, 0.0 }
 0x194   : > { %v2072_v62 = vpop.f32.mrf.mxu0  ;;  %vm1362_vm6 = vcmp.eq.s32.totalorder %v4559_v4, %v1199_v35  ;;  %vm1363_vm5 = vcmp.eq.s32.totalorder %v4566_v7, %v1199_v35  ;;  %789 = vperm.xlu1 %4115, %v4885_v23  }
 0x195   : > { %v2073_v8 = vadd.f32 %v5092_v14, %v2072_v62  ;;  %vm1491_vm7 = vmor %vm1043_vm1, %vm1363_vm5  ;;  %vm598_vm1 = vcmp.eq.s32.totalorder %v4559_v4, %v437_v24  ;;  %vm599_vm5 = vcmp.eq.s32.totalorder %v4566_v7, %v437_v24 }
 0x196   : > { %v2074_v59 = vpop.f32.mrf.mxu0  ;;  %vm3654_vm9 = vmpackc.low %vm1491_vm7, %vm5150_vm13 }
 0x197   : > { %v2313_v38 = vmax.f32 %v2073_v8, 0.0  ;;  %3655 = vmatprep.mubr.msk.bf16.mxu0 %vm3654_vm9, %v4241_v20  ;;  %vm1490_vm10 = vmor %vm5161_vm2, %vm1362_vm6 }
 0x198   : > { %792 = vperm.xlu1 %4115, %v4778_v55   ;;  %vm3656_vm11 = vmpackc.low %vm1490_vm10, %vm5155_vm0  ;;  %v434_v23 = vpop.permute.xlu1 %433  ;;  %vm1364_vm0 = vcmp.eq.s32.totalorder %v4559_v4, %v5098_v16  ;;  %v5230_v16 = vld [vmem:[%s4347_s21 + $0x1c0] sm:$0xff] }
 0x199   : > { %v2374_v13 = vpack.c.bf16 %v2313_v38, %v2312_v11  ;;  %3657 = vmatmul.mubr.msk.bf16.gmra.mxu0 %vm3656_vm11, %v4241_v20  ;;  %vm597_vm12 = vcmp.eq.s32.totalorder %v4566_v7, %v434_v23  ;;  %vm596_vm15 = vcmp.eq.s32.totalorder %v4559_v4, %v434_v23  ;;  %1285 = vperm.xlu0 %4144, %v5230_v16   ;;  %v449_v38 = vpop.permute.xlu0 %448 }
 0x19b   : > { %3880 = vmatprep.mubr.msk.bf16.mxu1 %vm2427_vm14, %v2374_v13  ;;  %v2077_v6 = vpop.f32.mrf.mxu0 }
 0x19c   : > { %4116 = vset.pattern.permute.xlu1 %v4238_v0  ;;  %v2078_v46 = vadd.f32 %v5092_v14, %v2077_v6 }
 0x19d   : > { %v2079_v17 = vpop.f32.mrf.mxu0  ;;  %1240 = vperm.xlu1 %4116, %v4778_v55   ;;  %v754_v19 = vpop.permute.xlu1 %753 }
 0x19e   : > { %vm917_vm4 = vcmp.eq.s32.totalorder %v4566_v7, %v754_v19  ;;  %vm916_vm8 = vcmp.eq.s32.totalorder %v4559_v4, %v754_v19  ;;  %v2314_v47 = vmax.f32 %v2078_v46, 0.0 }
 0x19f   : > { %v2080_v22 = vpop.f32.mrf.mxu0  ;;  %vm1045_vm13 = vmor %vm597_vm12, %vm917_vm4 }
 0x1a0   : > { %v2081_v39 = vadd.f32 %v5092_v14, %v2080_v22  ;;  %vm1044_vm2 = vmor %vm596_vm15, %vm916_vm8 }
 0x1a1   : > { %v2082_v55 = vpop.f32.mrf.mxu0  ;;  %4117 = vset.pattern.permute.xlu1 %v4240_v3  ;;  %v757_v25 = vpop.permute.xlu1 %756  ;;  %vm1493_vm9 = vmor %vm1045_vm13, %vm1365_vm3 }
 0x1a2   : > { %v2315_v30 = vmax.f32 %v2081_v39, 0.0  ;;  %475 = vperm.xlu1 %4117, %v4910_v26   ;;  %vm918_vm6 = vcmp.eq.s32.totalorder %v4559_v4, %v757_v25  ;;  %vm919_vm7 = vcmp.eq.s32.totalorder %v4566_v7, %v757_v25  ;;  %vm5220_vm10 = vmor %vm1044_vm2, %vm1364_vm0  ;;  %v455_v39 = vpop.permute.xlu0 %454  ;;  %v5315_v25 = vld [vmem:[%s4347_s21 + $0x1e0] sm:$0xff] }
 0x1a3   : > { %vm1046_vm11 = vmor %vm598_vm1, %vm918_vm6 }
 0x1a4   : > { %v2375_v63 = vpack.c.bf16 %v2315_v30, %v2314_v47  ;;  %vm1047_vm4 = vmor %vm599_vm5, %vm919_vm7  ;;  %vm1369_vm5 = vcmp.eq.s32.totalorder %v4566_v7, %v5109_v27 }
 0x1a6   : > { %3881 = vmatmul.mubr.msk.bf16.gmra.mxu1 %vm2427_vm14, %v2375_v63  ;;  %4118 = vset.pattern.permute.xlu1 %v4239_v1  ;;  %v1205_v33 = vpop.permute.xlu1 %1204  ;;  %v5323_v63 = vpop.permute.xlu0 %460 }
 0x1a7   : > { %vm1366_vm8 = vcmp.eq.s32.totalorder %v4559_v4, %v1205_v33  ;;  %vm1367_vm12 = vcmp.eq.s32.totalorder %v4566_v7, %v1205_v33  ;;  %795 = vperm.xlu1 %4118, %v4910_v26  }
 0x1a8   : > { %vm1495_vm15 = vmor %vm1047_vm4, %vm1367_vm12  ;;  %vm602_vm4 = vcmp.eq.s32.totalorder %v4559_v4, %v443_v53  ;;  %vm603_vm12 = vcmp.eq.s32.totalorder %v4566_v7, %v443_v53 }
 0x1a9   : > { %vm3658_vm3 = vmpackc.low %vm1495_vm15, %vm1493_vm9 }
 0x1aa   : > { %3659 = vmatprep.mubr.msk.bf16.mxu0 %vm3658_vm3, %v4241_v20  ;;  %vm1494_vm13 = vmor %vm1046_vm11, %vm1366_vm8 }
 0x1ab   : > { %798 = vperm.xlu1 %4118, %v4788_v60   ;;  %vm3660_vm0 = vmpackc.low %vm1494_vm13, %vm5220_vm10  ;;  %v440_v50 = vpop.permute.xlu1 %439  ;;  %vm1368_vm10 = vcmp.eq.s32.totalorder %v4559_v4, %v5109_v27  ;;  %v5269_v27 = vld [vmem:[%s4347_s21 + $0x1d0] sm:$0xff] }
 0x1ac   : > { %3661 = vmatmul.mubr.msk.bf16.gmra.mxu0 %vm3660_vm0, %v4241_v20  ;;  %vm601_vm6 = vcmp.eq.s32.totalorder %v4566_v7, %v440_v50  ;;  %vm600_vm7 = vcmp.eq.s32.totalorder %v4559_v4, %v440_v50  ;;  %1291 = vperm.xlu0 %4144, %v5269_v27  }
 0x1ae   : > { %v2085_v34 = vpop.f32.mrf.mxu0 }
 0x1af   : > { %4119 = vset.pattern.permute.xlu1 %v4238_v0  ;;  %v2086_v18 = vadd.f32 %v5092_v14, %v2085_v34 }
 0x1b0   : > { %v2087_v26 = vpop.f32.mrf.mxu0  ;;  %1246 = vperm.xlu1 %4119, %v4788_v60   ;;  %v760_v44 = vpop.permute.xlu1 %759  ;;  %1297 = vperm.xlu0 %4144, %v5315_v25  }
 0x1b1   : > { %vm921_vm2 = vcmp.eq.s32.totalorder %v4566_v7, %v760_v44  ;;  %vm920_vm1 = vcmp.eq.s32.totalorder %v4559_v4, %v760_v44  ;;  %v2316_v28 = vmax.f32 %v2086_v18, 0.0 }
 0x1b2   : > { %v2088_v41 = vpop.f32.mrf.mxu0  ;;  %vm1049_vm9 = vmor %vm601_vm6, %vm921_vm2 }
 0x1b3   : > { %v2089_v36 = vadd.f32 %v5092_v14, %v2088_v41  ;;  %vm1048_vm11 = vmor %vm600_vm7, %vm920_vm1 }
 0x1b4   : > { %v2090_v60 = vpop.f32.mrf.mxu0  ;;  %4120 = vset.pattern.permute.xlu1 %v4240_v3  ;;  %v763_v43 = vpop.permute.xlu1 %762  ;;  %vm1497_vm3 = vmor %vm1049_vm9, %vm1369_vm5  ;;  %4149 = vset.pattern.permute.xlu0 %v4240_v3 }
 0x1b5   : > { %v2317_v52 = vmax.f32 %v2089_v36, 0.0  ;;  %481 = vperm.xlu1 %4120, %v4943_v32   ;;  %vm922_vm8 = vcmp.eq.s32.totalorder %v4559_v4, %v763_v43  ;;  %vm923_vm15 = vcmp.eq.s32.totalorder %v4566_v7, %v763_v43  ;;  %vm5259_vm13 = vmor %vm1048_vm11, %vm1368_vm10  ;;  %v5355_v36 = vld [vmem:[%s4347_s21 + $0x1e8] sm:$0xff]  ;;  %v5368_v60 = vld [vmem:[%s4347_s21 + $0x1f8] sm:$0xff] }
 0x1b6   : > { %vm1050_vm0 = vmor %vm602_vm4, %vm922_vm8  ;;  %532 = vperm.xlu0 %4149, %v5355_v36  }
 0x1b7   : > { %v2376_v56 = vpack.c.bf16 %v2317_v52, %v2316_v28  ;;  %vm1051_vm2 = vmor %vm603_vm12, %vm923_vm15  ;;  %vm1373_vm12 = vcmp.eq.s32.totalorder %v4566_v7, %v5123_v40  ;;  %v5380_v52 = vld [vmem:[%s4347_s21 + $0x1f0] sm:$0xff] }
 0x1b9   : > { %3884 = vmatprep.mubr.msk.bf16.mxu1 %vm2427_vm14, %v2376_v56  ;;  %4121 = vset.pattern.permute.xlu1 %v4239_v1  ;;  %v1211_v21 = vpop.permute.xlu1 %1210 }
 0x1ba   : > { %vm1370_vm1 = vcmp.eq.s32.totalorder %v4559_v4, %v1211_v21  ;;  %vm1371_vm6 = vcmp.eq.s32.totalorder %v4566_v7, %v1211_v21  ;;  %801 = vperm.xlu1 %4121, %v4943_v32   ;;  %538 = vperm.xlu0 %4149, %v5368_v60  }
 0x1bb   : > { %vm1499_vm7 = vmor %vm1051_vm2, %vm1371_vm6  ;;  %vm606_vm2 = vcmp.eq.s32.totalorder %v4559_v4, %v449_v38  ;;  %vm607_vm6 = vcmp.eq.s32.totalorder %v4566_v7, %v449_v38 }
 0x1bc   : > { %vm3662_vm5 = vmpackc.low %vm1499_vm7, %vm1497_vm3 }
 0x1bd   : > { %3663 = vmatprep.mubr.msk.bf16.mxu0 %vm3662_vm5, %v4241_v20  ;;  %vm1498_vm9 = vmor %vm1050_vm0, %vm1370_vm1 }
 0x1be   : > { %804 = vperm.xlu1 %4121, %v4813_v5   ;;  %vm3664_vm10 = vmpackc.low %vm1498_vm9, %vm5259_vm13  ;;  %v446_v61 = vpop.permute.xlu1 %445  ;;  %vm1372_vm13 = vcmp.eq.s32.totalorder %v4559_v4, %v5123_v40  ;;  %4153 = vset.pattern.permute.xlu0 %v4238_v0 }
 0x1bf   : > { %3665 = vmatmul.mubr.msk.bf16.gmra.mxu0 %vm3664_vm10, %v4241_v20  ;;  %vm605_vm8 = vcmp.eq.s32.totalorder %v4566_v7, %v446_v61  ;;  %vm604_vm15 = vcmp.eq.s32.totalorder %v4559_v4, %v446_v61  ;;  %1303 = vperm.xlu0 %4153, %v5380_v52  }
 0x1c1   : > { %v2093_v35 = vpop.f32.mrf.mxu0 }
 0x1c2   : > { %4122 = vset.pattern.permute.xlu1 %v4238_v0  ;;  %v2094_v8 = vadd.f32 %v5092_v14, %v2093_v35 }
 0x1c3   : > { %v2095_v32 = vpop.f32.mrf.mxu0  ;;  %1252 = vperm.xlu1 %4122, %v4813_v5   ;;  %v766_v62 = vpop.permute.xlu1 %765 }
 0x1c4   : > { %vm925_vm11 = vcmp.eq.s32.totalorder %v4566_v7, %v766_v62  ;;  %vm924_vm4 = vcmp.eq.s32.totalorder %v4559_v4, %v766_v62  ;;  %v2318_v13 = vmax.f32 %v2094_v8, 0.0 }
 0x1c5   : > { %v2096_v59 = vpop.f32.mrf.mxu0  ;;  %vm1053_vm3 = vmor %vm605_vm8, %vm925_vm11 }
 0x1c6   : > { %v2097_v11 = vadd.f32 %v5092_v14, %v2096_v59  ;;  %vm1052_vm0 = vmor %vm604_vm15, %vm924_vm4 }
 0x1c7   : > { %v2098_v5 = vpop.f32.mrf.mxu0  ;;  %4123 = vset.pattern.permute.xlu1 %v4240_v3  ;;  %v769_v23 = vpop.permute.xlu1 %768  ;;  %vm1501_vm5 = vmor %vm1053_vm3, %vm1373_vm12 }
 0x1c8   : > { %v2319_v6 = vmax.f32 %v2097_v11, 0.0  ;;  %487 = vperm.xlu1 %4123, %v4976_v42   ;;  %vm926_vm1 = vcmp.eq.s32.totalorder %v4559_v4, %v769_v23  ;;  %vm927_vm7 = vcmp.eq.s32.totalorder %v4566_v7, %v769_v23  ;;  %vm5298_vm9 = vmor %vm1052_vm0, %vm1372_vm13 }
 0x1c9   : > { %vm1054_vm10 = vmor %vm606_vm2, %vm926_vm1 }
 0x1ca   : > { %v2377_v17 = vpack.c.bf16 %v2319_v6, %v2318_v13  ;;  %vm1055_vm11 = vmor %vm607_vm6, %vm927_vm7  ;;  %vm1377_vm6 = vcmp.eq.s32.totalorder %v4566_v7, %v5169_v2 }
 0x1cc   : > { %3885 = vmatmul.mubr.msk.bf16.gmra.mxu1 %vm2427_vm14, %v2377_v17  ;;  %4125 = vset.pattern.permute.xlu1 %v4239_v1  ;;  %v1217_v46 = vpop.permute.xlu1 %1216 }
 0x1cd   : > { %vm1374_vm4 = vcmp.eq.s32.totalorder %v4559_v4, %v1217_v46  ;;  %vm1375_vm8 = vcmp.eq.s32.totalorder %v4566_v7, %v1217_v46  ;;  %807 = vperm.xlu1 %4125, %v4976_v42   ;;  %v4174_v42 = vld [vmem:[%s4347_s21 + $0x178] sm:$0xff] }
 0x1ce   : > { %vm1503_vm12 = vmor %vm1055_vm11, %vm1375_vm8  ;;  %vm610_vm11 = vcmp.eq.s32.totalorder %v4559_v4, %v455_v39  ;;  %vm611_vm8 = vcmp.eq.s32.totalorder %v4566_v7, %v455_v39 }
 0x1cf   : > { %vm3666_vm15 = vmpackc.low %vm1503_vm12, %vm1501_vm5 }
 0x1d0   : > { %3667 = vmatprep.mubr.msk.bf16.mxu0 %vm3666_vm15, %v4241_v20  ;;  %vm1502_vm3 = vmor %vm1054_vm10, %vm1374_vm4 }
 0x1d1   : > { %810 = vperm.xlu1 %4125, %v4824_v45   ;;  %vm3668_vm13 = vmpackc.low %vm1502_vm3, %vm5298_vm9  ;;  %v452_v40 = vpop.permute.xlu1 %451  ;;  %vm1376_vm9 = vcmp.eq.s32.totalorder %v4559_v4, %v5169_v2  ;;  %v5359_v2 = vpop.permute.xlu0 %466 }
 0x1d2   : > { %3669 = vmatmul.mubr.msk.bf16.gmra.mxu0 %vm3668_vm13, %v4241_v20  ;;  %vm609_vm1 = vcmp.eq.s32.totalorder %v4566_v7, %v452_v40  ;;  %vm608_vm7 = vcmp.eq.s32.totalorder %v4559_v4, %v452_v40 }
 0x1d4   : > { %v2101_v22 = vpop.f32.mrf.mxu0 }
 0x1d5   : > { %4126 = vset.pattern.permute.xlu1 %v4238_v0  ;;  %v2102_v47 = vadd.f32 %v5092_v14, %v2101_v22 }
 0x1d6   : > { %v2103_v24 = vpop.f32.mrf.mxu0  ;;  %1258 = vperm.xlu1 %4126, %v4174_v42   ;;  %v772_v55 = vpop.permute.xlu1 %771 }
 0x1d7   : > { %vm929_vm0 = vcmp.eq.s32.totalorder %v4566_v7, %v772_v55  ;;  %vm928_vm2 = vcmp.eq.s32.totalorder %v4559_v4, %v772_v55  ;;  %v2320_v34 = vmax.f32 %v2102_v47, 0.0 }
 0x1d8   : > { %v2104_v45 = vpop.f32.mrf.mxu0  ;;  %vm5328_vm5 = vmor %vm609_vm1, %vm929_vm0 }
 0x1d9   : > { %v2105_v30 = vadd.f32 %v5092_v14, %v2104_v45  ;;  %vm1056_vm10 = vmor %vm608_vm7, %vm928_vm2 }
 0x1da   : > { %v2106_v33 = vpop.f32.mrf.mxu0  ;;  %4127 = vset.pattern.permute.xlu1 %v4240_v3  ;;  %v775_v50 = vpop.permute.xlu1 %774  ;;  %vm5346_vm15 = vmor %vm5328_vm5, %vm1377_vm6 }
 0x1db   : > { %v2321_v26 = vmax.f32 %v2105_v30, 0.0  ;;  %493 = vperm.xlu1 %4127, %v5005_v49   ;;  %vm930_vm4 = vcmp.eq.s32.totalorder %v4559_v4, %v775_v50  ;;  %vm931_vm12 = vcmp.eq.s32.totalorder %v4566_v7, %v775_v50  ;;  %vm5350_vm3 = vmor %vm1056_vm10, %vm1376_vm9 }
 0x1dc   : > { %vm1058_vm13 = vmor %vm610_vm11, %vm930_vm4 }
 0x1dd   : > { %v2378_v44 = vpack.c.bf16 %v2321_v26, %v2320_v34  ;;  %vm1059_vm0 = vmor %vm611_vm8, %vm931_vm12  ;;  %vm1381_vm8 = vcmp.eq.s32.totalorder %v4566_v7, %v5188_v15 }
 0x1df   : > { %3888 = vmatprep.mubr.msk.bf16.mxu1 %vm2427_vm14, %v2378_v44  ;;  %4128 = vset.pattern.permute.xlu1 %v4239_v1  ;;  %v1223_v53 = vpop.permute.xlu1 %1222 }
 0x1e0   : > { %vm1378_vm2 = vcmp.eq.s32.totalorder %v4559_v4, %v1223_v53  ;;  %vm1379_vm1 = vcmp.eq.s32.totalorder %v4566_v7, %v1223_v53  ;;  %813 = vperm.xlu1 %4128, %v5005_v49   ;;  %v5376_v49 = vpop.permute.xlu0 %472 }
 0x1e1   : > { %vm1507_vm6 = vmor %vm1059_vm0, %vm1379_vm1  ;;  %vm614_vm0 = vcmp.eq.s32.totalorder %v4559_v4, %v5323_v63  ;;  %vm615_vm1 = vcmp.eq.s32.totalorder %v4566_v7, %v5323_v63 }
 0x1e2   : > { %vm3670_vm7 = vmpackc.low %vm1507_vm6, %vm5346_vm15 }
 0x1e3   : > { %3671 = vmatprep.mubr.msk.bf16.mxu0 %vm3670_vm7, %v4241_v20  ;;  %vm1506_vm5 = vmor %vm1058_vm13, %vm1378_vm2 }
 0x1e4   : > { %816 = vperm.xlu1 %4128, %v5028_v37   ;;  %vm3672_vm9 = vmpackc.low %vm1506_vm5, %vm5350_vm3  ;;  %v458_v43 = vpop.permute.xlu1 %457  ;;  %v5388_v35 = vpop.permute.xlu0 %478  ;;  %vm1380_vm3 = vcmp.eq.s32.totalorder %v4559_v4, %v5188_v15 }
 0x1e5   : > { %3673 = vmatmul.mubr.msk.bf16.gmra.mxu0 %vm3672_vm9, %v4241_v20  ;;  %vm613_vm4 = vcmp.eq.s32.totalorder %v4566_v7, %v458_v43  ;;  %vm612_vm12 = vcmp.eq.s32.totalorder %v4559_v4, %v458_v43 }
 0x1e7   : > { %v2109_v28 = vpop.f32.mrf.mxu0 }
 0x1e8   : > { %4129 = vset.pattern.permute.xlu1 %v4238_v0  ;;  %v2110_v21 = vadd.f32 %v5092_v14, %v2109_v28  ;;  %v5408_v38 = vpop.permute.xlu0 %484 }
 0x1e9   : > { %v2111_v56 = vpop.f32.mrf.mxu0  ;;  %1264 = vperm.xlu1 %4129, %v5028_v37   ;;  %v778_v57 = vpop.permute.xlu1 %777 }
 0x1ea   : > { %vm933_vm10 = vcmp.eq.s32.totalorder %v4566_v7, %v778_v57  ;;  %vm932_vm11 = vcmp.eq.s32.totalorder %v4559_v4, %v778_v57  ;;  %v2322_v8 = vmax.f32 %v2110_v21, 0.0 }
 0x1eb   : > { %v2112_v61 = vpop.f32.mrf.mxu0  ;;  %vm1061_vm15 = vmor %vm613_vm4, %vm933_vm10 }
 0x1ec   : > { %v2113_v32 = vadd.f32 %v5092_v14, %v2112_v61  ;;  %vm1060_vm13 = vmor %vm612_vm12, %vm932_vm11  ;;  %v5423_v13 = vpop.permute.xlu0 %490 }
 0x1ed   : > { %v2114_v37 = vpop.f32.mrf.mxu0  ;;  %4130 = vset.pattern.permute.xlu1 %v4240_v3  ;;  %v781_v62 = vpop.permute.xlu1 %780  ;;  %vm1509_vm7 = vmor %vm1061_vm15, %vm1381_vm8 }
 0x1ee   : > { %v2323_v59 = vmax.f32 %v2113_v32, 0.0  ;;  %499 = vperm.xlu1 %4130, %v5013_v54   ;;  %vm934_vm2 = vcmp.eq.s32.totalorder %v4559_v4, %v781_v62  ;;  %vm935_vm6 = vcmp.eq.s32.totalorder %v4566_v7, %v781_v62  ;;  %vm5410_vm5 = vmor %vm1060_vm13, %vm1380_vm3 }
 0x1ef   : > { %vm1062_vm9 = vmor %vm614_vm0, %vm934_vm2 }
 0x1f0   : > { %v2379_v11 = vpack.c.bf16 %v2323_v59, %v2322_v8  ;;  %vm1063_vm10 = vmor %vm615_vm1, %vm935_vm6  ;;  %v1232_v46 = vpop.permute.xlu0 %1231 }
 0x1f2   : > { %3889 = vmatmul.mubr.msk.bf16.gmra.mxu1 %vm2427_vm14, %v2379_v11  ;;  %4131 = vset.pattern.permute.xlu1 %v4239_v1  ;;  %v1229_v23 = vpop.permute.xlu1 %1228 }
 0x1f3   : > { %vm1382_vm11 = vcmp.eq.s32.totalorder %v4559_v4, %v1229_v23  ;;  %vm1383_vm4 = vcmp.eq.s32.totalorder %v4566_v7, %v1229_v23  ;;  %819 = vperm.xlu1 %4131, %v5013_v54  }
 0x1f4   : > { %vm1511_vm8 = vmor %vm1063_vm10, %vm1383_vm4  ;;  %vm618_vm10 = vcmp.eq.s32.totalorder %v4559_v4, %v5359_v2  ;;  %vm619_vm4 = vcmp.eq.s32.totalorder %v4566_v7, %v5359_v2  ;;  %v1238_v50 = vpop.permute.xlu0 %1237 }
 0x1f5   : > { %vm3674_vm12 = vmpackc.low %vm1511_vm8, %vm1509_vm7  ;;  %vm1384_vm7 = vcmp.eq.s32.totalorder %v4559_v4, %v1232_v46 }
 0x1f6   : > { %3675 = vmatprep.mubr.msk.bf16.mxu0 %vm3674_vm12, %v4241_v20  ;;  %vm1510_vm15 = vmor %vm1062_vm9, %vm1382_vm11  ;;  %vm1385_vm9 = vcmp.eq.s32.totalorder %v4566_v7, %v1232_v46 }
 0x1f7   : > { %822 = vperm.xlu1 %4131, %v5061_v9   ;;  %vm3676_vm3 = vmpackc.low %vm1510_vm15, %vm5410_vm5  ;;  %v464_v15 = vpop.permute.xlu1 %463 }
 0x1f8   : > { %3677 = vmatmul.mubr.msk.bf16.gmra.mxu0 %vm3676_vm3, %v4241_v20  ;;  %vm616_vm2 = vcmp.eq.s32.totalorder %v4559_v4, %v464_v15  ;;  %vm617_vm1 = vcmp.eq.s32.totalorder %v4566_v7, %v464_v15  ;;  %v1244_v21 = vpop.permute.xlu0 %1243 }
 0x1fa   : > { %v2117_v6 = vpop.f32.mrf.mxu0 }
 0x1fb   : > { %4132 = vset.pattern.permute.xlu1 %v4238_v0  ;;  %v2118_v19 = vadd.f32 %v5092_v14, %v2117_v6 }
 0x1fc   : > { %v2119_v17 = vpop.f32.mrf.mxu0  ;;  %1270 = vperm.xlu1 %4132, %v5061_v9   ;;  %v784_v54 = vpop.permute.xlu1 %783 }
 0x1fd   : > { %vm936_vm13 = vcmp.eq.s32.totalorder %v4559_v4, %v784_v54  ;;  %vm937_vm0 = vcmp.eq.s32.totalorder %v4566_v7, %v784_v54  ;;  %v2324_v24 = vmax.f32 %v2118_v19, 0.0  ;;  %v1250_v17 = vpop.permute.xlu0 %1249 }
 0x1fe   : > { %v2120_v40 = vpop.f32.mrf.mxu0  ;;  %vm1064_vm6 = vmor %vm616_vm2, %vm936_vm13 }
 0x1ff   : > { %v2121_v22 = vadd.f32 %v5092_v14, %v2120_v40  ;;  %vm1065_vm5 = vmor %vm617_vm1, %vm937_vm0 }
 0x200   : > { %v2122_v39 = vpop.f32.mrf.mxu0  ;;  %4133 = vset.pattern.permute.xlu1 %v4240_v3  ;;  %v787_v9 = vpop.permute.xlu1 %786  ;;  %vm5443_vm8 = vmor %vm1064_vm6, %vm1384_vm7 }
 0x201   : > { %v2325_v42 = vmax.f32 %v2121_v22, 0.0  ;;  %505 = vperm.xlu1 %4133, %v5021_v58   ;;  %vm938_vm11 = vcmp.eq.s32.totalorder %v4559_v4, %v787_v9  ;;  %vm939_vm12 = vcmp.eq.s32.totalorder %v4566_v7, %v787_v9  ;;  %vm1513_vm15 = vmor %vm1065_vm5, %vm1385_vm9 }
 0x202   : > { %vm1066_vm3 = vmor %vm618_vm10, %vm938_vm11 }
 0x203   : > { %v2380_v47 = vpack.c.bf16 %v2325_v42, %v2324_v24  ;;  %vm1067_vm13 = vmor %vm619_vm4, %vm939_vm12  ;;  %vm1388_vm12 = vcmp.eq.s32.totalorder %v4559_v4, %v1238_v50  ;;  %v1256_v42 = vpop.permute.xlu0 %1255 }
 0x205   : > { %3892 = vmatprep.mubr.msk.bf16.mxu1 %vm2427_vm14, %v2380_v47  ;;  %4134 = vset.pattern.permute.xlu1 %v4239_v1  ;;  %v1235_v45 = vpop.permute.xlu1 %1234  ;;  %v5559_v47 = vld [vmem:[%s6229_s2] ss:$0 sm:$0xff] }
 0x206   : > { %vm1386_vm0 = vcmp.eq.s32.totalorder %v4559_v4, %v1235_v45  ;;  %vm1387_vm2 = vcmp.eq.s32.totalorder %v4566_v7, %v1235_v45  ;;  %825 = vperm.xlu1 %4134, %v5021_v58  }
 0x207   : > { %vm1514_vm1 = vmor %vm1066_vm3, %vm1386_vm0  ;;  %vm1389_vm3 = vcmp.eq.s32.totalorder %v4566_v7, %v1238_v50 }
 0x208   : > { %vm1515_vm6 = vmor %vm1067_vm13, %vm1387_vm2  ;;  %vm622_vm13 = vcmp.eq.s32.totalorder %v4559_v4, %v5376_v49  ;;  %vm623_vm2 = vcmp.eq.s32.totalorder %v4566_v7, %v5376_v49 }
 0x209   : > { %vm3678_vm7 = vmpackc.low %vm1515_vm6, %vm1513_vm15 }
 0x20a   : > { %3679 = vmatprep.mubr.msk.bf16.mxu0 %vm3678_vm7, %v4241_v20  ;;  %828 = vperm.xlu1 %4134, %v5112_v29   ;;  %vm3680_vm5 = vmpackc.low %vm1514_vm1, %vm5443_vm8  ;;  %v470_v30 = vpop.permute.xlu1 %469 }
 0x20b   : > { %3681 = vmatmul.mubr.msk.bf16.gmra.mxu0 %vm3680_vm5, %v4241_v20  ;;  %vm620_vm11 = vcmp.eq.s32.totalorder %v4559_v4, %v470_v30  ;;  %vm621_vm4 = vcmp.eq.s32.totalorder %v4566_v7, %v470_v30 }
 0x20d   : > { %v2125_v63 = vpop.f32.mrf.mxu0 }
 0x20e   : > { %4136 = vset.pattern.permute.xlu1 %v4238_v0  ;;  %v2126_v33 = vadd.f32 %v5092_v14, %v2125_v63 }
 0x20f   : > { %v2127_v31 = vpop.f32.mrf.mxu0  ;;  %1276 = vperm.xlu1 %4136, %v5112_v29   ;;  %v790_v58 = vpop.permute.xlu1 %789 }
 0x210   : > { %vm940_vm9 = vcmp.eq.s32.totalorder %v4559_v4, %v790_v58  ;;  %vm941_vm10 = vcmp.eq.s32.totalorder %v4566_v7, %v790_v58  ;;  %v2326_v18 = vmax.f32 %v2126_v33, 0.0  ;;  %v5566_v31 = vpop.permute.xlu0 %1261 }
 0x211   : > { %v2128_v34 = vpop.f32.mrf.mxu0  ;;  %vm1068_vm8 = vmor %vm620_vm11, %vm940_vm9 }
 0x212   : > { %v2129_v26 = vadd.f32 %v5092_v14, %v2128_v34  ;;  %vm1069_vm15 = vmor %vm621_vm4, %vm941_vm10 }
 0x213   : > { %v2130_v44 = vpop.f32.mrf.mxu0  ;;  %4137 = vset.pattern.permute.xlu1 %v4240_v3  ;;  %v793_v29 = vpop.permute.xlu1 %792  ;;  %vm5475_vm1 = vmor %vm1068_vm8, %vm1388_vm12 }
 0x214   : > { %v2327_v41 = vmax.f32 %v2129_v26, 0.0  ;;  %511 = vperm.xlu1 %4137, %v5198_v12   ;;  %vm942_vm0 = vcmp.eq.s32.totalorder %v4559_v4, %v793_v29  ;;  %vm943_vm6 = vcmp.eq.s32.totalorder %v4566_v7, %v793_v29  ;;  %vm1517_vm7 = vmor %vm1069_vm15, %vm1389_vm3 }
 0x215   : > { %vm1070_vm5 = vmor %vm622_vm13, %vm942_vm0 }
 0x216   : > { %v2381_v2 = vpack.c.bf16 %v2327_v41, %v2326_v18  ;;  %vm1071_vm9 = vmor %vm623_vm2, %vm943_vm6  ;;  %vm1392_vm6 = vcmp.eq.s32.totalorder %v4559_v4, %v1244_v21 }
 0x218   : > { %3893 = vmatmul.mubr.msk.bf16.gmra.mxu1 %vm2427_vm14, %v2381_v2  ;;  %4138 = vset.pattern.permute.xlu1 %v4239_v1  ;;  %v1241_v43 = vpop.permute.xlu1 %1240 }
 0x219   : > { %vm1390_vm10 = vcmp.eq.s32.totalorder %v4559_v4, %v1241_v43  ;;  %vm1391_vm11 = vcmp.eq.s32.totalorder %v4566_v7, %v1241_v43  ;;  %831 = vperm.xlu1 %4138, %v5198_v12  }
 0x21a   : > { %vm1518_vm4 = vmor %vm1070_vm5, %vm1390_vm10  ;;  %vm1393_vm5 = vcmp.eq.s32.totalorder %v4566_v7, %v1244_v21 }
 0x21b   : > { %vm1519_vm8 = vmor %vm1071_vm9, %vm1391_vm11  ;;  %vm626_vm9 = vcmp.eq.s32.totalorder %v4559_v4, %v5388_v35  ;;  %vm627_vm11 = vcmp.eq.s32.totalorder %v4566_v7, %v5388_v35 }
 0x21c   : > { %vm3682_vm12 = vmpackc.low %vm1519_vm8, %vm1517_vm7 }
 0x21d   : > { %3683 = vmatprep.mubr.msk.bf16.mxu0 %vm3682_vm12, %v4241_v20  ;;  %834 = vperm.xlu1 %4138, %v5140_v48   ;;  %vm3684_vm15 = vmpackc.low %vm1518_vm4, %vm5475_vm1  ;;  %v476_v49 = vpop.permute.xlu1 %475 }
 0x21e   : > { %3685 = vmatmul.mubr.msk.bf16.gmra.mxu0 %vm3684_vm15, %v4241_v20  ;;  %vm624_vm0 = vcmp.eq.s32.totalorder %v4559_v4, %v476_v49  ;;  %vm625_vm2 = vcmp.eq.s32.totalorder %v4566_v7, %v476_v49 }
 0x220   : > { %v2133_v28 = vpop.f32.mrf.mxu0 }
 0x221   : > { %4139 = vset.pattern.permute.xlu1 %v4238_v0  ;;  %v2134_v57 = vadd.f32 %v5092_v14, %v2133_v28 }
 0x222   : > { %v2135_v56 = vpop.f32.mrf.mxu0  ;;  %1282 = vperm.xlu1 %4139, %v5140_v48   ;;  %v796_v12 = vpop.permute.xlu1 %795 }
 0x223   : > { %vm944_vm3 = vcmp.eq.s32.totalorder %v4559_v4, %v796_v12  ;;  %vm945_vm13 = vcmp.eq.s32.totalorder %v4566_v7, %v796_v12  ;;  %v2328_v62 = vmax.f32 %v2134_v57, 0.0 }
 0x224   : > { %v2136_v61 = vpop.f32.mrf.mxu0  ;;  %vm1072_vm1 = vmor %vm624_vm0, %vm944_vm3 }
 0x225   : > { %v2137_v32 = vadd.f32 %v5092_v14, %v2136_v61  ;;  %vm1073_vm7 = vmor %vm625_vm2, %vm945_vm13 }
 0x226   : > { %v2138_v37 = vpop.f32.mrf.mxu0  ;;  %4140 = vset.pattern.permute.xlu1 %v4240_v3  ;;  %v799_v48 = vpop.permute.xlu1 %798  ;;  %vm5507_vm4 = vmor %vm1072_vm1, %vm1392_vm6 }
 0x227   : > { %v2329_v8 = vmax.f32 %v2137_v32, 0.0  ;;  %517 = vperm.xlu1 %4140, %v5230_v16   ;;  %vm946_vm10 = vcmp.eq.s32.totalorder %v4559_v4, %v799_v48  ;;  %vm947_vm8 = vcmp.eq.s32.totalorder %v4566_v7, %v799_v48  ;;  %vm1521_vm12 = vmor %vm1073_vm7, %vm1393_vm5 }
 0x228   : > { %vm1074_vm15 = vmor %vm626_vm9, %vm946_vm10 }
 0x229   : > { %v2382_v11 = vpack.c.bf16 %v2329_v8, %v2328_v62  ;;  %vm1075_vm3 = vmor %vm627_vm11, %vm947_vm8  ;;  %vm1396_vm8 = vcmp.eq.s32.totalorder %v4559_v4, %v1250_v17 }
 0x22b   : > { %3896 = vmatprep.mubr.msk.bf16.mxu1 %vm2427_vm14, %v2382_v11  ;;  %4141 = vset.pattern.permute.xlu1 %v4239_v1  ;;  %v1247_v5 = vpop.permute.xlu1 %1246 }
 0x22c   : > { %vm1394_vm13 = vcmp.eq.s32.totalorder %v4559_v4, %v1247_v5  ;;  %vm1395_vm0 = vcmp.eq.s32.totalorder %v4566_v7, %v1247_v5  ;;  %837 = vperm.xlu1 %4141, %v5230_v16  }
 0x22d   : > { %vm1522_vm2 = vmor %vm1074_vm15, %vm1394_vm13  ;;  %vm1397_vm15 = vcmp.eq.s32.totalorder %v4566_v7, %v1250_v17 }
 0x22e   : > { %vm1523_vm1 = vmor %vm1075_vm3, %vm1395_vm0  ;;  %vm630_vm3 = vcmp.eq.s32.totalorder %v4559_v4, %v5408_v38  ;;  %vm631_vm0 = vcmp.eq.s32.totalorder %v4566_v7, %v5408_v38 }
 0x22f   : > { %vm3686_vm6 = vmpackc.low %vm1523_vm1, %vm1521_vm12 }
 0x230   : > { %3687 = vmatprep.mubr.msk.bf16.mxu0 %vm3686_vm6, %v4241_v20  ;;  %840 = vperm.xlu1 %4141, %v5175_v10   ;;  %vm3688_vm7 = vmpackc.low %vm1522_vm2, %vm5507_vm4  ;;  %v482_v35 = vpop.permute.xlu1 %481 }
 0x231   : > { %3689 = vmatmul.mubr.msk.bf16.gmra.mxu0 %vm3688_vm7, %v4241_v20  ;;  %vm628_vm10 = vcmp.eq.s32.totalorder %v4559_v4, %v482_v35  ;;  %vm629_vm11 = vcmp.eq.s32.totalorder %v4566_v7, %v482_v35 }
 0x233   : > { %v2141_v23 = vpop.f32.mrf.mxu0 }
 0x234   : > { %4142 = vset.pattern.permute.xlu1 %v4238_v0  ;;  %v2142_v6 = vadd.f32 %v5092_v14, %v2141_v23 }
 0x235   : > { %v2143_v15 = vpop.f32.mrf.mxu0  ;;  %1288 = vperm.xlu1 %4142, %v5175_v10   ;;  %v802_v16 = vpop.permute.xlu1 %801 }
 0x236   : > { %vm948_vm5 = vcmp.eq.s32.totalorder %v4559_v4, %v802_v16  ;;  %vm949_vm9 = vcmp.eq.s32.totalorder %v4566_v7, %v802_v16  ;;  %v2330_v40 = vmax.f32 %v2142_v6, 0.0 }
 0x237   : > { %v2144_v54 = vpop.f32.mrf.mxu0  ;;  %vm1076_vm4 = vmor %vm628_vm10, %vm948_vm5 }
 0x238   : > { %v2145_v19 = vadd.f32 %v5092_v14, %v2144_v54  ;;  %vm1077_vm12 = vmor %vm629_vm11, %vm949_vm9 }
 0x239   : > { %v2146_v46 = vpop.f32.mrf.mxu0  ;;  %4143 = vset.pattern.permute.xlu1 %v4240_v3  ;;  %v805_v10 = vpop.permute.xlu1 %804  ;;  %vm5539_vm2 = vmor %vm1076_vm4, %vm1396_vm8 }
 0x23a   : > { %v2331_v22 = vmax.f32 %v2145_v19, 0.0  ;;  %523 = vperm.xlu1 %4143, %v5269_v27   ;;  %vm950_vm13 = vcmp.eq.s32.totalorder %v4559_v4, %v805_v10  ;;  %vm951_vm1 = vcmp.eq.s32.totalorder %v4566_v7, %v805_v10  ;;  %vm1525_vm6 = vmor %vm1077_vm12, %vm1397_vm15 }
 0x23b   : > { %vm1078_vm7 = vmor %vm630_vm3, %vm950_vm13 }
 0x23c   : > { %v2383_v39 = vpack.c.bf16 %v2331_v22, %v2330_v40  ;;  %vm1079_vm5 = vmor %vm631_vm0, %vm951_vm1  ;;  %vm1400_vm1 = vcmp.eq.s32.totalorder %v4559_v4, %v1256_v42 }
 0x23e   : > { %3897 = vmatmul.mubr.msk.bf16.gmra.mxu1 %vm2427_vm14, %v2383_v39  ;;  %4145 = vset.pattern.permute.xlu1 %v4239_v1  ;;  %v1253_v9 = vpop.permute.xlu1 %1252 }
 0x23f   : > { %vm1398_vm9 = vcmp.eq.s32.totalorder %v4559_v4, %v1253_v9  ;;  %vm1399_vm10 = vcmp.eq.s32.totalorder %v4566_v7, %v1253_v9  ;;  %843 = vperm.xlu1 %4145, %v5269_v27  }
 0x240   : > { %vm1526_vm11 = vmor %vm1078_vm7, %vm1398_vm9  ;;  %vm1401_vm7 = vcmp.eq.s32.totalorder %v4566_v7, %v1256_v42 }
 0x241   : > { %vm1527_vm4 = vmor %vm1079_vm5, %vm1399_vm10  ;;  %vm634_vm5 = vcmp.eq.s32.totalorder %v4559_v4, %v5423_v13  ;;  %vm635_vm10 = vcmp.eq.s32.totalorder %v4566_v7, %v5423_v13  ;;  %v5588_v13 = vpop.permute.xlu0 %1267 }
 0x242   : > { %vm3690_vm8 = vmpackc.low %vm1527_vm4, %vm1525_vm6 }
 0x243   : > { %3691 = vmatprep.mubr.msk.bf16.mxu0 %vm3690_vm8, %v4241_v20  ;;  %846 = vperm.xlu1 %4145, %v5185_v51   ;;  %vm3692_vm12 = vmpackc.low %vm1526_vm11, %vm5539_vm2  ;;  %v488_v38 = vpop.permute.xlu1 %487 }
 0x244   : > { %3693 = vmatmul.mubr.msk.bf16.gmra.mxu0 %vm3692_vm12, %v4241_v20  ;;  %vm632_vm13 = vcmp.eq.s32.totalorder %v4559_v4, %v488_v38  ;;  %vm633_vm0 = vcmp.eq.s32.totalorder %v4566_v7, %v488_v38 }
 0x245   : > { %v5595_v18 = vpop.permute.xlu0 %1273 }
 0x246   : > { %v2149_v24 = vpop.f32.mrf.mxu0 }
 0x247   : > { %4146 = vset.pattern.permute.xlu1 %v4238_v0  ;;  %v2150_v45 = vadd.f32 %v5559_v47, %v2149_v24 }
 0x248   : > { %v2151_v55 = vpop.f32.mrf.mxu0  ;;  %1294 = vperm.xlu1 %4146, %v5185_v51   ;;  %v808_v27 = vpop.permute.xlu1 %807 }
 0x249   : > { %vm952_vm15 = vcmp.eq.s32.totalorder %v4559_v4, %v808_v27  ;;  %vm953_vm3 = vcmp.eq.s32.totalorder %v4566_v7, %v808_v27  ;;  %v2332_v33 = vmax.f32 %v2150_v45, 0.0  ;;  %v497_v28 = vpop.permute.xlu0 %496 }
 0x24a   : > { %v2152_v30 = vpop.f32.mrf.mxu0  ;;  %vm1080_vm2 = vmor %vm632_vm13, %vm952_vm15 }
 0x24b   : > { %v2153_v63 = vadd.f32 %v5559_v47, %v2152_v30  ;;  %vm1081_vm6 = vmor %vm633_vm0, %vm953_vm3 }
 0x24c   : > { %v2154_v51 = vpop.f32.mrf.mxu0  ;;  %4147 = vset.pattern.permute.xlu1 %v4240_v3  ;;  %v811_v58 = vpop.permute.xlu1 %810  ;;  %vm5578_vm11 = vmor %vm1080_vm2, %vm1400_vm1 }
 0x24d   : > { %v2333_v50 = vmax.f32 %v2153_v63, 0.0  ;;  %529 = vperm.xlu1 %4147, %v5315_v25   ;;  %vm954_vm9 = vcmp.eq.s32.totalorder %v4559_v4, %v811_v58  ;;  %vm955_vm4 = vcmp.eq.s32.totalorder %v4566_v7, %v811_v58  ;;  %vm1529_vm8 = vmor %vm1081_vm6, %vm1401_vm7  ;;  %v503_v59 = vpop.permute.xlu0 %502 }
 0x24e   : > { %vm1082_vm12 = vmor %vm634_vm5, %vm954_vm9 }
 0x24f   : > { %v2384_v26 = vpack.c.bf16 %v2333_v50, %v2332_v33  ;;  %vm1083_vm15 = vmor %vm635_vm10, %vm955_vm4  ;;  %vm1404_vm10 = vcmp.eq.s32.totalorder %v4559_v4, %v5566_v31 }
 0x251   : > { %3900 = vmatprep.mubr.msk.bf16.mxu1 %vm2427_vm14, %v2384_v26  ;;  %4148 = vset.pattern.permute.xlu1 %v4239_v1  ;;  %v1259_v44 = vpop.permute.xlu1 %1258  ;;  %v509_v6 = vpop.permute.xlu0 %508 }
 0x252   : > { %vm1402_vm3 = vcmp.eq.s32.totalorder %v4559_v4, %v1259_v44  ;;  %vm1403_vm13 = vcmp.eq.s32.totalorder %v4566_v7, %v1259_v44  ;;  %849 = vperm.xlu1 %4148, %v5315_v25  }
 0x253   : > { %vm1530_vm0 = vmor %vm1082_vm12, %vm1402_vm3 }
 0x254   : > { %vm1531_vm2 = vmor %vm1083_vm15, %vm1403_vm13  ;;  %vm638_vm15 = vcmp.eq.s32.totalorder %v4559_v4, %v497_v28 }
 0x255   : > { %vm3694_vm1 = vmpackc.low %vm1531_vm2, %vm1529_vm8  ;;  %vm1405_vm8 = vcmp.eq.s32.totalorder %v4566_v7, %v5566_v31  ;;  %v5659_v40 = vpop.permute.xlu0 %514 }
 0x256   : > { %3695 = vmatprep.mubr.msk.bf16.mxu0 %vm3694_vm1, %v4241_v20  ;;  %852 = vperm.xlu1 %4148, %v5355_v36   ;;  %vm3696_vm6 = vmpackc.low %vm1530_vm0, %vm5578_vm11  ;;  %v494_v29 = vpop.permute.xlu1 %493  ;;  %vm639_vm0 = vcmp.eq.s32.totalorder %v4566_v7, %v497_v28 }
 0x257   : > { %3697 = vmatmul.mubr.msk.bf16.gmra.mxu0 %vm3696_vm6, %v4241_v20  ;;  %vm636_vm9 = vcmp.eq.s32.totalorder %v4559_v4, %v494_v29  ;;  %vm637_vm11 = vcmp.eq.s32.totalorder %v4566_v7, %v494_v29 }
 0x259   : > { %v2157_v41 = vpop.f32.mrf.mxu0  ;;  %v5676_v55 = vpop.permute.xlu0 %520 }
 0x25a   : > { %4150 = vset.pattern.permute.xlu1 %v4238_v0  ;;  %v2158_v2 = vadd.f32 %v5559_v47, %v2157_v41 }
 0x25b   : > { %v2159_v25 = vpop.f32.mrf.mxu0  ;;  %1300 = vperm.xlu1 %4150, %v5355_v36   ;;  %v814_v53 = vpop.permute.xlu1 %813 }
 0x25c   : > { %vm956_vm7 = vcmp.eq.s32.totalorder %v4559_v4, %v814_v53  ;;  %vm957_vm5 = vcmp.eq.s32.totalorder %v4566_v7, %v814_v53  ;;  %v2334_v12 = vmax.f32 %v2158_v2, 0.0 }
 0x25d   : > { %v2160_v43 = vpop.f32.mrf.mxu0  ;;  %vm1084_vm4 = vmor %vm636_vm9, %vm956_vm7  ;;  %v5684_v30 = vpop.permute.xlu0 %526 }
 0x25e   : > { %v2161_v49 = vadd.f32 %v5559_v47, %v2160_v43  ;;  %vm1085_vm12 = vmor %vm637_vm11, %vm957_vm5 }
 0x25f   : > { %v2162_v36 = vpop.f32.mrf.mxu0  ;;  %4151 = vset.pattern.permute.xlu1 %v4240_v3  ;;  %v817_v56 = vpop.permute.xlu1 %816  ;;  %vm5613_vm13 = vmor %vm1084_vm4, %vm1404_vm10 }
 0x260   : > { %v2335_v57 = vmax.f32 %v2161_v49, 0.0  ;;  %535 = vperm.xlu1 %4151, %v5380_v52   ;;  %vm958_vm3 = vcmp.eq.s32.totalorder %v4559_v4, %v817_v56  ;;  %vm959_vm2 = vcmp.eq.s32.totalorder %v4566_v7, %v817_v56  ;;  %vm1533_vm1 = vmor %vm1085_vm12, %vm1405_vm8 }
 0x261   : > { %vm1086_vm6 = vmor %vm638_vm15, %vm958_vm3  ;;  %v1280_v33 = vpop.permute.xlu0 %1279 }
 0x262   : > { %v2385_v61 = vpack.c.bf16 %v2335_v57, %v2334_v12  ;;  %vm1087_vm7 = vmor %vm639_vm0, %vm959_vm2 }
 0x264   : > { %3901 = vmatmul.mubr.msk.bf16.gmra.mxu1 %vm2427_vm14, %v2385_v61  ;;  %4152 = vset.pattern.permute.xlu1 %v4239_v1  ;;  %v1265_v3 = vpop.permute.xlu1 %1264 }
 0x265   : > { %vm1406_vm5 = vcmp.eq.s32.totalorder %v4559_v4, %v1265_v3  ;;  %vm1407_vm9 = vcmp.eq.s32.totalorder %v4566_v7, %v1265_v3  ;;  %855 = vperm.xlu1 %4152, %v5380_v52   ;;  %v1286_v36 = vpop.permute.xlu0 %1285 }
 0x266   : > { %vm1534_vm10 = vmor %vm1086_vm6, %vm1406_vm5 }
 0x267   : > { %vm1535_vm11 = vmor %vm1087_vm7, %vm1407_vm9  ;;  %vm642_vm7 = vcmp.eq.s32.totalorder %v4559_v4, %v503_v59 }
 0x268   : > { %vm3698_vm4 = vmpackc.low %vm1535_vm11, %vm1533_vm1  ;;  %vm1409_vm1 = vcmp.eq.s32.totalorder %v4566_v7, %v5588_v13 }
 0x269   : > { %3699 = vmatprep.mubr.msk.bf16.mxu0 %vm3698_vm4, %v4241_v20  ;;  %858 = vperm.xlu1 %4152, %v5368_v60   ;;  %vm3700_vm8 = vmpackc.low %vm1534_vm10, %vm5613_vm13  ;;  %v500_v32 = vpop.permute.xlu1 %499  ;;  %vm1408_vm13 = vcmp.eq.s32.totalorder %v4559_v4, %v5588_v13  ;;  %vm643_vm10 = vcmp.eq.s32.totalorder %v4566_v7, %v503_v59 }
 0x26a   : > { %3701 = vmatmul.mubr.msk.bf16.gmra.mxu0 %vm3700_vm8, %v4241_v20  ;;  %vm640_vm3 = vcmp.eq.s32.totalorder %v4559_v4, %v500_v32  ;;  %vm641_vm0 = vcmp.eq.s32.totalorder %v4566_v7, %v500_v32 }
 0x26c   : > { %v2165_v1 = vpop.f32.mrf.mxu0 }
 0x26d   : > { %4154 = vset.pattern.permute.xlu1 %v4238_v0  ;;  %v2166_v48 = vadd.f32 %v5559_v47, %v2165_v1 }
 0x26e   : > { %v2167_v37 = vpop.f32.mrf.mxu0  ;;  %1306 = vperm.xlu1 %4154, %v5368_v60   ;;  %v820_v52 = vpop.permute.xlu1 %819 }
 0x26f   : > { %vm960_vm12 = vcmp.eq.s32.totalorder %v4559_v4, %v820_v52  ;;  %vm961_vm15 = vcmp.eq.s32.totalorder %v4566_v7, %v820_v52  ;;  %v2336_v11 = vmax.f32 %v2166_v48, 0.0 }
 0x270   : > { %v2168_v62 = vpop.f32.mrf.mxu0  ;;  %vm1088_vm2 = vmor %vm640_vm3, %vm960_vm12 }
 0x271   : > { %v2169_v8 = vadd.f32 %v5559_v47, %v2168_v62  ;;  %vm1089_vm6 = vmor %vm641_vm0, %vm961_vm15 }
 0x272   : > { %v2170_v0 = vpop.f32.mrf.mxu0  ;;  %v823_v60 = vpop.permute.xlu1 %822  ;;  %vm5643_vm9 = vmor %vm1088_vm2, %vm1408_vm13 }
 0x273   : > { %v2337_v5 = vmax.f32 %v2169_v8, 0.0  ;;  %vm962_vm5 = vcmp.eq.s32.totalorder %v4559_v4, %v823_v60  ;;  %vm963_vm11 = vcmp.eq.s32.totalorder %v4566_v7, %v823_v60  ;;  %vm1537_vm4 = vmor %vm1089_vm6, %vm1409_vm1  ;;  %v1292_v0 = vpop.permute.xlu0 %1291 }
 0x274   : > { %vm1090_vm8 = vmor %vm642_vm7, %vm962_vm5 }
 0x275   : > { %v2386_v23 = vpack.c.bf16 %v2337_v5, %v2336_v11  ;;  %vm1091_vm12 = vmor %vm643_vm10, %vm963_vm11 }
 0x277   : > { %3904 = vmatprep.mubr.msk.bf16.mxu1 %vm2427_vm14, %v2386_v23  ;;  %v1271_v15 = vpop.permute.xlu1 %1270 }
 0x278   : > { %vm1410_vm15 = vcmp.eq.s32.totalorder %v4559_v4, %v1271_v15  ;;  %vm1411_vm3 = vcmp.eq.s32.totalorder %v4566_v7, %v1271_v15 }
 0x279   : > { %vm1538_vm0 = vmor %vm1090_vm8, %vm1410_vm15 }
 0x27a   : > { %vm1539_vm13 = vmor %vm1091_vm12, %vm1411_vm3  ;;  %vm646_vm12 = vcmp.eq.s32.totalorder %v4559_v4, %v509_v6 }
 0x27b   : > { %vm3702_vm2 = vmpackc.low %vm1539_vm13, %vm1537_vm4  ;;  %vm1413_vm4 = vcmp.eq.s32.totalorder %v4566_v7, %v5595_v18 }
 0x27c   : > { %3703 = vmatprep.mubr.msk.bf16.mxu0 %vm3702_vm2, %v4241_v20  ;;  %vm3704_vm1 = vmpackc.low %vm1538_vm0, %vm5643_vm9  ;;  %v506_v16 = vpop.permute.xlu1 %505  ;;  %vm1412_vm9 = vcmp.eq.s32.totalorder %v4559_v4, %v5595_v18  ;;  %vm647_vm0 = vcmp.eq.s32.totalorder %v4566_v7, %v509_v6 }
 0x27d   : > { %3705 = vmatmul.mubr.msk.bf16.gmra.mxu0 %vm3704_vm1, %v4241_v20  ;;  %vm644_vm5 = vcmp.eq.s32.totalorder %v4559_v4, %v506_v16  ;;  %vm645_vm10 = vcmp.eq.s32.totalorder %v4566_v7, %v506_v16 }
 0x27f   : > { %v2173_v17 = vpop.f32.mrf.mxu0 }
 0x280   : > { %v2174_v46 = vadd.f32 %v5559_v47, %v2173_v17 }
 0x281   : > { %v2175_v54 = vpop.f32.mrf.mxu0  ;;  %v826_v19 = vpop.permute.xlu1 %825 }
 0x282   : > { %vm964_vm6 = vcmp.eq.s32.totalorder %v4559_v4, %v826_v19  ;;  %vm965_vm7 = vcmp.eq.s32.totalorder %v4566_v7, %v826_v19  ;;  %v2338_v9 = vmax.f32 %v2174_v46, 0.0  ;;  %v1298_v46 = vpop.permute.xlu0 %1297 }
 0x283   : > { %v2176_v10 = vpop.f32.mrf.mxu0  ;;  %vm1092_vm11 = vmor %vm644_vm5, %vm964_vm6 }
 0x284   : > { %v2177_v22 = vadd.f32 %v5559_v47, %v2176_v10  ;;  %vm1093_vm8 = vmor %vm645_vm10, %vm965_vm7 }
 0x285   : > { %v2178_v14 = vpop.f32.mrf.mxu0  ;;  %v829_v39 = vpop.permute.xlu1 %828  ;;  %vm5670_vm3 = vmor %vm1092_vm11, %vm1412_vm9 }
 0x286   : > { %v2339_v38 = vmax.f32 %v2177_v22, 0.0  ;;  %vm966_vm15 = vcmp.eq.s32.totalorder %v4559_v4, %v829_v39  ;;  %vm967_vm13 = vcmp.eq.s32.totalorder %v4566_v7, %v829_v39  ;;  %vm1541_vm2 = vmor %vm1093_vm8, %vm1413_vm4 }
 0x287   : > { %vm1094_vm1 = vmor %vm646_vm12, %vm966_vm15 }
 0x288   : > { %v2387_v42 = vpack.c.bf16 %v2339_v38, %v2338_v9  ;;  %vm1095_vm6 = vmor %vm647_vm0, %vm967_vm13  ;;  %vm1416_vm13 = vcmp.eq.s32.totalorder %v4559_v4, %v1280_v33  ;;  %v533_v9 = vpop.permute.xlu0 %532 }
 0x28a   : > { %3905 = vmatmul.mubr.msk.bf16.gmra.mxu1 %vm2427_vm14, %v2387_v42  ;;  %v1277_v27 = vpop.permute.xlu1 %1276 }
 0x28b   : > { %vm1414_vm7 = vcmp.eq.s32.totalorder %v4559_v4, %v1277_v27  ;;  %vm1415_vm5 = vcmp.eq.s32.totalorder %v4566_v7, %v1277_v27 }
 0x28c   : > { %vm1542_vm9 = vmor %vm1094_vm1, %vm1414_vm7  ;;  %vm1417_vm1 = vcmp.eq.s32.totalorder %v4566_v7, %v1280_v33 }
 0x28d   : > { %vm1543_vm10 = vmor %vm1095_vm6, %vm1415_vm5  ;;  %vm650_vm6 = vcmp.eq.s32.totalorder %v4559_v4, %v5659_v40  ;;  %vm651_vm5 = vcmp.eq.s32.totalorder %v4566_v7, %v5659_v40 }
 0x28e   : > { %vm3706_vm11 = vmpackc.low %vm1543_vm10, %vm1541_vm2 }
 0x28f   : > { %3707 = vmatprep.mubr.msk.bf16.mxu0 %vm3706_vm11, %v4241_v20  ;;  %vm3708_vm4 = vmpackc.low %vm1542_vm9, %vm5670_vm3  ;;  %v512_v45 = vpop.permute.xlu1 %511 }
 0x290   : > { %3709 = vmatmul.mubr.msk.bf16.gmra.mxu0 %vm3708_vm4, %v4241_v20  ;;  %vm648_vm15 = vcmp.eq.s32.totalorder %v4559_v4, %v512_v45  ;;  %vm649_vm3 = vcmp.eq.s32.totalorder %v4566_v7, %v512_v45 }
 0x292   : > { %v2181_v63 = vpop.f32.mrf.mxu0 }
 0x293   : > { %v2182_v58 = vadd.f32 %v5559_v47, %v2181_v63 }
 0x294   : > { %v2183_v31 = vpop.f32.mrf.mxu0  ;;  %v832_v51 = vpop.permute.xlu1 %831 }
 0x295   : > { %vm968_vm8 = vcmp.eq.s32.totalorder %v4559_v4, %v832_v51  ;;  %vm969_vm12 = vcmp.eq.s32.totalorder %v4566_v7, %v832_v51  ;;  %v2340_v13 = vmax.f32 %v2182_v58, 0.0  ;;  %v539_v31 = vpop.permute.xlu0 %538 }
 0x296   : > { %v2184_v50 = vpop.f32.mrf.mxu0  ;;  %vm1096_vm0 = vmor %vm648_vm15, %vm968_vm8 }
 0x297   : > { %v2185_v34 = vadd.f32 %v5559_v47, %v2184_v50  ;;  %vm1097_vm2 = vmor %vm649_vm3, %vm969_vm12 }
 0x298   : > { %v2186_v26 = vpop.f32.mrf.mxu0  ;;  %v835_v44 = vpop.permute.xlu1 %834  ;;  %vm5700_vm9 = vmor %vm1096_vm0, %vm1416_vm13 }
 0x299   : > { %v2341_v29 = vmax.f32 %v2185_v34, 0.0  ;;  %vm970_vm7 = vcmp.eq.s32.totalorder %v4559_v4, %v835_v44  ;;  %vm971_vm10 = vcmp.eq.s32.totalorder %v4566_v7, %v835_v44  ;;  %vm1545_vm11 = vmor %vm1097_vm2, %vm1417_vm1  ;;  %v1304_v34 = vpop.permute.xlu0 %1303 }
 0x29a   : > { %vm1098_vm4 = vmor %vm650_vm6, %vm970_vm7 }
 0x29b   : > { %v2388_v41 = vpack.c.bf16 %v2341_v29, %v2340_v13  ;;  %vm1099_vm8 = vmor %vm651_vm5, %vm971_vm10  ;;  %vm1420_vm10 = vcmp.eq.s32.totalorder %v4559_v4, %v1286_v36 }
 0x29d   : > { %3908 = vmatprep.mubr.msk.bf16.mxu1 %vm2427_vm14, %v2388_v41  ;;  %v1283_v25 = vpop.permute.xlu1 %1282 }
 0x29e   : > { %vm1418_vm12 = vcmp.eq.s32.totalorder %v4559_v4, %v1283_v25  ;;  %vm1419_vm15 = vcmp.eq.s32.totalorder %v4566_v7, %v1283_v25 }
 0x29f   : > { %vm1546_vm3 = vmor %vm1098_vm4, %vm1418_vm12  ;;  %vm1421_vm4 = vcmp.eq.s32.totalorder %v4566_v7, %v1286_v36 }
 0x2a0   : > { %vm1547_vm0 = vmor %vm1099_vm8, %vm1419_vm15  ;;  %vm654_vm8 = vcmp.eq.s32.totalorder %v4559_v4, %v5676_v55  ;;  %vm655_vm15 = vcmp.eq.s32.totalorder %v4566_v7, %v5676_v55 }
 0x2a1   : > { %vm3710_vm13 = vmpackc.low %vm1547_vm0, %vm1545_vm11 }
 0x2a2   : > { %3711 = vmatprep.mubr.msk.bf16.mxu0 %vm3710_vm13, %v4241_v20  ;;  %vm3712_vm1 = vmpackc.low %vm1546_vm3, %vm5700_vm9  ;;  %v518_v53 = vpop.permute.xlu1 %517 }
 0x2a3   : > { %3713 = vmatmul.mubr.msk.bf16.gmra.mxu0 %vm3712_vm1, %v4241_v20  ;;  %vm652_vm7 = vcmp.eq.s32.totalorder %v4559_v4, %v518_v53  ;;  %vm653_vm5 = vcmp.eq.s32.totalorder %v4566_v7, %v518_v53 }
 0x2a5   : > { %v2189_v2 = vpop.f32.mrf.mxu0 }
 0x2a6   : > { %v2190_v28 = vadd.f32 %v5559_v47, %v2189_v2 }
 0x2a7   : > { %v2191_v43 = vpop.f32.mrf.mxu0  ;;  %v838_v49 = vpop.permute.xlu1 %837 }
 0x2a8   : > { %vm972_vm2 = vcmp.eq.s32.totalorder %v4559_v4, %v838_v49  ;;  %vm973_vm6 = vcmp.eq.s32.totalorder %v4566_v7, %v838_v49  ;;  %v2342_v61 = vmax.f32 %v2190_v28, 0.0 }
 0x2a9   : > { %v2192_v56 = vpop.f32.mrf.mxu0  ;;  %vm1100_vm9 = vmor %vm652_vm7, %vm972_vm2 }
 0x2aa   : > { %v2193_v12 = vadd.f32 %v5559_v47, %v2192_v56  ;;  %vm1101_vm11 = vmor %vm653_vm5, %vm973_vm6 }
 0x2ab   : > { %v2194_v57 = vpop.f32.mrf.mxu0  ;;  %v841_v21 = vpop.permute.xlu1 %840  ;;  %vm5725_vm3 = vmor %vm1100_vm9, %vm1420_vm10 }
 0x2ac   : > { %v2343_v3 = vmax.f32 %v2193_v12, 0.0  ;;  %vm974_vm12 = vcmp.eq.s32.totalorder %v4559_v4, %v841_v21  ;;  %vm975_vm0 = vcmp.eq.s32.totalorder %v4566_v7, %v841_v21  ;;  %vm1549_vm13 = vmor %vm1101_vm11, %vm1421_vm4 }
 0x2ad   : > { %vm1102_vm1 = vmor %vm654_vm8, %vm974_vm12 }
 0x2ae   : > { %v2389_v1 = vpack.c.bf16 %v2343_v3, %v2342_v61  ;;  %vm1103_vm2 = vmor %vm655_vm15, %vm975_vm0  ;;  %vm1424_vm0 = vcmp.eq.s32.totalorder %v4559_v4, %v1292_v0 }
 0x2b0   : > { %3909 = vmatmul.mubr.msk.bf16.gmra.mxu1 %vm2427_vm14, %v2389_v1  ;;  %v1289_v37 = vpop.permute.xlu1 %1288 }
 0x2b1   : > { %vm1422_vm6 = vcmp.eq.s32.totalorder %v4559_v4, %v1289_v37  ;;  %vm1423_vm7 = vcmp.eq.s32.totalorder %v4566_v7, %v1289_v37 }
 0x2b2   : > { %vm1550_vm5 = vmor %vm1102_vm1, %vm1422_vm6  ;;  %vm1425_vm1 = vcmp.eq.s32.totalorder %v4566_v7, %v1292_v0 }
 0x2b3   : > { %vm1551_vm9 = vmor %vm1103_vm2, %vm1423_vm7 }
 0x2b4   : > { %vm3716_vm10 = vmpackc.low %vm1550_vm5, %vm5725_vm3  ;;  %vm658_vm5 = vcmp.eq.s32.totalorder %v4559_v4, %v5684_v30 }
 0x2b5   : > { %vm3714_vm4 = vmpackc.low %vm1551_vm9, %vm1549_vm13  ;;  %v524_v52 = vpop.permute.xlu1 %523 }
 0x2b6   : > { %3715 = vmatprep.mubr.msk.bf16.mxu0 %vm3714_vm4, %v4241_v20  ;;  %vm656_vm12 = vcmp.eq.s32.totalorder %v4559_v4, %v524_v52  ;;  %vm657_vm15 = vcmp.eq.s32.totalorder %v4566_v7, %v524_v52 }
 0x2b7   : > { %3717 = vmatmul.mubr.msk.bf16.gmra.mxu0 %vm3716_vm10, %v4241_v20  ;;  %vm659_vm10 = vcmp.eq.s32.totalorder %v4566_v7, %v5684_v30 }
 0x2b8   : > { %v2197_v48 = vpop.f32.mrf.mxu0 }
 0x2b9   : > { %v2198_v59 = vadd.f32 %v5559_v47, %v2197_v48 }
 0x2ba   : > { %v2199_v62 = vpop.f32.mrf.mxu0  ;;  %v844_v8 = vpop.permute.xlu1 %843 }
 0x2bb   : > { %vm976_vm11 = vcmp.eq.s32.totalorder %v4559_v4, %v844_v8  ;;  %vm977_vm8 = vcmp.eq.s32.totalorder %v4566_v7, %v844_v8  ;;  %v2344_v23 = vmax.f32 %v2198_v59, 0.0  ;;  %v4173_v62 = vld [vmem:[%s6232_s5] sm:$0xff]  }
 0x2bc   : > { %v2200_v60 = vpop.f32.mrf.mxu0  ;;  %vm1104_vm3 = vmor %vm656_vm12, %vm976_vm11  ;;  %3940 = vmatprep.subr.bf16.mxu1 %v4173_v62 }
 0x2bd   : > { %v2201_v11 = vadd.f32 %v5559_v47, %v2200_v60  ;;  %vm1105_vm13 = vmor %vm657_vm15, %vm977_vm8  ;;  %3941 = vmatpush3.bf16.msra.mxu1 %v4173_v62 }
 0x2be   : > { %v2202_v5 = vpop.f32.mrf.mxu0  ;;  %v847_v35 = vpop.permute.xlu1 %846  ;;  %vm5746_vm6 = vmor %vm1104_vm3, %vm1424_vm0 }
 0x2bf   : > { %v2345_v15 = vmax.f32 %v2201_v11, 0.0  ;;  %vm978_vm2 = vcmp.eq.s32.totalorder %v4559_v4, %v847_v35  ;;  %vm979_vm7 = vcmp.eq.s32.totalorder %v4566_v7, %v847_v35  ;;  %vm1553_vm9 = vmor %vm1105_vm13, %vm1425_vm1 }
 0x2c0   : > { %vm1106_vm4 = vmor %vm658_vm5, %vm978_vm2 }
 0x2c1   : > { %v2390_v6 = vpack.c.bf16 %v2345_v15, %v2344_v23  ;;  %vm1107_vm11 = vmor %vm659_vm10, %vm979_vm7  ;;  %vm1428_vm10 = vcmp.eq.s32.totalorder %v4559_v4, %v1298_v46 }
 0x2c3   : > { %3912 = vmatprep.mubr.msk.bf16.mxu1 %vm2427_vm14, %v2390_v6  ;;  %v1295_v17 = vpop.permute.xlu1 %1294 }
 0x2c4   : > { %vm1426_vm8 = vcmp.eq.s32.totalorder %v4559_v4, %v1295_v17  ;;  %vm1427_vm12 = vcmp.eq.s32.totalorder %v4566_v7, %v1295_v17 }
 0x2c5   : > { %vm1554_vm15 = vmor %vm1106_vm4, %vm1426_vm8  ;;  %vm662_vm4 = vcmp.eq.s32.totalorder %v4559_v4, %v533_v9  ;;  %vm1429_vm8 = vcmp.eq.s32.totalorder %v4566_v7, %v1298_v46 }
 0x2c6   : > { %vm1555_vm3 = vmor %vm1107_vm11, %vm1427_vm12 }
 0x2c7   : > { %vm3720_vm0 = vmpackc.low %vm1554_vm15, %vm5746_vm6  ;;  %vm663_vm15 = vcmp.eq.s32.totalorder %v4566_v7, %v533_v9 }
 0x2c8   : > { %vm3718_vm1 = vmpackc.low %vm1555_vm3, %vm1553_vm9  ;;  %v530_v54 = vpop.permute.xlu1 %529 }
 0x2c9   : > { %3719 = vmatprep.mubr.msk.bf16.mxu0 %vm3718_vm1, %v4241_v20  ;;  %vm660_vm7 = vcmp.eq.s32.totalorder %v4559_v4, %v530_v54  ;;  %vm661_vm6 = vcmp.eq.s32.totalorder %v4566_v7, %v530_v54 }
 0x2ca   : > { %3721 = vmatmul.mubr.msk.bf16.gmra.mxu0 %vm3720_vm0, %v4241_v20 }
 0x2cb   : > { %v2205_v19 = vpop.f32.mrf.mxu0 }
 0x2cc   : > { %v2206_v22 = vadd.f32 %v5559_v47, %v2205_v19 }
 0x2cd   : > { %v2207_v10 = vpop.f32.mrf.mxu0  ;;  %v850_v40 = vpop.permute.xlu1 %849 }
 0x2ce   : > { %vm980_vm13 = vcmp.eq.s32.totalorder %v4559_v4, %v850_v40  ;;  %vm981_vm2 = vcmp.eq.s32.totalorder %v4566_v7, %v850_v40  ;;  %v2346_v42 = vmax.f32 %v2206_v22, 0.0 }
 0x2cf   : > { %v2208_v14 = vpop.f32.mrf.mxu0  ;;  %vm1108_vm5 = vmor %vm660_vm7, %vm980_vm13 }
 0x2d0   : > { %v2209_v39 = vadd.f32 %v5559_v47, %v2208_v14  ;;  %vm1109_vm9 = vmor %vm661_vm6, %vm981_vm2 }
 0x2d1   : > { %v2210_v38 = vpop.f32.mrf.mxu0  ;;  %v853_v24 = vpop.permute.xlu1 %852  ;;  %vm5772_vm12 = vmor %vm1108_vm5, %vm1428_vm10 }
 0x2d2   : > { %v2347_v55 = vmax.f32 %v2209_v39, 0.0  ;;  %vm982_vm11 = vcmp.eq.s32.totalorder %v4559_v4, %v853_v24  ;;  %vm983_vm3 = vcmp.eq.s32.totalorder %v4566_v7, %v853_v24  ;;  %vm1557_vm0 = vmor %vm1109_vm9, %vm1429_vm8 }
 0x2d3   : > { %vm1110_vm1 = vmor %vm662_vm4, %vm982_vm11 }
 0x2d4   : > { %v2391_v45 = vpack.c.bf16 %v2347_v55, %v2346_v42  ;;  %vm1111_vm13 = vmor %vm663_vm15, %vm983_vm3  ;;  %vm1432_vm3 = vcmp.eq.s32.totalorder %v4559_v4, %v1304_v34 }
 0x2d6   : > { %3913 = vmatmul.mubr.msk.bf16.gmra.mxu1 %vm2427_vm14, %v2391_v45  ;;  %v1301_v30 = vpop.permute.xlu1 %1300 }
 0x2d7   : > { %vm1430_vm2 = vcmp.eq.s32.totalorder %v4559_v4, %v1301_v30  ;;  %vm1431_vm7 = vcmp.eq.s32.totalorder %v4566_v7, %v1301_v30 }
 0x2d8   : > { %vm1558_vm6 = vmor %vm1110_vm1, %vm1430_vm2  ;;  %vm1433_vm1 = vcmp.eq.s32.totalorder %v4566_v7, %v1304_v34 }
 0x2d9   : > { %vm1559_vm5 = vmor %vm1111_vm13, %vm1431_vm7 }
 0x2da   : > { %vm3724_vm10 = vmpackc.low %vm1558_vm6, %vm5772_vm12  ;;  %vm666_vm6 = vcmp.eq.s32.totalorder %v4559_v4, %v539_v31 }
 0x2db   : > { %vm3722_vm8 = vmpackc.low %vm1559_vm5, %vm1557_vm0  ;;  %v536_v63 = vpop.permute.xlu1 %535 }
 0x2dc   : > { %3723 = vmatprep.mubr.msk.bf16.mxu0 %vm3722_vm8, %v4241_v20  ;;  %vm664_vm11 = vcmp.eq.s32.totalorder %v4559_v4, %v536_v63  ;;  %vm665_vm12 = vcmp.eq.s32.totalorder %v4566_v7, %v536_v63 }
 0x2dd   : > { %3725 = vmatmul.mubr.msk.bf16.gmra.mxu0 %vm3724_vm10, %v4241_v20  ;;  %vm667_vm10 = vcmp.eq.s32.totalorder %v4566_v7, %v539_v31 }
 0x2de   : > { %v2213_v51 = vpop.f32.mrf.mxu0 }
 0x2df   : > { %v2214_v50 = vadd.f32 %v5559_v47, %v2213_v51 }
 0x2e0   : > { %v2215_v58 = vpop.f32.mrf.mxu0  ;;  %v856_v33 = vpop.permute.xlu1 %855 }
 0x2e1   : > { %vm984_vm9 = vcmp.eq.s32.totalorder %v4559_v4, %v856_v33  ;;  %vm985_vm4 = vcmp.eq.s32.totalorder %v4566_v7, %v856_v33  ;;  %v2348_v18 = vmax.f32 %v2214_v50, 0.0 }
 0x2e2   : > { %v2216_v26 = vpop.f32.mrf.mxu0  ;;  %vm1112_vm15 = vmor %vm664_vm11, %vm984_vm9 }
 0x2e3   : > { %v2217_v44 = vadd.f32 %v5559_v47, %v2216_v26  ;;  %vm1113_vm0 = vmor %vm665_vm12, %vm985_vm4 }
 0x2e4   : > { %v2218_v13 = vpop.f32.mrf.mxu0  ;;  %v859_v29 = vpop.permute.xlu1 %858  ;;  %vm5794_vm2 = vmor %vm1112_vm15, %vm1432_vm3 }
 0x2e5   : > { %v2349_v41 = vmax.f32 %v2217_v44, 0.0  ;;  %vm986_vm13 = vcmp.eq.s32.totalorder %v4559_v4, %v859_v29  ;;  %vm987_vm7 = vcmp.eq.s32.totalorder %v4566_v7, %v859_v29  ;;  %vm1561_vm5 = vmor %vm1113_vm0, %vm1433_vm1  ;;  %v5829_v44 = vpop.f32.mrf.mxu1  ;;  %vm2924_vm1 = vcmask 130048  }
 0x2e6   : > { %vm1114_vm8 = vmor %vm666_vm6, %vm986_vm13 }
 0x2e7   : > { %v2392_v53 = vpack.c.bf16 %v2349_v41, %v2348_v18  ;;  %vm1115_vm9 = vmor %vm667_vm10, %vm987_vm7  ;;  %v5831_v29 = vpop.f32.mrf.mxu1 }
 0x2e9   : > { %3916 = vmatprep.mubr.msk.bf16.mxu1 %vm2427_vm14, %v2392_v53  ;;  %v1307_v2 = vpop.permute.xlu1 %1306  ;;  %v5834_v53 = vpop.f32.mrf.mxu1 }
 0x2ea   : > { %vm1434_vm4 = vcmp.eq.s32.totalorder %v4559_v4, %v1307_v2  ;;  %vm1435_vm11 = vcmp.eq.s32.totalorder %v4566_v7, %v1307_v2 }
 0x2eb   : > { %vm1562_vm12 = vmor %vm1114_vm8, %vm1434_vm4 }
 0x2ec   : > { %vm1563_vm15 = vmor %vm1115_vm9, %vm1435_vm11 }
 0x2ed   : > { %vm3726_vm3 = vmpackc.low %vm1563_vm15, %vm1561_vm5 }
 0x2ee   : > { %vm3728_vm0 = vmpackc.low %vm1562_vm12, %vm5794_vm2  ;;  %3727 = vmatprep.mubr.msk.bf16.mxu0 %vm3726_vm3, %v4241_v20 }
 0x2ef   : > { %3729 = vmatmul.mubr.msk.bf16.gmra.mxu0 %vm3728_vm0, %v4241_v20 }
 0x2f1   : > { %v2221_v43 = vpop.f32.mrf.mxu0 }
 0x2f2   : > { %v2222_v28 = vadd.f32 %v5559_v47, %v2221_v43 }
 0x2f3   : > { %v2223_v49 = vpop.f32.mrf.mxu0 }
 0x2f4   : > { %v2350_v12 = vmax.f32 %v2222_v28, 0.0 }
 0x2f5   : > { %v2224_v36 = vpop.f32.mrf.mxu0 }
 0x2f6   : > { %v2225_v56 = vadd.f32 %v5559_v47, %v2224_v36  ;;  %v2561_v36 = vpop.f32.mrf.mxu1 }
 0x2f7   : > { %v2226_v4 = vpop.f32.mrf.mxu0 }
 0x2f8   : > { %v2351_v7 = vmax.f32 %v2225_v56, 0.0  ;;  %v5837_v4 = vpop.f32.mrf.mxu1 }
 0x2fa   : > { %v2393_v57 = vpack.c.bf16 %v2351_v7, %v2350_v12  ;;  %v5840_v12 = vpop.f32.mrf.mxu1 }
 0x2fc   : > { %3917 = vmatmul.mubr.msk.bf16.gmra.mxu1 %vm2427_vm14, %v2393_v57  ;;  %v5842_v7 = vpop.f32.mrf.mxu1 }
 0x304   : > { %v2229_v21 = vpop.f32.mrf.mxu0 }
 0x305   : > { %v2230_v3 = vadd.f32 %v5559_v47, %v2229_v21 }
 0x306   : > { %v2231_v61 = vpop.f32.mrf.mxu0 }
 0x307   : > { %v2352_v37 = vmax.f32 %v2230_v3, 0.0  ;;  %v5844_v61 = vpop.f32.mrf.mxu1 }
 0x308   : > { %v2232_v32 = vpop.f32.mrf.mxu0 }
 0x309   : > { %v2233_v20 = vadd.f32 %v5559_v47, %v2232_v32 }
 0x30a   : > { %v2234_v1 = vpop.f32.mrf.mxu0 }
 0x30b   : > { %v2353_v52 = vmax.f32 %v2233_v20, 0.0  ;;  %v5847_v20 = vpop.f32.mrf.mxu1 }
 0x30d   : > { %v2394_v48 = vpack.c.bf16 %v2353_v52, %v2352_v37  ;;  %v5850_v62 = vpop.f32.mrf.mxu1 }
 0x30f   : > { %3920 = vmatprep.mubr.msk.bf16.mxu1 %vm2427_vm14, %v2394_v48 }
 0x317   : > { %v2237_v8 = vpop.f32.mrf.mxu0 }
 0x318   : > { %v2238_v0 = vadd.f32 %v5559_v47, %v2237_v8 }
 0x319   : > { %v2239_v59 = vpop.f32.mrf.mxu0 }
 0x31a   : > { %v2354_v35 = vmax.f32 %v2238_v0, 0.0  ;;  %v5853_v59 = vpop.f32.mrf.mxu1 }
 0x31b   : > { %v2240_v60 = vpop.f32.mrf.mxu0 }
 0x31c   : > { %v2241_v11 = vadd.f32 %v5559_v47, %v2240_v60  ;;  %v5855_v0 = vpop.f32.mrf.mxu1 }
 0x31d   : > { %v2242_v5 = vpop.f32.mrf.mxu0 }
 0x31e   : > { %v2355_v23 = vmax.f32 %v2241_v11, 0.0  ;;  %v5857_v60 = vpop.f32.mrf.mxu1 }
 0x320   : > { %v2395_v15 = vpack.c.bf16 %v2355_v23, %v2354_v35  ;;  %v5860_v23 = vpop.f32.mrf.mxu1 }
 0x322   : > { %3921 = vmatmul.mubr.msk.bf16.gmra.mxu1 %vm2427_vm14, %v2395_v15 }
 0x32a   : > { %v2245_v16 = vpop.f32.mrf.mxu0 }
 0x32b   : > { %v2246_v17 = vadd.f32 %v5559_v47, %v2245_v16 }
 0x32c   : > { %v2247_v6 = vpop.f32.mrf.mxu0 }
 0x32d   : > { %v2356_v10 = vmax.f32 %v2246_v17, 0.0 }
 0x32e   : > { %v2248_v54 = vpop.f32.mrf.mxu0 }
 0x32f   : > { %v2249_v19 = vadd.f32 %v5559_v47, %v2248_v54 }
 0x330   : > { %v2250_v46 = vpop.f32.mrf.mxu0 }
 0x331   : > { %v2357_v40 = vmax.f32 %v2249_v19, 0.0  ;;  %v5863_v19 = vpop.f32.mrf.mxu1 }
 0x333   : > { %v2396_v22 = vpack.c.bf16 %v2357_v40, %v2356_v10  ;;  %v5866_v10 = vpop.f32.mrf.mxu1 }
 0x335   : > { %3924 = vmatprep.mubr.msk.bf16.mxu1 %vm2427_vm14, %v2396_v22  ;;  %v5868_v40 = vpop.f32.mrf.mxu1 }
 0x337   : > { %v5870_v22 = vpop.f32.mrf.mxu1 }
 0x33d   : > { %v2253_v14 = vpop.f32.mrf.mxu0 }
 0x33e   : > { %v2254_v9 = vadd.f32 %v5559_v47, %v2253_v14 }
 0x33f   : > { %v2255_v39 = vpop.f32.mrf.mxu0 }
 0x340   : > { %v2358_v55 = vmax.f32 %v2254_v9, 0.0  ;;  %v5872_v9 = vpop.f32.mrf.mxu1 }
 0x341   : > { %v2256_v38 = vpop.f32.mrf.mxu0 }
 0x342   : > { %v2257_v24 = vadd.f32 %v5559_v47, %v2256_v38 }
 0x343   : > { %v2258_v42 = vpop.f32.mrf.mxu0 }
 0x344   : > { %v2359_v27 = vmax.f32 %v2257_v24, 0.0 }
 0x346   : > { %v2397_v45 = vpack.c.bf16 %v2359_v27, %v2358_v55  ;;  %v5876_v27 = vpop.f32.mrf.mxu1 }
 0x348   : > { %3925 = vmatmul.mubr.msk.bf16.gmra.mxu1 %vm2427_vm14, %v2397_v45 }
 0x350   : > { %v2261_v30 = vpop.f32.mrf.mxu0 }
 0x351   : > { %v2262_v31 = vadd.f32 %v5559_v47, %v2261_v30 }
 0x352   : > { %v2263_v63 = vpop.f32.mrf.mxu0 }
 0x353   : > { %v2360_v50 = vmax.f32 %v2262_v31, 0.0  ;;  %v5878_v63 = vpop.f32.mrf.mxu1 }
 0x354   : > { %v2264_v51 = vpop.f32.mrf.mxu0 }
 0x355   : > { %v2265_v58 = vadd.f32 %v5559_v47, %v2264_v51  ;;  %v5881_v51 = vpop.f32.mrf.mxu1 }
 0x356   : > { %v2266_v33 = vpop.f32.mrf.mxu0 }
 0x357   : > { %v2361_v34 = vmax.f32 %v2265_v58, 0.0  ;;  %v5883_v58 = vpop.f32.mrf.mxu1 }
 0x359   : > { %v2398_v26 = vpack.c.bf16 %v2361_v34, %v2360_v50  ;;  %v5888_v50 = vld [vmem:[%s6231_s4] ss:$0 sm:$0xff] }
 0x35a   : > { %v2562_v34 = vadd.f32 %v5888_v50, %v2561_v36  ;;  %v2570_v36 = vadd.f32 %v5834_v53, %v5888_v50 }
 0x35b   : > { %3928 = vmatprep.mubr.msk.bf16.mxu1 %vm2427_vm14, %v2398_v26 }
 0x363   : > { %v2269_v13 = vpop.f32.mrf.mxu0 }
 0x364   : > { %v2270_v41 = vadd.f32 %v5559_v47, %v2269_v13  ;;  %v5891_v13 = vpop.f32.mrf.mxu1 }
 0x365   : > { %v2271_v18 = vpop.f32.mrf.mxu0 }
 0x366   : > { %v2362_v49 = vmax.f32 %v2270_v41, 0.0  ;;  %v2559_v41 = vadd.f32 %v5888_v50, %v5831_v29  ;;  %v2578_v29 = vadd.f32 %v5888_v50, %v5844_v61  ;;  %v2586_v61 = vadd.f32 %v5842_v7, %v5888_v50 }
 0x367   : > { %v2272_v25 = vpop.f32.mrf.mxu0 }
 0x368   : > { %v2273_v2 = vadd.f32 %v5559_v47, %v2272_v25 }
 0x369   : > { %v2274_v43 = vpop.f32.mrf.mxu0 }
 0x36a   : > { %v2363_v28 = vmax.f32 %v2273_v2, 0.0  ;;  %v5896_v2 = vpop.f32.mrf.mxu1 }
 0x36c   : > { %v2399_v56 = vpack.c.bf16 %v2363_v28, %v2362_v49  ;;  %v2814_v49 = vmax.f32 %v2562_v34, 0.0 }
 0x36e   : > { %3929 = vmatmul.mubr.msk.bf16.gmra.mxu1 %vm2427_vm14, %v2399_v56 }
 0x377   : > { %v2277_v57 = vpop.f32.mrf.mxu0 }
 0x378   : > { %v2278_v3 = vadd.f32 %v5559_v47, %v2277_v57 }
 0x379   : > { %v2279_v21 = vpop.f32.mrf.mxu0 }
 0x37a   : > { %v2364_v52 = vmax.f32 %v2278_v3, 0.0  ;;  %v2813_v21 = vmax.f32 %v2559_v41, 0.0  ;;  %v5901_v3 = vpop.f32.mrf.mxu1 }
 0x37b   : > { %v2280_v32 = vpop.f32.mrf.mxu0 }
 0x37c   : > { %v2281_v1 = vadd.f32 %v5559_v47, %v2280_v32  ;;  %v5911_v53 = vpop.f32.mrf.mxu1 }
 0x37d   : > { %v2282_v37 = vpop.f32.mrf.mxu0 }
 0x37e   : > { %v2365_v48 = vmax.f32 %v2281_v1, 0.0  ;;  %v2877_v1 = vpack.c.bf16 %v2814_v49, %v2813_v21  ;;  %v2567_v37 = vadd.f32 %v5829_v44, %v5888_v50  ;;  %v2594_v44 = vadd.f32 %v5888_v50, %v5855_v0 }
 0x37f   : > { %v2602_v0 = vadd.f32 %v5853_v59, %v5888_v50  ;;  %v2631_v21 = vadd.f32 %v5868_v40, %v5888_v50 }
 0x380   : > { %v2400_v8 = vpack.c.bf16 %v2365_v48, %v2364_v52  ;;  %v2816_v52 = vmax.f32 %v2570_v36, 0.0  ;;  %v2818_v48 = vmax.f32 %v2578_v29, 0.0 }
 0x381   : > { %v2831_v29 = vmax.f32 %v2631_v21, 0.0 }
 0x382   : > { %3932 = vmatprep.mubr.msk.bf16.mxu1 %vm2427_vm14, %v2400_v8  ;;  %v2815_v8 = vmax.f32 %v2567_v37, 0.0 }
 0x38a   : > { %v2285_v11 = vpop.f32.mrf.mxu0 }
 0x38b   : > { %v2286_v35 = vadd.f32 %v5559_v47, %v2285_v11 }
 0x38c   : > { %v2287_v5 = vpop.f32.mrf.mxu0 }
 0x38d   : > { %v2366_v17 = vmax.f32 %v2286_v35, 0.0  ;;  %v2878_v5 = vpack.c.bf16 %v2816_v52, %v2815_v8  ;;  %v2657_v35 = vpop.f32.mrf.mxu1  ;;  %v2655_v8 = vadd.f32 %v5888_v50, %v5901_v3 }
 0x38e   : > { %v2288_v15 = vpop.f32.mrf.mxu0  ;;  %v2658_v40 = vadd.f32 %v5888_v50, %v2657_v35  ;;  %v2666_v35 = vadd.f32 %v5911_v53, %v5888_v50 }
 0x38f   : > { %v2289_v16 = vadd.f32 %v5559_v47, %v2288_v15 }
 0x390   : > { %v2290_v6 = vpop.f32.mrf.mxu0 }
 0x391   : > { %v2367_v54 = vmax.f32 %v2289_v16, 0.0  ;;  %v5919_v16 = vpop.f32.mrf.mxu1  ;;  %v2591_v6 = vadd.f32 %v5888_v50, %v5850_v62 }
 0x393   : > { %v2401_v46 = vpack.c.bf16 %v2367_v54, %v2366_v17  ;;  %v2820_v17 = vmax.f32 %v2586_v61, 0.0  ;;  %v2822_v54 = vmax.f32 %v2594_v44, 0.0  ;;  %v2837_v44 = vmax.f32 %v2655_v8, 0.0 }
 0x395   : > { %3933 = vmatmul.mubr.msk.bf16.gmra.mxu1 %vm2427_vm14, %v2401_v46  ;;  %v5925_v46 = vpop.f32.mrf.mxu1 }
 0x396   : > { %v2671_v3 = vadd.f32 %v5888_v50, %v5925_v46 }
 0x397   : > { %v5933_v62 = vpop.f32.mrf.mxu1 }
 0x399   : > { %v2673_v59 = vpop.f32.mrf.mxu1 }
 0x39b   : > { %v5941_v34 = vpop.f32.mrf.mxu1 }
 0x39d   : > { %v2293_v14 = vpop.f32.mrf.mxu0 }
 0x39e   : > { %v2294_v38 = vadd.f32 %v5559_v47, %v2293_v14  ;;  %v2821_v14 = vmax.f32 %v2591_v6, 0.0  ;;  %v2663_v6 = vadd.f32 %v5896_v2, %v5888_v50 }
 0x39f   : > { %v2295_v39 = vpop.f32.mrf.mxu0 }
 0x3a0   : > { %v2368_v45 = vmax.f32 %v2294_v38, 0.0  ;;  %v2610_v38 = vadd.f32 %v5888_v50, %v5866_v10  ;;  %v2618_v10 = vadd.f32 %v5863_v19, %v5888_v50 }
 0x3a1   : > { %v2296_v24 = vpop.f32.mrf.mxu0 }
 0x3a2   : > { %v2297_v42 = vadd.f32 %v5559_v47, %v2296_v24  ;;  %v2599_v24 = vadd.f32 %v5847_v20, %v5888_v50  ;;  %v2828_v41 = vmax.f32 %v2618_v10, 0.0 }
 0x3a3   : > { %v2298_v55 = vpop.f32.mrf.mxu0 }
 0x3a4   : > { %v2369_v30 = vmax.f32 %v2297_v42, 0.0  ;;  %v2607_v42 = vadd.f32 %v5888_v50, %v5860_v23  ;;  %v2824_v55 = vmax.f32 %v2602_v0, 0.0  ;;  %v2615_v23 = vadd.f32 %v5857_v60, %v5888_v50 }
 0x3a5   : > { %v2642_v60 = vadd.f32 %v5888_v50, %v5891_v13  ;;  %v2650_v13 = vadd.f32 %v5883_v58, %v5888_v50  ;;  %v2841_v0 = vmax.f32 %v2671_v3, 0.0 }
 0x3a6   : > { %v2402_v31 = vpack.c.bf16 %v2369_v30, %v2368_v45  ;;  %v2826_v45 = vmax.f32 %v2610_v38, 0.0  ;;  %v2823_v30 = vmax.f32 %v2599_v24, 0.0  ;;  %v2827_v19 = vmax.f32 %v2615_v23, 0.0 }
 0x3a8   : > { %3936 = vmatprep.mubr.msk.bf16.mxu1 %vm2427_vm14, %v2402_v31  ;;  %v2825_v31 = vmax.f32 %v2607_v42, 0.0  ;;  %v2679_v42 = vadd.f32 %v5919_v16, %v5888_v50  ;;  %v2695_v16 = vadd.f32 %v5941_v34, %v5888_v50 }
 0x3aa   : > { %v2883_v20 = vpack.c.bf16 %v2826_v45, %v2825_v31 }
 0x3af   : > { %v2301_v33 = vpop.f32.mrf.mxu0 }
 0x3b0   : > { %v2302_v18 = vadd.f32 %v5559_v47, %v2301_v33  ;;  %v2882_v33 = vpack.c.bf16 %v2824_v55, %v2823_v30 }
 0x3b1   : > { %v2303_v26 = vpop.f32.mrf.mxu0 }
 0x3b2   : > { %v2370_v56 = vmax.f32 %v2302_v18, 0.0  ;;  %v2626_v26 = vadd.f32 %v5888_v50, %v5876_v27  ;;  %v2623_v18 = vadd.f32 %v5888_v50, %v5870_v22  ;;  %v2639_v22 = vadd.f32 %v5888_v50, %v5881_v51 }
 0x3b3   : > { %v2304_v25 = vpop.f32.mrf.mxu0 }
 0x3b4   : > { %v2305_v43 = vadd.f32 %v5559_v47, %v2304_v25  ;;  %v2575_v47 = vadd.f32 %v5888_v50, %v5840_v12  ;;  %v2583_v12 = vadd.f32 %v5837_v4, %v5888_v50  ;;  %v2881_v4 = vpack.c.bf16 %v2822_v54, %v2821_v14  ;;  %v2686_v25 = vpop.f32.mrf.mxu1 }
 0x3b5   : > { %v2306_v28 = vpop.f32.mrf.mxu0  ;;  %v2829_v49 = vmax.f32 %v2623_v18, 0.0  ;;  %v2833_v37 = vmax.f32 %v2639_v22, 0.0  ;;  %v2840_v54 = vmax.f32 %v2666_v35, 0.0  ;;  %v2687_v46 = vadd.f32 %v5888_v50, %v2686_v25 }
 0x3b6   : > { %v2371_v57 = vmax.f32 %v2305_v43, 0.0  ;;  %v2817_v11 = vmax.f32 %v2575_v47, 0.0  ;;  %v2819_v7 = vmax.f32 %v2583_v12, 0.0  ;;  %v2830_v43 = vmax.f32 %v2626_v26, 0.0  ;;  %v3911_v27 = vpop.f32.mrf.mxu1 }
 0x3b7   : > { %v2884_v28 = vpack.c.bf16 %v2828_v41, %v2827_v19  ;;  %v2845_v31 = vmax.f32 %v2687_v46, 0.0 }
 0x3b8   : > { %v2403_v32 = vpack.c.bf16 %v2371_v57, %v2370_v56  ;;  %v2879_v15 = vpack.c.bf16 %v2818_v48, %v2817_v11  ;;  %v2880_v39 = vpack.c.bf16 %v2820_v17, %v2819_v7  ;;  %v2634_v56 = vadd.f32 %v5872_v9, %v5888_v50 }
 0x3b9   : > { %v2885_v57 = vpack.c.bf16 %v2830_v43, %v2829_v49  ;;  %v2647_v48 = vadd.f32 %v5878_v63, %v5888_v50  ;;  %v2836_v11 = vmax.f32 %v2650_v13, 0.0  ;;  %v2674_v63 = vadd.f32 %v5888_v50, %v2673_v59 }
 0x3ba   : > { %3937 = vmatmul.mubr.msk.bf16.gmra.mxu1 %vm2427_vm14, %v2403_v32  ;;  %v2832_v36 = vmax.f32 %v2634_v56, 0.0  ;;  %v2689_v32 = vpop.f32.mrf.mxu1  ;;  %v2843_v59 = vmax.f32 %v2679_v42, 0.0  ;;  %v2847_v43 = vmax.f32 %v2695_v16, 0.0 }
 0x3bb   : > { %3942 = vmatprep.mubr.msk.bf16.mxu1 %vm2924_vm1, %v2877_v1  ;;  %v2834_v1 = vmax.f32 %v2642_v60, 0.0  ;;  %v2835_v61 = vmax.f32 %v2647_v48, 0.0  ;;  %v2842_v14 = vmax.f32 %v2674_v63, 0.0  ;;  %v2690_v2 = vadd.f32 %v5888_v50, %v2689_v32 }
 0x3bc   : > { %v5961_v9 = vpop.f32.mrf.mxu1  ;;  %v2886_v47 = vpack.c.bf16 %v2832_v36, %v2831_v29 }
 0x3bd   : > { %v2887_v52 = vpack.c.bf16 %v2834_v1, %v2833_v37  ;;  %v2888_v58 = vpack.c.bf16 %v2836_v11, %v2835_v61  ;;  %v2891_v24 = vpack.c.bf16 %v2842_v14, %v2841_v0  ;;  %v2846_v30 = vmax.f32 %v2690_v2, 0.0 }
 0x3be   : > { %v2702_v51 = vpop.f32.mrf.mxu1  ;;  %v2711_v34 = vadd.f32 %v5961_v9, %v5888_v50 }
 0x3bf   : > { %v2703_v18 = vadd.f32 %v5888_v50, %v2702_v51 }
 0x3c0   : > { %v2851_v32 = vmax.f32 %v2711_v34, 0.0 }
 0x3c1   : > { %v2849_v49 = vmax.f32 %v2703_v18, 0.0 }
 0x3c2   : > { %3943 = vmatmul.mubr.msk.bf16.vlgmr.msra.gmra.mxu1 %vm2924_vm1, %v2878_v5  ;;  %v2838_v5 = vmax.f32 %v2658_v40, 0.0 }
 0x3c3   : > { %3946 = vmatprep.mubr.msk.bf16.mxu1 %vm2924_vm1, %v2879_v15  ;;  %v3915_v15 = vpop.f32.mrf.mxu1 }
 0x3c4   : > { %v2889_v12 = vpack.c.bf16 %v2838_v5, %v2837_v44  ;;  %v2714_v56 = vadd.f32 %v3915_v15, %v5888_v50 }
 0x3c5   : > { %v2705_v17 = vpop.f32.mrf.mxu1 }
 0x3c6   : > { %v2706_v26 = vadd.f32 %v5888_v50, %v2705_v17  ;;  %v2852_v22 = vmax.f32 %v2714_v56, 0.0 }
 0x3c7   : > { %v3918_v7 = vpop.f32.mrf.mxu1 }
 0x3c8   : > { %v2850_v25 = vmax.f32 %v2706_v26, 0.0  ;;  %v2896_v37 = vpack.c.bf16 %v2852_v22, %v2851_v32  ;;  %v2727_v9 = vadd.f32 %v3918_v7, %v5888_v50 }
 0x3c9   : > { %v2718_v38 = vpop.f32.mrf.mxu1 }
 0x3ca   : > { %3947 = vmatmul.mubr.msk.bf16.gmra.mxu1 %vm2924_vm1, %v2880_v39  ;;  %v2839_v39 = vmax.f32 %v2663_v6, 0.0  ;;  %v2719_v21 = vadd.f32 %v5888_v50, %v2718_v38  ;;  %v2855_v61 = vmax.f32 %v2727_v9, 0.0 }
 0x3cb   : > { %3950 = vmatprep.mubr.msk.bf16.mxu1 %vm2924_vm1, %v2881_v4  ;;  %v2682_v4 = vadd.f32 %v5933_v62, %v5888_v50  ;;  %v3919_v45 = vpop.f32.mrf.mxu1  ;;  %v2698_v62 = vadd.f32 %v3911_v27, %v5888_v50  ;;  %v2895_v27 = vpack.c.bf16 %v2850_v25, %v2849_v49 }
 0x3cc   : > { %v2890_v53 = vpack.c.bf16 %v2840_v54, %v2839_v39  ;;  %v2853_v29 = vmax.f32 %v2719_v21, 0.0 }
 0x3cd   : > { %v2844_v55 = vmax.f32 %v2682_v4, 0.0  ;;  %v2721_v10 = vpop.f32.mrf.mxu1  ;;  %v2848_v41 = vmax.f32 %v2698_v62, 0.0 }
 0x3d2   : > { %3951 = vmatmul.mubr.msk.bf16.gmra.mxu1 %vm2924_vm1, %v2882_v33  ;;  %v2892_v33 = vpack.c.bf16 %v2844_v55, %v2843_v59 }
 0x3d3   : > { %3954 = vmatprep.mubr.msk.bf16.mxu1 %vm2924_vm1, %v2883_v20  ;;  %v2893_v20 = vpack.c.bf16 %v2846_v30, %v2845_v31 }
 0x3da   : > { %3955 = vmatmul.mubr.msk.bf16.gmra.mxu1 %vm2924_vm1, %v2884_v28  ;;  %v2894_v28 = vpack.c.bf16 %v2848_v41, %v2847_v43 }
 0x3db   : > { %3958 = vmatprep.mubr.msk.bf16.mxu1 %vm2924_vm1, %v2885_v57  ;;  %v2722_v57 = vadd.f32 %v5888_v50, %v2721_v10 }
 0x3dd   : > { %v2854_v36 = vmax.f32 %v2722_v57, 0.0 }
 0x3e2   : > { %3959 = vmatmul.mubr.msk.bf16.gmra.mxu1 %vm2924_vm1, %v2886_v47  ;;  %v3922_v23 = vpop.f32.mrf.mxu1  ;;  %v2730_v47 = vadd.f32 %v3919_v45, %v5888_v50 }
 0x3e3   : > { %3962 = vmatprep.mubr.msk.bf16.mxu1 %vm2924_vm1, %v2887_v52  ;;  %v2897_v52 = vpack.c.bf16 %v2854_v36, %v2853_v29  ;;  %v2743_v6 = vadd.f32 %v3922_v23, %v5888_v50 }
 0x3e4   : > { %v2734_v19 = vpop.f32.mrf.mxu1  ;;  %v2856_v8 = vmax.f32 %v2730_v47, 0.0 }
 0x3e5   : > { %v2735_v51 = vadd.f32 %v5888_v50, %v2734_v19  ;;  %v2859_v7 = vmax.f32 %v2743_v6, 0.0 }
 0x3e6   : > { %v3923_v60 = vpop.f32.mrf.mxu1 }
 0x3e7   : > { %v2857_v44 = vmax.f32 %v2735_v51, 0.0  ;;  %v2746_v35 = vadd.f32 %v3923_v60, %v5888_v50 }
 0x3e8   : > { %v2737_v1 = vpop.f32.mrf.mxu1 }
 0x3e9   : > { %v2738_v40 = vadd.f32 %v5888_v50, %v2737_v1  ;;  %v2860_v3 = vmax.f32 %v2746_v35, 0.0 }
 0x3ea   : > { %3963 = vmatmul.mubr.msk.bf16.gmra.mxu1 %vm2924_vm1, %v2888_v58  ;;  %v2898_v58 = vpack.c.bf16 %v2856_v8, %v2855_v61 }
 0x3eb   : > { %3966 = vmatprep.mubr.msk.bf16.mxu1 %vm2924_vm1, %v2889_v12  ;;  %v2858_v5 = vmax.f32 %v2738_v40, 0.0  ;;  %v2900_v39 = vpack.c.bf16 %v2860_v3, %v2859_v7 }
 0x3ed   : > { %v2899_v12 = vpack.c.bf16 %v2858_v5, %v2857_v44 }
 0x3f2   : > { %3967 = vmatmul.mubr.msk.bf16.gmra.mxu1 %vm2924_vm1, %v2890_v53 }
 0x3f3   : > { %3970 = vmatprep.mubr.msk.bf16.mxu1 %vm2924_vm1, %v2891_v24 }
 0x3fa   : > { %3971 = vmatmul.mubr.msk.bf16.gmra.mxu1 %vm2924_vm1, %v2892_v33 }
 0x3fb   : > { %3974 = vmatprep.mubr.msk.bf16.mxu1 %vm2924_vm1, %v2893_v20 }
 0x402   : > { %3975 = vmatmul.mubr.msk.bf16.gmra.mxu1 %vm2924_vm1, %v2894_v28 }
 0x403   : > { %3978 = vmatprep.mubr.msk.bf16.mxu1 %vm2924_vm1, %v2895_v27 }
 0x408   : > { %v3926_v13 = vpop.f32.mrf.mxu1 }
 0x409   : > { %v2759_v4 = vadd.f32 %v3926_v13, %v5888_v50 }
 0x40a   : > { %v2750_v48 = vpop.f32.mrf.mxu1  ;;  %3979 = vmatmul.mubr.msk.bf16.gmra.mxu1 %vm2924_vm1, %v2896_v37 }
 0x40b   : > { %3982 = vmatprep.mubr.msk.bf16.mxu1 %vm2924_vm1, %v2897_v52  ;;  %v2751_v17 = vadd.f32 %v5888_v50, %v2750_v48  ;;  %v2863_v24 = vmax.f32 %v2759_v4, 0.0  ;;  %v6041_v52 = vld [vmem:[%s6233_s6] ss:$0 sm:$0xff] }
 0x40c   : > { %v3927_v11 = vpop.f32.mrf.mxu1 }
 0x40d   : > { %v2861_v14 = vmax.f32 %v2751_v17, 0.0  ;;  %v2762_v0 = vadd.f32 %v3927_v11, %v5888_v50 }
 0x40e   : > { %v2753_v15 = vpop.f32.mrf.mxu1 }
 0x40f   : > { %v2754_v63 = vadd.f32 %v5888_v50, %v2753_v15  ;;  %v2864_v38 = vmax.f32 %v2762_v0, 0.0 }
 0x411   : > { %v2862_v54 = vmax.f32 %v2754_v63, 0.0  ;;  %v2902_v2 = vpack.c.bf16 %v2864_v38, %v2863_v24 }
 0x412   : > { %3983 = vmatmul.mubr.msk.bf16.gmra.mxu1 %vm2924_vm1, %v2898_v58 }
 0x413   : > { %3986 = vmatprep.mubr.msk.bf16.mxu1 %vm2924_vm1, %v2899_v12  ;;  %v2901_v53 = vpack.c.bf16 %v2862_v54, %v2861_v14 }
 0x41a   : > { %3987 = vmatmul.mubr.msk.bf16.gmra.mxu1 %vm2924_vm1, %v2900_v39 }
 0x41b   : > { %3990 = vmatprep.mubr.msk.bf16.mxu1 %vm2924_vm1, %v2901_v53 }
 0x422   : > { %3991 = vmatmul.mubr.msk.bf16.gmra.mxu1 %vm2924_vm1, %v2902_v2 }
 0x42e   : > { %v3930_v42 = vpop.f32.mrf.mxu1 }
 0x42f   : > { %v2775_v59 = vadd.f32 %v3930_v42, %v5888_v50 }
 0x430   : > { %v2766_v46 = vpop.f32.mrf.mxu1 }
 0x431   : > { %v2767_v45 = vadd.f32 %v5888_v50, %v2766_v46  ;;  %v2867_v26 = vmax.f32 %v2775_v59, 0.0 }
 0x432   : > { %v3931_v55 = vpop.f32.mrf.mxu1 }
 0x433   : > { %v2778_v30 = vadd.f32 %v3931_v55, %v5888_v50  ;;  %v2865_v10 = vmax.f32 %v2767_v45, 0.0 }
 0x434   : > { %v2769_v31 = vpop.f32.mrf.mxu1 }
 0x435   : > { %v2770_v33 = vadd.f32 %v5888_v50, %v2769_v31  ;;  %v2868_v62 = vmax.f32 %v2778_v30, 0.0 }
 0x437   : > { %v2866_v20 = vmax.f32 %v2770_v33, 0.0  ;;  %v2904_v23 = vpack.c.bf16 %v2868_v62, %v2867_v26 }
 0x439   : > { %v2903_v16 = vpack.c.bf16 %v2866_v20, %v2865_v10 }
 0x43b   : > { %3994 = vmatprep.mubr.msk.bf16.mxu1 %vm2924_vm1, %v2903_v16 }
 0x43c   : > { %3995 = vmatmul.mubr.msk.bf16.gmra.mxu1 %vm2924_vm1, %v2904_v23 }
 0x455   : > { %v3934_v18 = vpop.f32.mrf.mxu1 }
 0x456   : > { %v2791_v49 = vadd.f32 %v3934_v18, %v5888_v50 }
 0x457   : > { %v2782_v41 = vpop.f32.mrf.mxu1 }
 0x458   : > { %v2783_v43 = vadd.f32 %v5888_v50, %v2782_v41  ;;  %v2871_v60 = vmax.f32 %v2791_v49, 0.0 }
 0x459   : > { %v3935_v25 = vpop.f32.mrf.mxu1 }
 0x45a   : > { %v2794_v19 = vadd.f32 %v3935_v25, %v5888_v50  ;;  %v2869_v57 = vmax.f32 %v2783_v43, 0.0 }
 0x45b   : > { %v2785_v28 = vpop.f32.mrf.mxu1 }
 0x45c   : > { %v2786_v56 = vadd.f32 %v5888_v50, %v2785_v28  ;;  %v2872_v27 = vmax.f32 %v2794_v19, 0.0 }
 0x45e   : > { %v2870_v34 = vmax.f32 %v2786_v56, 0.0  ;;  %v2906_v22 = vpack.c.bf16 %v2872_v27, %v2871_v60 }
 0x460   : > { %v2905_v21 = vpack.c.bf16 %v2870_v34, %v2869_v57 }
 0x462   : > { %3998 = vmatprep.mubr.msk.bf16.mxu1 %vm2924_vm1, %v2905_v21 }
 0x463   : > { %3999 = vmatmul.mubr.msk.bf16.gmra.mxu1 %vm2924_vm1, %v2906_v22 }
 0x47a   : > { %v3938_v36 = vpop.f32.mrf.mxu1 }
 0x47b   : > { %v2807_v47 = vadd.f32 %v3938_v36, %v5888_v50 }
 0x47c   : > { %v2798_v32 = vpop.f32.mrf.mxu1 }
 0x47d   : > { %v2799_v29 = vadd.f32 %v5888_v50, %v2798_v32  ;;  %v2875_v5 = vmax.f32 %v2807_v47, 0.0 }
 0x47e   : > { %v3939_v1 = vpop.f32.mrf.mxu1 }
 0x47f   : > { %v2810_v37 = vadd.f32 %v3939_v1, %v5888_v50  ;;  %v2873_v51 = vmax.f32 %v2799_v29, 0.0 }
 0x480   : > { %v2801_v13 = vpop.f32.mrf.mxu1 }
 0x481   : > { %v2802_v40 = vadd.f32 %v5888_v50, %v2801_v13  ;;  %v2876_v9 = vmax.f32 %v2810_v37, 0.0 }
 0x482   : > { %v3944_v48 = vpop.f32.mrf.mxu1 }
 0x483   : > { %v2874_v8 = vmax.f32 %v2802_v40, 0.0  ;;  %v3064_v11 = vadd.f32 %v3944_v48, %v6041_v52  ;;  %v2908_v50 = vpack.c.bf16 %v2876_v9, %v2875_v5 }
 0x484   : > { %v3055_v61 = vpop.f32.mrf.mxu1 }
 0x485   : > { %v2907_v15 = vpack.c.bf16 %v2874_v8, %v2873_v51  ;;  %3312 = vst [vmem:[%s6045_s9 + $0x10] sm:$0xff] %v3064_v11  ;;  %v3056_v44 = vadd.f32 %v6041_v52, %v3055_v61 }
 0x486   : > { %v3945_v58 = vpop.f32.mrf.mxu1 }
 0x487   : > { %3310 = vst [vmem:[%s6045_s9] sm:$0xff] %v3056_v44  ;;  %v3067_v35 = vadd.f32 %v3945_v58, %v6041_v52  ;;  %4002 = vmatprep.mubr.msk.bf16.mxu1 %vm2924_vm1, %v2907_v15 }
 0x488   : > { %v3058_v12 = vpop.f32.mrf.mxu1  ;;  %4003 = vmatmul.mubr.msk.bf16.gmra.mxu1 %vm2924_vm1, %v2908_v50 }
 0x489   : > { %3313 = vst [vmem:[%s6045_s9 + $0x18] sm:$0xff] %v3067_v35  ;;  %v3059_v63 = vadd.f32 %v6041_v52, %v3058_v12 }
 0x48a   : > { %v3948_v6 = vpop.f32.mrf.mxu1 }
 0x48b   : > { %3311 = vst [vmem:[%s6045_s9 + $0x8] sm:$0xff] %v3059_v63  ;;  %v3080_v17 = vadd.f32 %v3948_v6, %v6041_v52 }
 0x48c   : > { %v3071_v3 = vpop.f32.mrf.mxu1 }
 0x48d   : > { %3316 = vst [vmem:[%s6045_s9 + $0x30] sm:$0xff] %v3080_v17  ;;  %v3072_v54 = vadd.f32 %v6041_v52, %v3071_v3 }
 0x48e   : > { %v3949_v7 = vpop.f32.mrf.mxu1 }
 0x48f   : > { %3314 = vst [vmem:[%s6045_s9 + $0x20] sm:$0xff] %v3072_v54  ;;  %v3083_v14 = vadd.f32 %v3949_v7, %v6041_v52 }
 0x490   : > { %v3074_v39 = vpop.f32.mrf.mxu1 }
 0x491   : > { %3317 = vst [vmem:[%s6045_s9 + $0x38] sm:$0xff] %v3083_v14  ;;  %v3075_v0 = vadd.f32 %v6041_v52, %v3074_v39 }
 0x492   : > { %v3952_v53 = vpop.f32.mrf.mxu1 }
 0x493   : > { %3315 = vst [vmem:[%s6045_s9 + $0x28] sm:$0xff] %v3075_v0  ;;  %v3096_v4 = vadd.f32 %v3952_v53, %v6041_v52 }
 0x494   : > { %v3087_v38 = vpop.f32.mrf.mxu1 }
 0x495   : > { %3320 = vst [vmem:[%s6045_s9 + $0x50] sm:$0xff] %v3096_v4  ;;  %v3088_v24 = vadd.f32 %v6041_v52, %v3087_v38 }
 0x496   : > { %v3953_v2 = vpop.f32.mrf.mxu1 }
 0x497   : > { %3318 = vst [vmem:[%s6045_s9 + $0x40] sm:$0xff] %v3088_v24  ;;  %v3099_v42 = vadd.f32 %v3953_v2, %v6041_v52 }
 0x498   : > { %v3090_v46 = vpop.f32.mrf.mxu1 }
 0x499   : > { %3321 = vst [vmem:[%s6045_s9 + $0x58] sm:$0xff] %v3099_v42  ;;  %v3091_v55 = vadd.f32 %v6041_v52, %v3090_v46 }
 0x49a   : > { %v3956_v45 = vpop.f32.mrf.mxu1 }
 0x49b   : > { %3319 = vst [vmem:[%s6045_s9 + $0x48] sm:$0xff] %v3091_v55  ;;  %v3112_v30 = vadd.f32 %v3956_v45, %v6041_v52 }
 0x49c   : > { %v3103_v59 = vpop.f32.mrf.mxu1 }
 0x49d   : > { %3324 = vst [vmem:[%s6045_s9 + $0x70] sm:$0xff] %v3112_v30  ;;  %v3104_v31 = vadd.f32 %v6041_v52, %v3103_v59 }
 0x49e   : > { %v3957_v33 = vpop.f32.mrf.mxu1 }
 0x49f   : > { %3322 = vst [vmem:[%s6045_s9 + $0x60] sm:$0xff] %v3104_v31  ;;  %v3115_v62 = vadd.f32 %v3957_v33, %v6041_v52 }
 0x4a0   : > { %v3106_v10 = vpop.f32.mrf.mxu1 }
 0x4a1   : > { %3325 = vst [vmem:[%s6045_s9 + $0x78] sm:$0xff] %v3115_v62  ;;  %v3107_v20 = vadd.f32 %v6041_v52, %v3106_v10 }
 0x4a2   : > { %v3960_v26 = vpop.f32.mrf.mxu1 }
 0x4a3   : > { %3323 = vst [vmem:[%s6045_s9 + $0x68] sm:$0xff] %v3107_v20  ;;  %v3128_v16 = vadd.f32 %v3960_v26, %v6041_v52 }
 0x4a4   : > { %v3119_v23 = vpop.f32.mrf.mxu1 }
 0x4a5   : > { %3328 = vst [vmem:[%s6045_s9 + $0x90] sm:$0xff] %v3128_v16  ;;  %v3120_v18 = vadd.f32 %v6041_v52, %v3119_v23 }
 0x4a6   : > { %v3961_v41 = vpop.f32.mrf.mxu1 }
 0x4a7   : > { %3326 = vst [vmem:[%s6045_s9 + $0x80] sm:$0xff] %v3120_v18  ;;  %v3131_v25 = vadd.f32 %v3961_v41, %v6041_v52 }
 0x4a8   : > { %v3122_v43 = vpop.f32.mrf.mxu1 }
 0x4a9   : > { %3329 = vst [vmem:[%s6045_s9 + $0x98] sm:$0xff] %v3131_v25  ;;  %v3123_v19 = vadd.f32 %v6041_v52, %v3122_v43 }
 0x4aa   : > { %v3964_v49 = vpop.f32.mrf.mxu1 }
 0x4ab   : > { %3327 = vst [vmem:[%s6045_s9 + $0x88] sm:$0xff] %v3123_v19  ;;  %v3144_v28 = vadd.f32 %v3964_v49, %v6041_v52 }
 0x4ac   : > { %v3135_v56 = vpop.f32.mrf.mxu1 }
 0x4ad   : > { %3332 = vst [vmem:[%s6045_s9 + $0xb0] sm:$0xff] %v3144_v28  ;;  %v3136_v27 = vadd.f32 %v6041_v52, %v3135_v56 }
 0x4ae   : > { %v3965_v57 = vpop.f32.mrf.mxu1 }
 0x4af   : > { %3330 = vst [vmem:[%s6045_s9 + $0xa0] sm:$0xff] %v3136_v27  ;;  %v3147_v34 = vadd.f32 %v3965_v57, %v6041_v52 }
 0x4b0   : > { %v3138_v60 = vpop.f32.mrf.mxu1 }
 0x4b1   : > { %3333 = vst [vmem:[%s6045_s9 + $0xb8] sm:$0xff] %v3147_v34  ;;  %v3139_v21 = vadd.f32 %v6041_v52, %v3138_v60 }
 0x4b2   : > { %v3968_v22 = vpop.f32.mrf.mxu1 }
 0x4b3   : > { %3331 = vst [vmem:[%s6045_s9 + $0xa8] sm:$0xff] %v3139_v21  ;;  %v3160_v36 = vadd.f32 %v3968_v22, %v6041_v52 }
 0x4b4   : > { %v3151_v32 = vpop.f32.mrf.mxu1 }
 0x4b5   : > { %3336 = vst [vmem:[%s6045_s9 + $0xd0] sm:$0xff] %v3160_v36  ;;  %v3152_v1 = vadd.f32 %v6041_v52, %v3151_v32 }
 0x4b6   : > { %v3969_v29 = vpop.f32.mrf.mxu1 }
 0x4b7   : > { %3334 = vst [vmem:[%s6045_s9 + $0xc0] sm:$0xff] %v3152_v1  ;;  %v3163_v37 = vadd.f32 %v3969_v29, %v6041_v52 }
 0x4b8   : > { %v3154_v47 = vpop.f32.mrf.mxu1 }
 0x4b9   : > { %3337 = vst [vmem:[%s6045_s9 + $0xd8] sm:$0xff] %v3163_v37  ;;  %v3155_v13 = vadd.f32 %v6041_v52, %v3154_v47 }
 0x4ba   : > { %v3972_v40 = vpop.f32.mrf.mxu1 }
 0x4bb   : > { %3335 = vst [vmem:[%s6045_s9 + $0xc8] sm:$0xff] %v3155_v13  ;;  %v3176_v9 = vadd.f32 %v3972_v40, %v6041_v52 }
 0x4bc   : > { %v3167_v48 = vpop.f32.mrf.mxu1 }
 0x4bd   : > { %3340 = vst [vmem:[%s6045_s9 + $0xf0] sm:$0xff] %v3176_v9  ;;  %v3168_v51 = vadd.f32 %v6041_v52, %v3167_v48 }
 0x4be   : > { %v3973_v8 = vpop.f32.mrf.mxu1 }
 0x4bf   : > { %3338 = vst [vmem:[%s6045_s9 + $0xe0] sm:$0xff] %v3168_v51  ;;  %v3179_v11 = vadd.f32 %v3973_v8, %v6041_v52 }
 0x4c0   : > { %v3170_v5 = vpop.f32.mrf.mxu1 }
 0x4c1   : > { %3341 = vst [vmem:[%s6045_s9 + $0xf8] sm:$0xff] %v3179_v11  ;;  %v3171_v61 = vadd.f32 %v6041_v52, %v3170_v5 }
 0x4c2   : > { %v3976_v15 = vpop.f32.mrf.mxu1 }
 0x4c3   : > { %3339 = vst [vmem:[%s6045_s9 + $0xe8] sm:$0xff] %v3171_v61  ;;  %v3192_v44 = vadd.f32 %v3976_v15, %v6041_v52 }
 0x4c4   : > { %v3183_v50 = vpop.f32.mrf.mxu1 }
 0x4c5   : > { %3344 = vst [vmem:[%s6045_s9 + $0x110] sm:$0xff] %v3192_v44  ;;  %v3184_v58 = vadd.f32 %v6041_v52, %v3183_v50 }
 0x4c6   : > { %v3977_v35 = vpop.f32.mrf.mxu1 }
 0x4c7   : > { %3342 = vst [vmem:[%s6045_s9 + $0x100] sm:$0xff] %v3184_v58  ;;  %v3195_v12 = vadd.f32 %v3977_v35, %v6041_v52 }
 0x4c8   : > { %v3186_v63 = vpop.f32.mrf.mxu1 }
 0x4c9   : > { %3345 = vst [vmem:[%s6045_s9 + $0x118] sm:$0xff] %v3195_v12  ;;  %v3187_v6 = vadd.f32 %v6041_v52, %v3186_v63 }
 0x4ca   : > { %v3980_v17 = vpop.f32.mrf.mxu1 }
 0x4cb   : > { %3343 = vst [vmem:[%s6045_s9 + $0x108] sm:$0xff] %v3187_v6  ;;  %v3208_v3 = vadd.f32 %v3980_v17, %v6041_v52 }
 0x4cc   : > { %v3199_v54 = vpop.f32.mrf.mxu1 }
 0x4cd   : > { %3348 = vst [vmem:[%s6045_s9 + $0x130] sm:$0xff] %v3208_v3  ;;  %v3200_v7 = vadd.f32 %v6041_v52, %v3199_v54 }
 0x4ce   : > { %v3981_v14 = vpop.f32.mrf.mxu1 }
 0x4cf   : > { %3346 = vst [vmem:[%s6045_s9 + $0x120] sm:$0xff] %v3200_v7  ;;  %v3211_v39 = vadd.f32 %v3981_v14, %v6041_v52 }
 0x4d0   : > { %v3202_v0 = vpop.f32.mrf.mxu1 }
 0x4d1   : > { %3349 = vst [vmem:[%s6045_s9 + $0x138] sm:$0xff] %v3211_v39  ;;  %v3203_v53 = vadd.f32 %v6041_v52, %v3202_v0 }
 0x4d2   : > { %v3984_v4 = vpop.f32.mrf.mxu1 }
 0x4d3   : > { %3347 = vst [vmem:[%s6045_s9 + $0x128] sm:$0xff] %v3203_v53  ;;  %v3224_v38 = vadd.f32 %v3984_v4, %v6041_v52 }
 0x4d4   : > { %v3215_v24 = vpop.f32.mrf.mxu1 }
 0x4d5   : > { %3352 = vst [vmem:[%s6045_s9 + $0x150] sm:$0xff] %v3224_v38  ;;  %v3216_v2 = vadd.f32 %v6041_v52, %v3215_v24 }
 0x4d6   : > { %v3985_v42 = vpop.f32.mrf.mxu1 }
 0x4d7   : > { %3350 = vst [vmem:[%s6045_s9 + $0x140] sm:$0xff] %v3216_v2  ;;  %v3227_v46 = vadd.f32 %v3985_v42, %v6041_v52 }
 0x4d8   : > { %v3218_v55 = vpop.f32.mrf.mxu1 }
 0x4d9   : > { %3353 = vst [vmem:[%s6045_s9 + $0x158] sm:$0xff] %v3227_v46  ;;  %v3219_v45 = vadd.f32 %v6041_v52, %v3218_v55 }
 0x4da   : > { %v3988_v30 = vpop.f32.mrf.mxu1 }
 0x4db   : > { %3351 = vst [vmem:[%s6045_s9 + $0x148] sm:$0xff] %v3219_v45  ;;  %v3240_v59 = vadd.f32 %v3988_v30, %v6041_v52 }
 0x4dc   : > { %v3231_v31 = vpop.f32.mrf.mxu1 }
 0x4dd   : > { %3356 = vst [vmem:[%s6045_s9 + $0x170] sm:$0xff] %v3240_v59  ;;  %v3232_v33 = vadd.f32 %v6041_v52, %v3231_v31 }
 0x4de   : > { %v3989_v62 = vpop.f32.mrf.mxu1 }
 0x4df   : > { %3354 = vst [vmem:[%s6045_s9 + $0x160] sm:$0xff] %v3232_v33  ;;  %v3243_v10 = vadd.f32 %v3989_v62, %v6041_v52 }
 0x4e0   : > { %v3234_v20 = vpop.f32.mrf.mxu1 }
 0x4e1   : > { %3357 = vst [vmem:[%s6045_s9 + $0x178] sm:$0xff] %v3243_v10  ;;  %v3235_v26 = vadd.f32 %v6041_v52, %v3234_v20 }
 0x4e2   : > { %v3992_v16 = vpop.f32.mrf.mxu1 }
 0x4e3   : > { %3355 = vst [vmem:[%s6045_s9 + $0x168] sm:$0xff] %v3235_v26  ;;  %v3256_v23 = vadd.f32 %v3992_v16, %v6041_v52 }
 0x4e4   : > { %v3247_v18 = vpop.f32.mrf.mxu1 }
 0x4e5   : > { %3360 = vst [vmem:[%s6045_s9 + $0x190] sm:$0xff] %v3256_v23  ;;  %v3248_v41 = vadd.f32 %v6041_v52, %v3247_v18 }
 0x4e6   : > { %v3993_v25 = vpop.f32.mrf.mxu1 }
 0x4e7   : > { %3358 = vst [vmem:[%s6045_s9 + $0x180] sm:$0xff] %v3248_v41  ;;  %v3259_v43 = vadd.f32 %v3993_v25, %v6041_v52 }
 0x4e8   : > { %v3250_v19 = vpop.f32.mrf.mxu1 }
 0x4e9   : > { %3361 = vst [vmem:[%s6045_s9 + $0x198] sm:$0xff] %v3259_v43  ;;  %v3251_v49 = vadd.f32 %v6041_v52, %v3250_v19 }
 0x4eb   : > { %3359 = vst [vmem:[%s6045_s9 + $0x188] sm:$0xff] %v3251_v49 }
 0x4fc   : > { %v3996_v28 = vpop.f32.mrf.mxu1 }
 0x4fd   : > { %v3272_v56 = vadd.f32 %v3996_v28, %v6041_v52 }
 0x4fe   : > { %v3263_v27 = vpop.f32.mrf.mxu1 }
 0x4ff   : > { %3364 = vst [vmem:[%s6045_s9 + $0x1b0] sm:$0xff] %v3272_v56  ;;  %v3264_v57 = vadd.f32 %v6041_v52, %v3263_v27 }
 0x500   : > { %v3997_v34 = vpop.f32.mrf.mxu1 }
 0x501   : > { %3362 = vst [vmem:[%s6045_s9 + $0x1a0] sm:$0xff] %v3264_v57  ;;  %v3275_v60 = vadd.f32 %v3997_v34, %v6041_v52 }
 0x502   : > { %v3266_v21 = vpop.f32.mrf.mxu1 }
 0x503   : > { %3365 = vst [vmem:[%s6045_s9 + $0x1b8] sm:$0xff] %v3275_v60  ;;  %v3267_v22 = vadd.f32 %v6041_v52, %v3266_v21 }
 0x505   : > { %3363 = vst [vmem:[%s6045_s9 + $0x1a8] sm:$0xff] %v3267_v22 }
 0x523   : > { %v4000_v36 = vpop.f32.mrf.mxu1 }
 0x524   : > { %v3288_v32 = vadd.f32 %v4000_v36, %v6041_v52 }
 0x525   : > { %v3279_v1 = vpop.f32.mrf.mxu1 }
 0x526   : > { %3368 = vst [vmem:[%s6045_s9 + $0x1d0] sm:$0xff] %v3288_v32  ;;  %v3280_v29 = vadd.f32 %v6041_v52, %v3279_v1 }
 0x527   : > { %v4001_v37 = vpop.f32.mrf.mxu1 }
 0x528   : > { %3366 = vst [vmem:[%s6045_s9 + $0x1c0] sm:$0xff] %v3280_v29  ;;  %v3291_v47 = vadd.f32 %v4001_v37, %v6041_v52 }
 0x529   : > { %v3282_v13 = vpop.f32.mrf.mxu1 }
 0x52a   : > { %3369 = vst [vmem:[%s6045_s9 + $0x1d8] sm:$0xff] %v3291_v47  ;;  %v3283_v40 = vadd.f32 %v6041_v52, %v3282_v13 }
 0x52c   : > { %3367 = vst [vmem:[%s6045_s9 + $0x1c8] sm:$0xff] %v3283_v40 }
 0x548   : > { %v4004_v9 = vpop.f32.mrf.mxu1 }
 0x549   : > { %v3304_v48 = vadd.f32 %v4004_v9, %v6041_v52 }
 0x54a   : > { %v3295_v51 = vpop.f32.mrf.mxu1 }
 0x54b   : > { %3372 = vst [vmem:[%s6045_s9 + $0x1f0] sm:$0xff] %v3304_v48  ;;  %v3296_v8 = vadd.f32 %v6041_v52, %v3295_v51 }
 0x54c   : > { %v4005_v11 = vpop.f32.mrf.mxu1 }
 0x54d   : > { %3370 = vst [vmem:[%s6045_s9 + $0x1e0] sm:$0xff] %v3296_v8  ;;  %v3307_v5 = vadd.f32 %v4005_v11, %v6041_v52 }
 0x54e   : > { %v3298_v61 = vpop.f32.mrf.mxu1 }
 0x54f   : > { %3373 = vst [vmem:[%s6045_s9 + $0x1f8] sm:$0xff] %v3307_v5  ;;  %v3299_v15 = vadd.f32 %v6041_v52, %v3298_v61 }
 0x551   : > { %3371 = vst [vmem:[%s6045_s9 + $0x1e8] sm:$0xff] %v3299_v15 }
 0x552   : > { %4189 = shalt.err (!%p4186_p3)
}
 0x553   : > { %s4190_s22 = scalar_lea.hbm %s6178_s16, 8192  ;;  %s4194_s8 = scalar_lea.hbm %s6234_s7, 16384 }
 0x554   : > { %p4191_p4 = scmp.ne.s32.totalorder %s6178_s16, %s4190_s22  ;;  %p4195_p9 = scmp.lt.s32.totalorder %s6178_s16, %s6234_s7 }
 0x555   : > { %p4196_p10 = scmp.lt.s32.totalorder %s4194_s8, %s4190_s22 }
 0x556   : > { %p4192_p7 = pnand %p4191_p4, %p4323_p5 }
 0x557   : > { %p4197_p11 = por %p4196_p10, %p4195_p9 }
 0x558   : > { %p4193_p8 = pneg %p4192_p7 }
 0x55a   : > { %p4198_p12 = pnand %p4197_p11, %p4193_p8 }
 0x55c   : > { %4201 = shalt.err (!%p4198_p12)
}
 0x55d   : > { %s4243_s15 = smov 128   ;;  %s4244_s21 = smov 8  }
 0x55e   : > { %4006 = dma.vmem_to_hbm [thread:$0]  (%p4323_p5), %s6180_s14, 8192, %s6178_s16, %s6187_s28, %s4243_s15, %s4243_s15, %s4244_s21  }
 0x55f PF: > { %p4012_p13 = scmp.ge.s32.totalorder %s4236_s27, 2  ;;  %s3403_s17 = sand.u32 1, %s4224_s24  }
 0x560   : > { %s3404_s18 = scalar_lea.sflag [#allocation3], %s3403_s17 }
 0x561   : > { %p4009_p0 = pnand %p4012_p13, %p4327_p6 }
 0x563   : > { %p4010_p1 = pneg %p4009_p0 }
 0x565   : > { %4219 = dma.done.wait (%p4010_p1), %s3404_s18, 8192  }
 0x566   : > { %4221 = vsyncadd (%p4010_p1), %s3404_s18, 4294959104  ;;  %p17_p2 = scmp.ge.s32.totalorder %s4310_s30, 4   ;;  %s6325_s24 = smov %s4228_s25 }
 0x567   : > { %s6326_s25 = smov %s4232_s26  ;;  %s6327_s26 = smov %s4321_s10 }
 0x568   : > { %s6328_s27 = smov %s4310_s30  ;;  %19 = sbr.rel (!%p17_p2) target bundleno = 3 (0x3), region = 83 }
 0x56d   :  { %3409 = vsyncpa [#allocation3], 1 }
 0x56e   :  { %3411 = vsyncpa [#allocation3 + $0x1], 1 }

</bundles_post_ra>
